<compile_context>
chip_gen: v7x
topology: tpu7x:2x2x1
jax: 0.10.0
libtpu: 0.0.40
codegen_flags: <defaults>
</compile_context>

<pallas_src>
import functools
import jax
import jax.numpy as jnp
from jax.experimental import pallas as pl
from jax.experimental.pallas import tpu as pltpu


FOCAL_LEVEL = 2
FOCAL_WINDOW = 9
FOCAL_FACTOR = 2
MLP_RATIO = 4.0
GATE_PAD = 128                  # gate projection kept lane-dense (3 real cols of 128)
LN_EPS = 1e-5


# --------------------------------------------------------------------------- #
# generation-aware VMEM budget / tile sizes
# --------------------------------------------------------------------------- #
@functools.lru_cache(maxsize=None)
def _vmem_cap_bytes():
    try:
        return int(pltpu.get_tpu_info().vmem_capacity_bytes)
    except Exception:
        return 128 * 1024 * 1024          # assume v5e/v6e-class if query unavailable


@functools.lru_cache(maxsize=None)
def _vmem_limit_bytes():
    cap = _vmem_cap_bytes()
    # never ask for the full physical VMEM: leave headroom for compiler scratch.
    # 128 MiB parts -> 112 MiB, 64 MiB parts (v7x) -> 48 MiB.
    return int(min(cap - 16 * 1024 * 1024, int(cap * 0.875)))


@functools.lru_cache(maxsize=None)
def _row_tile_tokens():
    # token-row tile for the matmul kernels; smaller on 64 MiB (v7x) parts so the
    # fused MLP hidden (tm x 4C f32) + single-buffered weights fit comfortably.
    return 512 if _vmem_cap_bytes() >= 96 * 1024 * 1024 else 256


def _cp(*sem):
    return pltpu.CompilerParams(dimension_semantics=sem,
                                vmem_limit_bytes=_vmem_limit_bytes())


def _const_spec(shape, index_map=None):
    """BlockSpec for grid-invariant operands (weights / biases): single buffered."""
    imap = index_map if index_map is not None else (lambda *_: (0,) * len(shape))
    try:
        return pl.BlockSpec(shape, imap, pipeline_mode=pl.Buffered(1))
    except (TypeError, AttributeError):      # older jax: fall back to default buffering
        return pl.BlockSpec(shape, imap)


# --------------------------------------------------------------------------- #
# activations / layernorm helpers
# --------------------------------------------------------------------------- #
def _erf(x):
    # Abramowitz-Stegun polynomial, |err| < 1.5e-7 -> matches torch.nn.GELU to fp32 tol.
    a1, a2, a3, a4, a5 = 0.254829592, -0.284496736, 1.421413741, -1.453152027, 1.061405429
    p = 0.3275911
    s = jnp.sign(x)
    ax = jnp.abs(x)
    t = 1.0 / (1.0 + p * ax)
    poly = ((((a5 * t + a4) * t + a3) * t + a2) * t + a1) * t
    return s * (1.0 - poly * jnp.exp(-ax * ax))


def _gelu(x):
    return 0.5 * x * (1.0 + _erf(x * 0.7071067811865476))


def _gelu_tanh(x):
    # tanh-approximate GELU: transcendental goes to the (otherwise idle) EUP.
    # ~1e-3 abs drift vs exact erf; used only for the MLP hidden activation.
    return 0.5 * x * (1.0 + jnp.tanh(0.7978845608028654 * (x + 0.044715 * x * x * x)))


def _layernorm_f32(x, g, b):
    mu = jnp.mean(x, axis=-1, keepdims=True)
    var = jnp.mean(jnp.square(x - mu), axis=-1, keepdims=True)
    return (x - mu) * jax.lax.rsqrt(var + LN_EPS) * g + b


# --------------------------------------------------------------------------- #
# Kernel 1: LayerNorm1 + f projection  ->  q, ctx  (both bf16, lane-dense)
# --------------------------------------------------------------------------- #
def _ln_f_kernel(x_ref, g_ref, b_ref, wq_ref, bq_ref, wc_ref, bc_ref, q_ref, c_ref):
    x = x_ref[...].astype(jnp.float32)
    xn = _layernorm_f32(x, g_ref[...], b_ref[...]).astype(jnp.bfloat16)
    # two separate dots (instead of one (C,2C) dot sliced at column C): both outputs
    # stay lane-dense / unmasked even when C % 128 != 0.
    q_ref[...] = (jnp.dot(xn, wq_ref[...], preferred_element_type=jnp.float32)
                  + bq_ref[...]).astype(q_ref.dtype)
    c_ref[...] = (jnp.dot(xn, wc_ref[...], preferred_element_type=jnp.float32)
                  + bc_ref[...]).astype(c_ref.dtype)


def ln_f(x2d, p):
    M, C = x2d.shape
    tm = min(_row_tile_tokens(), M)
    grid = (pl.cdiv(M, tm),)
    flops = 4 * M * C * C
    bytes_accessed = 4 * M * C + 4 * M * C + 4 * C * C
    return pl.pallas_call(
        _ln_f_kernel,
        out_shape=(jax.ShapeDtypeStruct((M, C), jnp.bfloat16),
                   jax.ShapeDtypeStruct((M, C), jnp.bfloat16)),
        grid=grid,
        in_specs=[pl.BlockSpec((tm, C), lambda i: (i, 0)),
                  _const_spec((1, C)),
                  _const_spec((1, C)),
                  _const_spec((C, C)),
                  _const_spec((1, C)),
                  _const_spec((C, C)),
                  _const_spec((1, C))],
        out_specs=(pl.BlockSpec((tm, C), lambda i: (i, 0)),
                   pl.BlockSpec((tm, C), lambda i: (i, 0))),
        compiler_params=_cp("parallel"),
        cost_estimate=pl.CostEstimate(flops=flops, transcendentals=M,
                                      bytes_accessed=bytes_accessed),
    )(x2d, p['norm1_g'], p['norm1_b'], p['f_wq'], p['f_bq'], p['f_wc'], p['f_bc'])


# --------------------------------------------------------------------------- #
# Kernels 2/3: depthwise conv (SAME, stride 1, bias=False) + GELU, row-tiled with halo.
# Bulk rows arrive through the blocked pipeline; the 2*pad halo rows are fetched with
# manual async DMAs from an ANY-space ref while the bulk copy / halo zeroing runs.
# --------------------------------------------------------------------------- #
def _dw_load_tile(xb_ref, xh_ref, xpad_ref, sem, *, pad, TH, W, woff, ct):
    b = pl.program_id(0)
    c = pl.program_id(1)
    t = pl.program_id(2)
    nt = pl.num_programs(2)
    r0 = t * TH
    THp = xpad_ref.shape[0]
    Wp = xpad_ref.shape[1]

    def _top_copy():
        return pltpu.make_async_copy(
            xh_ref.at[b, pl.ds(r0 - pad, pad), :, pl.ds(c * ct, ct)],
            xpad_ref.at[pl.ds(0, pad), pl.ds(woff, W), :],
            sem.at[0])

    def _bot_copy():
        return pltpu.make_async_copy(
            xh_ref.at[b, pl.ds(r0 + TH, pad), :, pl.ds(c * ct, ct)],
            xpad_ref.at[pl.ds(pad + TH, pad), pl.ds(woff, W), :],
            sem.at[1])

    @pl.when(t > 0)
    def _():
        _top_copy().start()

    @pl.when(t < nt - 1)
    def _():
        _bot_copy().start()

    # zero only the halo frame (left/right margins + out-of-image halo rows), not the
    # whole padded buffer; interior is overwritten by the bulk copy below.
    xpad_ref[:, 0:woff, :] = jnp.zeros((THp, woff, ct), xpad_ref.dtype)
    xpad_ref[:, woff + W:, :] = jnp.zeros((THp, Wp - woff - W, ct), xpad_ref.dtype)

    @pl.when(t == 0)
    def _():
        xpad_ref[0:pad, woff:woff + W, :] = jnp.zeros((pad, W, ct), xpad_ref.dtype)

    @pl.when(t == nt - 1)
    def _():
        xpad_ref[pad + TH:pad + TH + pad, woff:woff + W, :] = jnp.zeros(
            (pad, W, ct), xpad_ref.dtype)

    # bulk rows (blocked, pipelined input) into the interior of the padded buffer.
    xpad_ref[pad:pad + TH, woff:woff + W, :] = xb_ref[0]

    @pl.when(t > 0)
    def _():
        _top_copy().wait()

    @pl.when(t < nt - 1)
    def _():
        _bot_copy().wait()


def _dw_accumulate(xpad_ref, w_ref, acc_ref, *, k, TH, W, woff):
    pad = k // 2
    # accumulate directly from xpad_ref (no shifted scratch buffer / store-back):
    # inner loads are static (possibly sublane-unaligned) ref slices, outer-dim slices
    # along dh are cheap address offsets.
    for dw in range(k):
        a = woff - pad + dw
        part = xpad_ref[0:TH, a:a + W, :].astype(jnp.float32) * w_ref[0, dw, :]
        for dh in range(1, k):
            part = part + xpad_ref[dh:dh + TH, a:a + W, :].astype(jnp.float32) * w_ref[dh, dw, :]
        if dw == 0:
            acc_ref[...] = part
        else:
            acc_ref[...] += part


def _dwconv_gelu_kernel(xb_ref, xh_ref, w_ref, o_ref, acc_ref, xpad_ref, sem,
                        *, k, TH, W, woff, ct):
    _dw_load_tile(xb_ref, xh_ref, xpad_ref, sem, pad=k // 2, TH=TH, W=W, woff=woff, ct=ct)
    _dw_accumulate(xpad_ref, w_ref, acc_ref, k=k, TH=TH, W=W, woff=woff)
    o_ref[...] = _gelu(acc_ref[...])[None].astype(o_ref.dtype)


def _dwconv_gelu_glob_kernel(xb_ref, xh_ref, w_ref, o_ref, glob_ref,
                             acc_ref, xpad_ref, sem, gsum_ref,
                             *, k, TH, W, woff, ct, HW):
    _dw_load_tile(xb_ref, xh_ref, xpad_ref, sem, pad=k // 2, TH=TH, W=W, woff=woff, ct=ct)
    _dw_accumulate(xpad_ref, w_ref, acc_ref, k=k, TH=TH, W=W, woff=woff)
    y = _gelu(acc_ref[...])
    o_ref[...] = y[None].astype(o_ref.dtype)

    # ctx_global = GELU(spatial mean of last-level context), accumulated over the
    # (sequential, "arbitrary") row-tile axis.
    t = pl.program_id(2)
    nt = pl.num_programs(2)

    @pl.when(t == 0)
    def _():
        gsum_ref[...] = jnp.zeros_like(gsum_ref)

    gsum_ref[...] += jnp.sum(y, axis=(0, 1))[None, :]

    @pl.when(t == nt - 1)
    def _():
        glob_ref[...] = _gelu(gsum_ref[...] * (1.0 / HW))[None].astype(glob_ref.dtype)


def _conv_row_tile(H):
    if H <= 64:
        return H
    for cand in (64, 48, 40, 32, 24, 16, 8):
        if H % cand == 0:
            return cand
    # TODO(synk): non-divisible H falls back to full-height tiles; add a masked glob
    # reduction + clamped halo to support arbitrary H with row tiling.
    return H


def _dwconv_call(x, w, *, with_glob):
    B, H, W, C = x.shape
    k = w.shape[0]
    pad = k // 2
    assert pad <= 8, "kernel halo wider than one sublane tile is not supported"
    woff = 8                                 # sublane-aligned left margin (>= pad)
    ct = 128 if C % 128 == 0 else C          # channel tile -> extra parallel grid axis
    nc = C // ct
    TH = _conv_row_tile(H)
    nt = H // TH
    Wp = W + 2 * woff

    scratch = [pltpu.VMEM((TH, W, ct), jnp.float32),          # f32 accumulator
               pltpu.VMEM((TH + 2 * pad, Wp, ct), x.dtype),   # padded tile (bf16)
               pltpu.SemaphoreType.DMA((2,))]
    in_specs = [pl.BlockSpec((1, TH, W, ct), lambda b, c, t: (b, t, 0, c)),
                pl.BlockSpec(memory_space=pl.ANY),            # same array: halo source
                pl.BlockSpec((k, k, ct), lambda b, c, t: (0, 0, c))]
    out_spec_x = pl.BlockSpec((1, TH, W, ct), lambda b, c, t: (b, t, 0, c))
    grid = (B, nc, nt)
    # NOTE(v7x): with B=1, nc=1, nt=1 only one TensorCore is used; realistic backbone
    # resolutions give nt >= 2 so the parallel axes keep both cores busy.
    if with_glob:
        kern = functools.partial(_dwconv_gelu_glob_kernel, k=k, TH=TH, W=W, woff=woff,
                                 ct=ct, HW=float(H * W))
        return pl.pallas_call(
            kern,
            out_shape=(jax.ShapeDtypeStruct((B, H, W, C), x.dtype),
                       jax.ShapeDtypeStruct((B, 1, C), jnp.float32)),
            grid=grid,
            in_specs=in_specs,
            out_specs=(out_spec_x, pl.BlockSpec((1, 1, ct), lambda b, c, t: (b, 0, c))),
            scratch_shapes=scratch + [pltpu.VMEM((1, ct), jnp.float32)],
            compiler_params=_cp("parallel", "parallel", "arbitrary"),
        )(x, x, w)
    kern = functools.partial(_dwconv_gelu_kernel, k=k, TH=TH, W=W, woff=woff, ct=ct)
    return pl.pallas_call(
        kern,
        out_shape=jax.ShapeDtypeStruct((B, H, W, C), x.dtype),
        grid=grid,
        in_specs=in_specs,
        out_specs=out_spec_x,
        scratch_shapes=scratch,
        compiler_params=_cp("parallel", "parallel", "parallel"),
    )(x, x, w)


# --------------------------------------------------------------------------- #
# Kernel 4: gates (recomputed) + combine + h + q*mod + proj + residual
#           + LayerNorm2 + fc1 + tanh-GELU + fc2 + residual   (fused, per-token)
# --------------------------------------------------------------------------- #
def _combine_mlp_kernel(x_ref, q_ref, c1_ref, c2_ref, glob_ref,
                        n1g_ref, n1b_ref, wg_ref, bg_ref,
                        hw_ref, hb_ref, pw_ref, pb_ref,
                        n2g_ref, n2b_ref, w1_ref, b1_ref, w2_ref, b2_ref,
                        o_ref):
    x = x_ref[0].astype(jnp.float32)                         # (tl, C) shortcut
    # gates recomputed in-kernel (cheap LN + tiny CxGATE_PAD dot) instead of a
    # 128-lane padded HBM round trip.
    xn1 = _layernorm_f32(x, n1g_ref[...], n1b_ref[...]).astype(jnp.bfloat16)
    gates = jnp.dot(xn1, wg_ref[...], preferred_element_type=jnp.float32) + bg_ref[...]

    c1 = c1_ref[0].astype(jnp.float32)
    c2 = c2_ref[0].astype(jnp.float32)
    glob = glob_ref[0].astype(jnp.float32)                   # (1, C) = GELU(mean ctx2)
    ctx_all = c1 * gates[:, 0:1] + c2 * gates[:, 1:2] + glob * gates[:, 2:3]

    mod = jnp.dot(ctx_all.astype(jnp.bfloat16), hw_ref[...],
                  preferred_element_type=jnp.float32) + hb_ref[...]
    x_out = q_ref[0].astype(jnp.float32) * mod
    y = jnp.dot(x_out.astype(jnp.bfloat16), pw_ref[...],
                preferred_element_type=jnp.float32) + pb_ref[...]
    x1 = x + y                                               # residual 1 (x_attn)

    xn2 = _layernorm_f32(x1, n2g_ref[...], n2b_ref[...]).astype(jnp.bfloat16)
    h = _gelu_tanh(jnp.dot(xn2, w1_ref[...], preferred_element_type=jnp.float32)
                   + b1_ref[...])
    y2 = jnp.dot(h.astype(jnp.bfloat16), w2_ref[...],
                 preferred_element_type=jnp.float32) + b2_ref[...]
    o_ref[...] = (x1 + y2)[None].astype(o_ref.dtype)


def combine_mlp(x, q, c1, c2, glob, p):
    B, L, C = x.shape
    Hd = p['fc1_w'].shape[1]
    tl = min(_row_tile_tokens(), L)
    grid = (B, pl.cdiv(L, tl))
    tok = lambda b, t: (b, t, 0)
    M = B * L
    flops = 2 * M * C * (GATE_PAD + 10 * C)
    bytes_accessed = 8 * M * C + 6 * M * C + 2 * (C * GATE_PAD + 2 * C * C + 2 * C * Hd)
    return pl.pallas_call(
        _combine_mlp_kernel,
        out_shape=jax.ShapeDtypeStruct((B, L, C), x.dtype),
        grid=grid,
        in_specs=[pl.BlockSpec((1, tl, C), tok),                          # shortcut
                  pl.BlockSpec((1, tl, C), tok),                          # q
                  pl.BlockSpec((1, tl, C), tok),                          # ctx level 0
                  pl.BlockSpec((1, tl, C), tok),                          # ctx level 1
                  pl.BlockSpec((1, 1, C), lambda b, t: (b, 0, 0)),        # global ctx
                  _const_spec((1, C)),                                    # norm1 gamma
                  _const_spec((1, C)),                                    # norm1 beta
                  _const_spec((C, GATE_PAD)),                             # gate weight
                  _const_spec((1, GATE_PAD)),                             # gate bias
                  _const_spec((C, C)),                                    # h weight
                  _const_spec((1, C)),                                    # h bias
                  _const_spec((C, C)),                                    # proj weight
                  _const_spec((1, C)),                                    # proj bias
                  _const_spec((1, C)),                                    # norm2 gamma
                  _const_spec((1, C)),                                    # norm2 beta
                  _const_spec((C, Hd)),                                   # fc1 weight
                  _const_spec((1, Hd)),                                   # fc1 bias
                  _const_spec((Hd, C)),                                   # fc2 weight
                  _const_spec((1, C))],                                   # fc2 bias
        out_specs=pl.BlockSpec((1, tl, C), tok),
        compiler_params=_cp("parallel", "parallel"),
        cost_estimate=pl.CostEstimate(flops=flops, transcendentals=M * (Hd + 2),
                                      bytes_accessed=bytes_accessed),
    )(x, q, c1, c2, glob,
      p['norm1_g'], p['norm1_b'], p['f_wg'], p['f_bg'],
      p['h_w'], p['h_b'], p['proj_w'], p['proj_b'],
      p['norm2_g'], p['norm2_b'], p['fc1_w'], p['fc1_b'], p['fc2_w'], p['fc2_b'])


# --------------------------------------------------------------------------- #
# Module forward (JAX glue around the Pallas kernels)
# --------------------------------------------------------------------------- #
def block_forward(x, H, W, p):
    """FocalModulationBlock, pre-LN path (use_postln=False).  x: (B, L, C) f32."""
    B, L, C = x.shape
    M = B * L
    q, ctx = ln_f(x.reshape(M, C), p)
    ctx1 = _dwconv_call(ctx.reshape(B, H, W, C), p['focal_w'][0], with_glob=False)
    ctx2, glob = _dwconv_call(ctx1, p['focal_w'][1], with_glob=True)
    return combine_mlp(x, q.reshape(B, L, C), ctx1.reshape(B, L, C),
                       ctx2.reshape(B, L, C), glob, p)


def basic_layer_forward(x, H, W, block_params):
    prepared = [p if 'f_wq' in p else prepare_block_params(p) for p in block_params]
    for p in prepared:
        x = block_forward(x, H, W, p)
    # downsample is None -> (x, H, W, x, H, W)
    return x, H, W, x, H, W


# --------------------------------------------------------------------------- #
# Parameters: PyTorch-layout init + one-time repack into kernel layout
# --------------------------------------------------------------------------- #
def init_basic_layer_params(key, dim, depth):
    """Synthetic parameters; shapes follow the PyTorch __init__ (weights stored (in, out))."""
    hidden = int(dim * MLP_RATIO)
    G = FOCAL_LEVEL + 1
    blocks = []
    for _ in range(depth):
        keys = jax.random.split(key, 16)
        key = keys[0]

        def nrm(k, shape, scale=0.02):
            return (scale * jax.random.normal(k, shape)).astype(jnp.float32)

        p = {
            'norm1_g': jnp.ones((dim,), jnp.float32),
            'norm1_b': jnp.zeros((dim,), jnp.float32),
            'norm2_g': jnp.ones((dim,), jnp.float32),
            'norm2_b': jnp.zeros((dim,), jnp.float32),
            'f_w': nrm(keys[1], (dim, 2 * dim + G)),    # FocalModulation.f
            'f_b': nrm(keys[2], (2 * dim + G,)),
            'h_w': nrm(keys[3], (dim, dim)),            # 1x1 conv == per-token linear
            'h_b': nrm(keys[4], (dim,)),
            'proj_w': nrm(keys[5], (dim, dim)),
            'proj_b': nrm(keys[6], (dim,)),
            'fc1_w': nrm(keys[7], (dim, hidden)),
            'fc1_b': nrm(keys[8], (hidden,)),
            'fc2_w': nrm(keys[9], (hidden, dim)),
            'fc2_b': nrm(keys[10], (dim,)),
            # focal_layers[l]: depthwise Conv2d, kernel = focal_factor*l + focal_window
            'focal_w': [nrm(keys[11 + l],
                            (FOCAL_FACTOR * l + FOCAL_WINDOW,
                             FOCAL_FACTOR * l + FOCAL_WINDOW, dim))
                        for l in range(FOCAL_LEVEL)],
        }
        blocks.append(p)
    return blocks


def prepare_block_params(p):
    """Repack into kernel layout: split f into wq / wc / lane-padded gate weights,
    pre-cast matmul weights to bf16 (f32 MXU accumulation in-kernel), biases as (1, N)."""
    dim = p['h_w'].shape[0]
    G = FOCAL_LEVEL + 1
    f_w, f_b = p['f_w'], p['f_b']
    wg = jnp.zeros((dim, GATE_PAD), jnp.float32).at[:, :G].set(f_w[:, 2 * dim:])
    bg = jnp.zeros((GATE_PAD,), jnp.float32).at[:G].set(f_b[2 * dim:])
    return {
        'norm1_g': p['norm1_g'].reshape(1, dim),
        'norm1_b': p['norm1_b'].reshape(1, dim),
        'norm2_g': p['norm2_g'].reshape(1, dim),
        'norm2_b': p['norm2_b'].reshape(1, dim),
        'f_wq': f_w[:, :dim].astype(jnp.bfloat16),
        'f_bq': f_b[:dim].reshape(1, dim),
        'f_wc': f_w[:, dim:2 * dim].astype(jnp.bfloat16),
        'f_bc': f_b[dim:2 * dim].reshape(1, dim),
        'f_wg': wg.astype(jnp.bfloat16),
        'f_bg': bg.reshape(1, GATE_PAD),
        'h_w': p['h_w'].astype(jnp.bfloat16),
        'h_b': p['h_b'].reshape(1, dim),
        'proj_w': p['proj_w'].astype(jnp.bfloat16),
        'proj_b': p['proj_b'].reshape(1, dim),
        'fc1_w': p['fc1_w'].astype(jnp.bfloat16),
        'fc1_b': p['fc1_b'].reshape(1, -1),
        'fc2_w': p['fc2_w'].astype(jnp.bfloat16),
        'fc2_b': p['fc2_b'].reshape(1, dim),
        'focal_w': list(p['focal_w']),   # depthwise weights stay f32 (VPU path)
    }


# --------------------------------------------------------------------------- #
if __name__ == "__main__":
    B, H, W, C = 2, 16, 16, 32
    depth = 2
    key = jax.random.PRNGKey(0)
    kx, kp = jax.random.split(key)
    x = jax.random.normal(kx, (B, H * W, C), jnp.float32)
    params = init_basic_layer_params(kp, C, depth)

    out, oh, ow, out_down, wh, ww = basic_layer_forward(x, H, W, params)
    jax.block_until_ready(out)

    assert out.shape == (B, H * W, C)
    assert out_down.shape == (B, H * W, C)
    assert (oh, ow, wh, ww) == (H, W, H, W)
    assert bool(jnp.isfinite(out).all())
    print("KERNEL_OK")
</pallas_src>

<mosaic_0001>
module attributes {stable_mosaic.version = 11 : i64} {
  func.func @_ln_f_kernel(%arg0: i32, %arg1: memref<512x32xf32, #tpu.memory_space<vmem>>, %arg2: memref<1x32xf32, #tpu.memory_space<vmem>>, %arg3: memref<1x32xf32, #tpu.memory_space<vmem>>, %arg4: memref<32x32xbf16, #tpu.memory_space<vmem>>, %arg5: memref<1x32xf32, #tpu.memory_space<vmem>>, %arg6: memref<32x32xbf16, #tpu.memory_space<vmem>>, %arg7: memref<1x32xf32, #tpu.memory_space<vmem>>, %arg8: memref<512x32xbf16, #tpu.memory_space<vmem>>, %arg9: memref<512x32xbf16, #tpu.memory_space<vmem>>) attributes {dimension_semantics = [#tpu.dimension_semantics<parallel>], iteration_bounds = array<i64: 1>, scalar_prefetch = 0 : i64, scratch_operands = 0 : i64, tpu.core_type = #tpu.core_type<tc>, window_params = [{transform_indices = @transform_0, window_bounds = array<i64: 512, 32>}, {pipeline_mode = #tpu.pipeline_mode<synchronous>, transform_indices = @transform_1, window_bounds = array<i64: 1, 32>}, {pipeline_mode = #tpu.pipeline_mode<synchronous>, transform_indices = @transform_2, window_bounds = array<i64: 1, 32>}, {pipeline_mode = #tpu.pipeline_mode<synchronous>, transform_indices = @transform_3, window_bounds = array<i64: 32, 32>}, {pipeline_mode = #tpu.pipeline_mode<synchronous>, transform_indices = @transform_4, window_bounds = array<i64: 1, 32>}, {pipeline_mode = #tpu.pipeline_mode<synchronous>, transform_indices = @transform_5, window_bounds = array<i64: 32, 32>}, {pipeline_mode = #tpu.pipeline_mode<synchronous>, transform_indices = @transform_6, window_bounds = array<i64: 1, 32>}, {transform_indices = @transform_7, window_bounds = array<i64: 512, 32>}, {transform_indices = @transform_8, window_bounds = array<i64: 512, 32>}]} {
    %c0 = arith.constant 0 : index
    %c0_0 = arith.constant 0 : index
    %0 = vector.load %arg1[%c0, %c0_0] : memref<512x32xf32, #tpu.memory_space<vmem>>, vector<512x32xf32>
    %c0_1 = arith.constant 0 : index
    %c0_2 = arith.constant 0 : index
    %1 = vector.load %arg2[%c0_1, %c0_2] : memref<1x32xf32, #tpu.memory_space<vmem>>, vector<1x32xf32>
    %c0_3 = arith.constant 0 : index
    %c0_4 = arith.constant 0 : index
    %2 = vector.load %arg3[%c0_3, %c0_4] : memref<1x32xf32, #tpu.memory_space<vmem>>, vector<1x32xf32>
    %cst = arith.constant dense<0.000000e+00> : vector<512xf32>
    %3 = vector.multi_reduction <add>, %0, %cst [1] : vector<512x32xf32> to vector<512xf32>
    %4 = vector.shape_cast %3 : vector<512xf32> to vector<512x1xf32>
    %cst_5 = arith.constant 3.200000e+01 : f32
    %5 = vector.broadcast %cst_5 : f32 to vector<512x1xf32>
    %6 = arith.divf %4, %5 : vector<512x1xf32>
    %7 = vector.broadcast %6 : vector<512x1xf32> to vector<512x32xf32>
    %8 = arith.subf %0, %7 : vector<512x32xf32>
    %9 = arith.mulf %8, %8 : vector<512x32xf32>
    %cst_6 = arith.constant dense<0.000000e+00> : vector<512xf32>
    %10 = vector.multi_reduction <add>, %9, %cst_6 [1] : vector<512x32xf32> to vector<512xf32>
    %11 = vector.shape_cast %10 : vector<512xf32> to vector<512x1xf32>
    %cst_7 = arith.constant 3.200000e+01 : f32
    %12 = vector.broadcast %cst_7 : f32 to vector<512x1xf32>
    %13 = arith.divf %11, %12 : vector<512x1xf32>
    %14 = vector.broadcast %6 : vector<512x1xf32> to vector<512x32xf32>
    %15 = arith.subf %0, %14 : vector<512x32xf32>
    %cst_8 = arith.constant 9.99999974E-6 : f32
    %16 = vector.broadcast %cst_8 : f32 to vector<512x1xf32>
    %17 = arith.addf %13, %16 : vector<512x1xf32>
    %18 = math.rsqrt %17 : vector<512x1xf32>
    %19 = vector.broadcast %18 : vector<512x1xf32> to vector<512x32xf32>
    %20 = arith.mulf %15, %19 : vector<512x32xf32>
    %21 = vector.broadcast %1 : vector<1x32xf32> to vector<512x32xf32>
    %22 = arith.mulf %20, %21 : vector<512x32xf32>
    %23 = vector.broadcast %2 : vector<1x32xf32> to vector<512x32xf32>
    %24 = arith.addf %22, %23 : vector<512x32xf32>
    %25 = arith.truncf %24 : vector<512x32xf32> to vector<512x32xbf16>
    %c0_9 = arith.constant 0 : index
    %c0_10 = arith.constant 0 : index
    %26 = vector.load %arg4[%c0_9, %c0_10] : memref<32x32xbf16, #tpu.memory_space<vmem>>, vector<32x32xbf16>
    %cst_11 = arith.constant dense<0.000000e+00> : vector<512x32xf32>
    %27 = tpu.matmul %25, %26, %cst_11 {dimension_numbers = #tpu.dot_dimension_numbers<[1], [0], [0], [1], [0, 0, 1, 1], [], []>} : vector<512x32xbf16>, vector<32x32xbf16>, vector<512x32xf32> -> vector<512x32xf32>
    %c0_12 = arith.constant 0 : index
    %c0_13 = arith.constant 0 : index
    %28 = vector.load %arg5[%c0_12, %c0_13] : memref<1x32xf32, #tpu.memory_space<vmem>>, vector<1x32xf32>
    %29 = vector.broadcast %28 : vector<1x32xf32> to vector<512x32xf32>
    %30 = arith.addf %27, %29 : vector<512x32xf32>
    %31 = arith.truncf %30 : vector<512x32xf32> to vector<512x32xbf16>
    %c0_14 = arith.constant 0 : index
    %c0_15 = arith.constant 0 : index
    %32 = vector.load %arg8[%c0_14, %c0_15] : memref<512x32xbf16, #tpu.memory_space<vmem>>, vector<512x32xbf16>
    tpu.vector_store %arg8[%c0_14, %c0_15], %31 {strides = array<i32>} : memref<512x32xbf16, #tpu.memory_space<vmem>>, vector<512x32xbf16>,
    %c0_16 = arith.constant 0 : index
    %c0_17 = arith.constant 0 : index
    %33 = vector.load %arg6[%c0_16, %c0_17] : memref<32x32xbf16, #tpu.memory_space<vmem>>, vector<32x32xbf16>
    %cst_18 = arith.constant dense<0.000000e+00> : vector<512x32xf32>
    %34 = tpu.matmul %25, %33, %cst_18 {dimension_numbers = #tpu.dot_dimension_numbers<[1], [0], [0], [1], [0, 0, 1, 1], [], []>} : vector<512x32xbf16>, vector<32x32xbf16>, vector<512x32xf32> -> vector<512x32xf32>
    %c0_19 = arith.constant 0 : index
    %c0_20 = arith.constant 0 : index
    %35 = vector.load %arg7[%c0_19, %c0_20] : memref<1x32xf32, #tpu.memory_space<vmem>>, vector<1x32xf32>
    %36 = vector.broadcast %35 : vector<1x32xf32> to vector<512x32xf32>
    %37 = arith.addf %34, %36 : vector<512x32xf32>
    %38 = arith.truncf %37 : vector<512x32xf32> to vector<512x32xbf16>
    %c0_21 = arith.constant 0 : index
    %c0_22 = arith.constant 0 : index
    %39 = vector.load %arg9[%c0_21, %c0_22] : memref<512x32xbf16, #tpu.memory_space<vmem>>, vector<512x32xbf16>
    tpu.vector_store %arg9[%c0_21, %c0_22], %38 {strides = array<i32>} : memref<512x32xbf16, #tpu.memory_space<vmem>>, vector<512x32xbf16>,
    return
  }
  func.func @transform_0(%arg0: i32) -> (i32, i32) {
    %c0_i32 = arith.constant 0 : i32
    %c0_i32_0 = arith.constant 0 : i32
    return %arg0, %c0_i32 : i32, i32
  }
  func.func @transform_1(%arg0: i32) -> (i32, i32) {
    %c0_i32 = arith.constant 0 : i32
    %c0_i32_0 = arith.constant 0 : i32
    %c0_i32_1 = arith.constant 0 : i32
    return %c0_i32, %c0_i32_0 : i32, i32
  }
  func.func @transform_2(%arg0: i32) -> (i32, i32) {
    %c0_i32 = arith.constant 0 : i32
    %c0_i32_0 = arith.constant 0 : i32
    %c0_i32_1 = arith.constant 0 : i32
    return %c0_i32, %c0_i32_0 : i32, i32
  }
  func.func @transform_3(%arg0: i32) -> (i32, i32) {
    %c0_i32 = arith.constant 0 : i32
    %c0_i32_0 = arith.constant 0 : i32
    %c0_i32_1 = arith.constant 0 : i32
    return %c0_i32, %c0_i32_0 : i32, i32
  }
  func.func @transform_4(%arg0: i32) -> (i32, i32) {
    %c0_i32 = arith.constant 0 : i32
    %c0_i32_0 = arith.constant 0 : i32
    %c0_i32_1 = arith.constant 0 : i32
    return %c0_i32, %c0_i32_0 : i32, i32
  }
  func.func @transform_5(%arg0: i32) -> (i32, i32) {
    %c0_i32 = arith.constant 0 : i32
    %c0_i32_0 = arith.constant 0 : i32
    %c0_i32_1 = arith.constant 0 : i32
    return %c0_i32, %c0_i32_0 : i32, i32
  }
  func.func @transform_6(%arg0: i32) -> (i32, i32) {
    %c0_i32 = arith.constant 0 : i32
    %c0_i32_0 = arith.constant 0 : i32
    %c0_i32_1 = arith.constant 0 : i32
    return %c0_i32, %c0_i32_0 : i32, i32
  }
  func.func @transform_7(%arg0: i32) -> (i32, i32) {
    %c0_i32 = arith.constant 0 : i32
    %c0_i32_0 = arith.constant 0 : i32
    return %arg0, %c0_i32 : i32, i32
  }
  func.func @transform_8(%arg0: i32) -> (i32, i32) {
    %c0_i32 = arith.constant 0 : i32
    %c0_i32_0 = arith.constant 0 : i32
    return %arg0, %c0_i32 : i32, i32
  }
}

</mosaic_0001>

<bundles_post_ra>
// kernel: tpu_custom_call.1
= control target key start
LH: loop header
LB: loop body
LE: loop exit
PB: predicated region body
PF: predicated region fallthrough
CT: control target
= control target key end

     0   :  { %14 = vsyncpa [#allocation3], 0  ;;  %s4839_s0 = inlined_call_operand.hbm [shape: f32[512,32], index: 0, kind: input, shape index: {}]   ;;  %s4840_s1 = inlined_call_operand.hbm [shape: f32[1,32], index: 1, kind: input, shape index: {}]   ;;  %s4841_s2 = inlined_call_operand.hbm [shape: f32[1,32], index: 2, kind: input, shape index: {}]   ;;  %s4842_s3 = inlined_call_operand.hbm [shape: bf16[32,32], index: 3, kind: input, shape index: {}]   ;;  %s4843_s4 = inlined_call_operand.hbm [shape: f32[1,32], index: 4, kind: input, shape index: {}]   ;;  %s4844_s5 = inlined_call_operand.hbm [shape: bf16[32,32], index: 5, kind: input, shape index: {}]   ;;  %s4845_s6 = inlined_call_operand.hbm [shape: f32[1,32], index: 6, kind: input, shape index: {}]   ;;  %s4846_s7 = inlined_call_operand.hbm [shape: bf16[512,32], index: 7, kind: output, shape index: {0}]   ;;  %s4847_s8 = inlined_call_operand.hbm [shape: bf16[512,32], index: 8, kind: output, shape index: {1}]  }
   0x1   :  { %15 = vsyncpa [#allocation6], 0 }
   0x2   :  { %16 = vsyncpa [#allocation9], 0 }
   0x3   :  { %17 = vsyncpa [#allocation12], 0 }
   0x4   :  { %18 = vsyncpa [#allocation4], 0 }
   0x5   :  { %19 = vsyncpa [#allocation16], 0  ;;  %s3476_s27 = smov [#allocation5]   ;;  %s3477_s29 = smov [#allocation8]  }
   0x6   :  { %s38_s28 = sshll.u32 %s3476_s27, 4  ;;  %s57_s30 = sshll.u32 %s3477_s29, 4  ;;  %s39_s28 = int_to_ptr.vmem [resolvable:$true] %s38_s28  ;;  %s3534_s30 = int_to_ptr.vmem [resolvable:$true] %s57_s30 }
   0x7   :  { %s3266_s11 = scalar_lea.hbm %s4840_s1, 16 }
   0x8   :  { %p3267_p0 = scmp.ne.s32.totalorder %s4840_s1, %s3266_s11  ;;  %p3270_p1 = scmp.lt.u32.totalorder %s3266_s11, %s4840_s1 }
   0xa   :  { %p3272_p2 = pnand %p3270_p1, %p3267_p0 }
   0xc   :  { %3275 = shalt.err (!%p3272_p2)
}
   0xd   :  { %s3276_s16 = scalar_lea.vmem %s39_s28, 16  ;;  %s3280_s17 = scalar_lea.vmem %s39_s28, 32 }
   0xe   :  { %p3277_p3 = scmp.ne.s32.totalorder %s39_s28, %s3276_s16  ;;  %p3281_p4 = scmp.lt.s32.totalorder %s39_s28, %s39_s28 }
   0xf   :  { %p3282_p5 = scmp.lt.s32.totalorder %s3280_s17, %s3276_s16 }
  0x11   :  { %p3283_p6 = por %p3282_p5, %p3281_p4 }
  0x13   :  { %p3284_p7 = pnand %p3283_p6, %p3277_p3 }
  0x15   :  { %3287 = shalt.err (!%p3284_p7)
}
  0x16   :  { %41 = dma.hbm_to_vmem [thread:$0]  %s4840_s1, 16, %s39_s28, [#allocation6]  }
  0x17   :  { %s3288_s22 = scalar_lea.hbm %s4842_s3, 256 }
  0x18   :  { %p3289_p8 = scmp.ne.s32.totalorder %s4842_s3, %s3288_s22  ;;  %p3292_p9 = scmp.lt.u32.totalorder %s3288_s22, %s4842_s3 }
  0x1a   :  { %p3294_p10 = pnand %p3292_p9, %p3289_p8 }
  0x1c   :  { %3297 = shalt.err (!%p3294_p10)
}
  0x1d   :  { %s3298_s27 = scalar_lea.vmem %s3534_s30, 256  ;;  %p3303_p12 = scmp.lt.s32.totalorder %s3534_s30, %s3534_s30 }
  0x1e   :  { %p3299_p11 = scmp.ne.s32.totalorder %s3534_s30, %s3298_s27  ;;  %p3304_p13 = scmp.lt.s32.totalorder %s3298_s27, %s3298_s27 }
  0x20   :  { %p3305_p0 = por %p3304_p13, %p3303_p12 }
  0x22   :  { %p3306_p1 = pnand %p3305_p0, %p3299_p11 }
  0x24   :  { %3309 = shalt.err (!%p3306_p1)
}
  0x25   :  { %s3478_s1 = smov 64   ;;  %s3479_s28 = smov 4  }
  0x26   :  { %63 = dma.hbm_to_vmem [thread:$0]  %s4842_s3, 256, %s3534_s30, [#allocation9], %s3478_s1, %s3478_s1, %s3479_s28  }
  0x27   :  { %s3480_s10 = smov [#allocation11]   ;;  %s3481_s12 = smov [#allocation2]  }
  0x28   :  { %s79_s11 = sshll.u32 %s3480_s10, 4  ;;  %s25_s13 = sshll.u32 %s3481_s12, 4  ;;  %s80_s11 = int_to_ptr.vmem [resolvable:$true] %s79_s11  ;;  %s3568_s13 = int_to_ptr.vmem [resolvable:$true] %s25_s13 }
  0x29   :  { %s3310_s16 = scalar_lea.hbm %s4844_s5, 256 }
  0x2a   :  { %p3311_p2 = scmp.ne.s32.totalorder %s4844_s5, %s3310_s16  ;;  %p3314_p3 = scmp.lt.u32.totalorder %s3310_s16, %s4844_s5 }
  0x2c   :  { %p3316_p4 = pnand %p3314_p3, %p3311_p2 }
  0x2e   :  { %3319 = shalt.err (!%p3316_p4)
}
  0x2f   :  { %s3320_s3 = scalar_lea.vmem %s80_s11, 256  ;;  %p3325_p6 = scmp.lt.s32.totalorder %s80_s11, %s80_s11 }
  0x30   :  { %p3321_p5 = scmp.ne.s32.totalorder %s80_s11, %s3320_s3  ;;  %p3326_p7 = scmp.lt.s32.totalorder %s3320_s3, %s3320_s3 }
  0x32   :  { %p3327_p8 = por %p3326_p7, %p3325_p6 }
  0x34   :  { %p3328_p9 = pnand %p3327_p8, %p3321_p5 }
  0x36   :  { %3331 = shalt.err (!%p3328_p9)
}
  0x37   :  { %85 = dma.hbm_to_vmem [thread:$0]  %s4844_s5, 256, %s80_s11, [#allocation12], %s3478_s1, %s3478_s1, %s3479_s28  }
  0x38   :  { %s3332_s24 = scalar_lea.hbm %s4839_s0, 8192 }
  0x39   :  { %p3333_p10 = scmp.ne.s32.totalorder %s4839_s0, %s3332_s24  ;;  %p3336_p11 = scmp.lt.u32.totalorder %s3332_s24, %s4839_s0 }
  0x3b   :  { %p3338_p12 = pnand %p3336_p11, %p3333_p10 }
  0x3d   :  { %3341 = shalt.err (!%p3338_p12)
}
  0x3e   :  { %s3342_s9 = scalar_lea.vmem %s3568_s13, 8192  ;;  %p3347_p0 = scmp.lt.s32.totalorder %s3568_s13, %s3568_s13 }
  0x3f   :  { %p3343_p13 = scmp.ne.s32.totalorder %s3568_s13, %s3342_s9  ;;  %p3348_p1 = scmp.lt.s32.totalorder %s3342_s9, %s3342_s9 }
  0x41   :  { %p3349_p2 = por %p3348_p1, %p3347_p0 }
  0x43   :  { %p3350_p3 = pnand %p3349_p2, %p3343_p13 }
  0x45   :  { %3353 = shalt.err (!%p3350_p3)
}
  0x46   :  { %s3482_s5 = smov 128   ;;  %s3483_s10 = smov 8  }
  0x47   :  { %31 = dma.hbm_to_vmem [thread:$0]  %s4839_s0, 8192, %s3568_s13, [#allocation3], %s3482_s5, %s3482_s5, %s3483_s10  }
  0x48   :  { %s3484_s14 = smov [#allocation7]   ;;  %s3485_s16 = smov [#allocation10]  }
  0x49   :  { %s48_s15 = sshll.u32 %s3484_s14, 4  ;;  %s70_s17 = sshll.u32 %s3485_s16, 4  ;;  %s49_s15 = int_to_ptr.vmem [resolvable:$true] %s48_s15  ;;  %s71_s17 = int_to_ptr.vmem [resolvable:$true] %s70_s17 }
  0x4a   :  { %s3354_s20 = scalar_lea.hbm %s4841_s2, 16 }
  0x4b   :  { %p3355_p4 = scmp.ne.s32.totalorder %s4841_s2, %s3354_s20  ;;  %p3358_p5 = scmp.lt.u32.totalorder %s3354_s20, %s4841_s2 }
  0x4d   :  { %p3360_p6 = pnand %p3358_p5, %p3355_p4 }
  0x4f   :  { %3363 = shalt.err (!%p3360_p6)
}
  0x50   :  { %s3364_s0 = scalar_lea.vmem %s49_s15, 16  ;;  %s3368_s13 = scalar_lea.vmem %s49_s15, 32 }
  0x51   :  { %p3365_p7 = scmp.ne.s32.totalorder %s49_s15, %s3364_s0  ;;  %p3369_p8 = scmp.lt.s32.totalorder %s49_s15, %s49_s15 }
  0x52   :  { %p3370_p9 = scmp.lt.s32.totalorder %s3368_s13, %s3364_s0 }
  0x54   :  { %p3371_p10 = por %p3370_p9, %p3369_p8 }
  0x56   :  { %p3372_p11 = pnand %p3371_p10, %p3365_p7 }
  0x58   :  { %3375 = shalt.err (!%p3372_p11)
}
  0x59   :  { %51 = dma.hbm_to_vmem [thread:$0]  %s4841_s2, 16, %s49_s15, [#allocation6]  }
  0x5a   :  { %s3376_s27 = scalar_lea.hbm %s4843_s4, 16 }
  0x5b   :  { %p3377_p12 = scmp.ne.s32.totalorder %s4843_s4, %s3376_s27  ;;  %p3380_p13 = scmp.lt.u32.totalorder %s3376_s27, %s4843_s4 }
  0x5d   :  { %p3382_p0 = pnand %p3380_p13, %p3377_p12 }
  0x5f   :  { %3385 = shalt.err (!%p3382_p0)
}
  0x60   :  { %s3386_s11 = scalar_lea.vmem %s71_s17, 16  ;;  %s3390_s12 = scalar_lea.vmem %s71_s17, 32 }
  0x61   :  { %p3387_p1 = scmp.ne.s32.totalorder %s71_s17, %s3386_s11  ;;  %p3391_p2 = scmp.lt.s32.totalorder %s71_s17, %s71_s17 }
  0x62   :  { %p3392_p3 = scmp.lt.s32.totalorder %s3390_s12, %s3386_s11 }
  0x64   :  { %p3393_p4 = por %p3392_p3, %p3391_p2 }
  0x66   :  { %p3394_p5 = pnand %p3393_p4, %p3387_p1 }
  0x68   :  { %3397 = shalt.err (!%p3394_p5)
}
  0x69   :  { %73 = dma.hbm_to_vmem [thread:$0]  %s4843_s4, 16, %s71_s17, [#allocation9]  }
  0x6a   :  { %s3486_s15 = smov [#allocation13]   ;;  %s3398_s20 = scalar_lea.hbm %s4845_s6, 16 }
  0x6b   :  { %s92_s16 = sshll.u32 %s3486_s15, 4  ;;  %p3399_p6 = scmp.ne.s32.totalorder %s4845_s6, %s3398_s20  ;;  %s93_s16 = int_to_ptr.vmem [resolvable:$true] %s92_s16 }
  0x6c   :  { %p3402_p7 = scmp.lt.u32.totalorder %s3398_s20, %s4845_s6 }
  0x6e   :  { %p3404_p8 = pnand %p3402_p7, %p3399_p6 }
  0x70   :  { %3407 = shalt.err (!%p3404_p8)
}
  0x71   :  { %s3408_s0 = scalar_lea.vmem %s93_s16, 16  ;;  %s3412_s4 = scalar_lea.vmem %s93_s16, 32 }
  0x72   :  { %p3409_p9 = scmp.ne.s32.totalorder %s93_s16, %s3408_s0  ;;  %p3413_p10 = scmp.lt.s32.totalorder %s93_s16, %s93_s16 }
  0x73   :  { %p3414_p11 = scmp.lt.s32.totalorder %s3412_s4, %s3408_s0 }
  0x75   :  { %p3415_p12 = por %p3414_p11, %p3413_p10 }
  0x77   :  { %p3416_p13 = pnand %p3415_p12, %p3409_p9 }
  0x79   :  { %3419 = shalt.err (!%p3416_p13)
}
  0x7a   :  { %95 = dma.hbm_to_vmem [thread:$0]  %s4845_s6, 16, %s93_s16, [#allocation12]  }
  0x7b   :  { %3464 = dma.done.wait [#allocation3], 8192  }
  0x7c   :  { %3465 = vsyncadd [#allocation3], 4294959104 }
  0x7d   :  { %3466 = dma.done.wait [#allocation6], 32  }
  0x7e   :  { %3467 = vsyncadd [#allocation6], 4294967264 }
  0x7f   :  { %3468 = dma.done.wait [#allocation9], 272  }
  0x80   :  { %3469 = vsyncadd [#allocation9], 4294967024 }
  0x81   :  { %3470 = dma.done.wait [#allocation12], 272  }
  0x82   :  { %3471 = vsyncadd [#allocation12], 4294967024  ;;  %vm184_vm0 = vcmask 261120   ;;  %v3638_v0 = vld [vmem:[#allocation2] sm:$0xff]  ;;  %v3640_v1 = vld [vmem:[#allocation2 + $0x10] sm:$0xff]  ;;  %vm1854_vm1 = vcmask 257024  }
  0x83   :  { %v3642_v2 = vld [vmem:[#allocation2 + $0x8] sm:$0xff]  ;;  %v185_v3 = vsel %vm184_vm0, %v3638_v0, 0.0  ;;  %v191_v4 = vsel %vm184_vm0, %v3640_v1, 0.0  ;;  %v3648_v5 = vld [vmem:[#allocation2 + $0x18] sm:$0xff]  ;;  %v3654_v8 = vld [vmem:[#allocation2 + $0x20] sm:$0xff]  ;;  %s3487_s6 = smov [#allocation14]  }
  0x84   :  { %186 = vadd.xlane.f32.xlu0 %v185_v3  ;;  %192 = vadd.xlane.f32.xlu1 %v191_v4  ;;  %v188_v6 = vsel %vm184_vm0, %v3642_v2, 0.0  ;;  %v194_v7 = vsel %vm184_vm0, %v3648_v5, 0.0  ;;  %v3656_v9 = vld [vmem:[#allocation2 + $0x28] sm:$0xff]  ;;  %v197_v10 = vsel %vm184_vm0, %v3654_v8, 0.0  ;;  %v3662_v12 = vld [vmem:[#allocation2 + $0x30] sm:$0xff]  ;;  %v3664_v13 = vld [vmem:[#allocation2 + $0x38] sm:$0xff] }
  0x85   :  { %v200_v11 = vsel %vm184_vm0, %v3656_v9, 0.0  ;;  %v203_v14 = vsel %vm184_vm0, %v3662_v12, 0.0  ;;  %v206_v15 = vsel %vm184_vm0, %v3664_v13, 0.0  ;;  %v3670_v16 = vld [vmem:[#allocation2 + $0x40] sm:$0xff]  ;;  %v3672_v17 = vld [vmem:[#allocation2 + $0x48] sm:$0xff]  ;;  %v3678_v20 = vld [vmem:[#allocation2 + $0x50] sm:$0xff] }
  0x86   :  { %v209_v18 = vsel %vm184_vm0, %v3670_v16, 0.0  ;;  %v212_v19 = vsel %vm184_vm0, %v3672_v17, 0.0  ;;  %v3680_v21 = vld [vmem:[#allocation2 + $0x58] sm:$0xff]  ;;  %v215_v22 = vsel %vm184_vm0, %v3678_v20, 0.0  ;;  %v3686_v24 = vld [vmem:[#allocation2 + $0x60] sm:$0xff]  ;;  %v3688_v25 = vld [vmem:[#allocation2 + $0x68] sm:$0xff] }
  0x87   :  { %v218_v23 = vsel %vm184_vm0, %v3680_v21, 0.0  ;;  %v221_v26 = vsel %vm184_vm0, %v3686_v24, 0.0  ;;  %v224_v27 = vsel %vm184_vm0, %v3688_v25, 0.0  ;;  %v3694_v28 = vld [vmem:[#allocation2 + $0x70] sm:$0xff]  ;;  %v3696_v29 = vld [vmem:[#allocation2 + $0x78] sm:$0xff]  ;;  %v3702_v32 = vld [vmem:[#allocation2 + $0x80] sm:$0xff] }
  0x88   :  { %189 = vadd.xlane.f32.xlu0 %v188_v6  ;;  %195 = vadd.xlane.f32.xlu1 %v194_v7  ;;  %v227_v30 = vsel %vm184_vm0, %v3694_v28, 0.0  ;;  %v230_v31 = vsel %vm184_vm0, %v3696_v29, 0.0  ;;  %v3704_v33 = vld [vmem:[#allocation2 + $0x88] sm:$0xff]  ;;  %v233_v34 = vsel %vm184_vm0, %v3702_v32, 0.0  ;;  %v3710_v36 = vld [vmem:[#allocation2 + $0x90] sm:$0xff]  ;;  %v3712_v37 = vld [vmem:[#allocation2 + $0x98] sm:$0xff] }
  0x89   :  { %v236_v35 = vsel %vm184_vm0, %v3704_v33, 0.0  ;;  %v239_v38 = vsel %vm184_vm0, %v3710_v36, 0.0  ;;  %v242_v39 = vsel %vm184_vm0, %v3712_v37, 0.0  ;;  %v3718_v40 = vld [vmem:[#allocation2 + $0xa0] sm:$0xff]  ;;  %v3720_v41 = vld [vmem:[#allocation2 + $0xa8] sm:$0xff]  ;;  %v3726_v44 = vld [vmem:[#allocation2 + $0xb0] sm:$0xff] }
  0x8a   :  { %v245_v42 = vsel %vm184_vm0, %v3718_v40, 0.0  ;;  %v248_v43 = vsel %vm184_vm0, %v3720_v41, 0.0  ;;  %v3728_v45 = vld [vmem:[#allocation2 + $0xb8] sm:$0xff]  ;;  %v251_v46 = vsel %vm184_vm0, %v3726_v44, 0.0  ;;  %v3734_v48 = vld [vmem:[#allocation2 + $0xc0] sm:$0xff]  ;;  %v3736_v49 = vld [vmem:[#allocation2 + $0xc8] sm:$0xff] }
  0x8b   :  { %v254_v47 = vsel %vm184_vm0, %v3728_v45, 0.0  ;;  %v257_v50 = vsel %vm184_vm0, %v3734_v48, 0.0  ;;  %v260_v51 = vsel %vm184_vm0, %v3736_v49, 0.0  ;;  %v3742_v52 = vld [vmem:[#allocation2 + $0xd0] sm:$0xff]  ;;  %v3744_v53 = vld [vmem:[#allocation2 + $0xd8] sm:$0xff]  ;;  %v3750_v56 = vld [vmem:[#allocation2 + $0xe0] sm:$0xff] }
  0x8c   :  { %198 = vadd.xlane.f32.xlu0 %v197_v10  ;;  %201 = vadd.xlane.f32.xlu1 %v200_v11  ;;  %v263_v54 = vsel %vm184_vm0, %v3742_v52, 0.0  ;;  %v266_v55 = vsel %vm184_vm0, %v3744_v53, 0.0  ;;  %v3752_v57 = vld [vmem:[#allocation2 + $0xe8] sm:$0xff]  ;;  %v269_v58 = vsel %vm184_vm0, %v3750_v56, 0.0  ;;  %v3758_v60 = vld [vmem:[#allocation2 + $0xf0] sm:$0xff]  ;;  %v3760_v61 = vld [vmem:[#allocation2 + $0xf8] sm:$0xff] }
  0x8d   :  { %v272_v59 = vsel %vm184_vm0, %v3752_v57, 0.0  ;;  %v275_v62 = vsel %vm184_vm0, %v3758_v60, 0.0  ;;  %v278_v63 = vsel %vm184_vm0, %v3760_v61, 0.0  ;;  %v3766_v3 = vld [vmem:[#allocation2 + $0x100] sm:$0xff]  ;;  %v3768_v4 = vld [vmem:[#allocation2 + $0x108] sm:$0xff]  ;;  %v3774_v10 = vld [vmem:[#allocation2 + $0x110] sm:$0xff] }
  0x8e   :  { %v281_v6 = vsel %vm184_vm0, %v3766_v3, 0.0  ;;  %v284_v7 = vsel %vm184_vm0, %v3768_v4, 0.0  ;;  %v3776_v11 = vld [vmem:[#allocation2 + $0x118] sm:$0xff]  ;;  %s2556_s23 = sshll.u32 %s3487_s6, 4  ;;  %s3488_s24 = smov [#allocation15]   ;;  %s2557_s23 = int_to_ptr.vmem [resolvable:$true] %s2556_s23 }
  0x8f   :  { %s2568_s25 = sshll.u32 %s3488_s24, 4  ;;  %s3420_s26 = scalar_lea.vmem %s2557_s23, 4096  ;;  %s4800_s25 = int_to_ptr.vmem [resolvable:$true] %s2568_s25 }
  0x90   :  { %204 = vadd.xlane.f32.xlu0 %v203_v14  ;;  %207 = vadd.xlane.f32.xlu1 %v206_v15  ;;  %v287_v14 = vsel %vm184_vm0, %v3774_v10, 0.0  ;;  %v290_v15 = vsel %vm184_vm0, %v3776_v11, 0.0  ;;  %p3421_p0 = scmp.ne.s32.totalorder %s2557_s23, %s3420_s26  ;;  %p3425_p1 = scmp.lt.s32.totalorder %s2557_s23, %s2557_s23 }
  0x91   :  { %p3426_p2 = scmp.lt.s32.totalorder %s3420_s26, %s3420_s26 }
  0x93   :  { %p3427_p3 = por %p3426_p2, %p3425_p1 }
  0x94   :  { %210 = vadd.xlane.f32.xlu0 %v209_v18  ;;  %213 = vadd.xlane.f32.xlu1 %v212_v19  ;;  %v3782_v18 = vld [vmem:[#allocation2 + $0x120] sm:$0xff]  ;;  %v3784_v19 = vld [vmem:[#allocation2 + $0x128] sm:$0xff] }
  0x95   :  { %p3428_p4 = pnand %p3427_p3, %p3421_p0 }
  0x98   :  { %216 = vadd.xlane.f32.xlu0 %v215_v22  ;;  %219 = vadd.xlane.f32.xlu1 %v218_v23  ;;  %v293_v22 = vsel %vm184_vm0, %v3782_v18, 0.0  ;;  %v296_v23 = vsel %vm184_vm0, %v3784_v19, 0.0 }
  0x9c   :  { %222 = vadd.xlane.f32.xlu0 %v221_v26  ;;  %225 = vadd.xlane.f32.xlu1 %v224_v27  ;;  %v3790_v26 = vld [vmem:[#allocation2 + $0x130] sm:$0xff]  ;;  %v3792_v27 = vld [vmem:[#allocation2 + $0x138] sm:$0xff] }
  0xa0   :  { %228 = vadd.xlane.f32.xlu0 %v227_v30  ;;  %231 = vadd.xlane.f32.xlu1 %v230_v31  ;;  %v299_v30 = vsel %vm184_vm0, %v3790_v26, 0.0  ;;  %v302_v31 = vsel %vm184_vm0, %v3792_v27, 0.0 }
  0xa4   :  { %234 = vadd.xlane.f32.xlu0 %v233_v34  ;;  %237 = vadd.xlane.f32.xlu1 %v236_v35  ;;  %v3798_v34 = vld [vmem:[#allocation2 + $0x140] sm:$0xff]  ;;  %v3800_v35 = vld [vmem:[#allocation2 + $0x148] sm:$0xff] }
  0xa8   :  { %240 = vadd.xlane.f32.xlu0 %v239_v38  ;;  %243 = vadd.xlane.f32.xlu1 %v242_v39  ;;  %v305_v38 = vsel %vm184_vm0, %v3798_v34, 0.0  ;;  %v308_v39 = vsel %vm184_vm0, %v3800_v35, 0.0 }
  0xac   :  { %246 = vadd.xlane.f32.xlu0 %v245_v42  ;;  %249 = vadd.xlane.f32.xlu1 %v248_v43  ;;  %v3806_v42 = vld [vmem:[#allocation2 + $0x150] sm:$0xff]  ;;  %v3808_v43 = vld [vmem:[#allocation2 + $0x158] sm:$0xff] }
  0xb0   :  { %252 = vadd.xlane.f32.xlu0 %v251_v46  ;;  %255 = vadd.xlane.f32.xlu1 %v254_v47  ;;  %v311_v46 = vsel %vm184_vm0, %v3806_v42, 0.0  ;;  %v314_v47 = vsel %vm184_vm0, %v3808_v43, 0.0 }
  0xb4   :  { %258 = vadd.xlane.f32.xlu0 %v257_v50  ;;  %261 = vadd.xlane.f32.xlu1 %v260_v51  ;;  %v3814_v50 = vld [vmem:[#allocation2 + $0x160] sm:$0xff]  ;;  %v3816_v51 = vld [vmem:[#allocation2 + $0x168] sm:$0xff] }
  0xb8   :  { %264 = vadd.xlane.f32.xlu0 %v263_v54  ;;  %267 = vadd.xlane.f32.xlu1 %v266_v55  ;;  %v317_v54 = vsel %vm184_vm0, %v3814_v50, 0.0  ;;  %v320_v55 = vsel %vm184_vm0, %v3816_v51, 0.0 }
  0xbc   :  { %270 = vadd.xlane.f32.xlu0 %v269_v58  ;;  %273 = vadd.xlane.f32.xlu1 %v272_v59  ;;  %v3822_v58 = vld [vmem:[#allocation2 + $0x170] sm:$0xff]  ;;  %v3824_v59 = vld [vmem:[#allocation2 + $0x178] sm:$0xff] }
  0xc0   :  { %276 = vadd.xlane.f32.xlu0 %v275_v62  ;;  %279 = vadd.xlane.f32.xlu1 %v278_v63  ;;  %v323_v62 = vsel %vm184_vm0, %v3822_v58, 0.0  ;;  %v326_v63 = vsel %vm184_vm0, %v3824_v59, 0.0 }
  0xc4   :  { %282 = vadd.xlane.f32.xlu0 %v281_v6  ;;  %285 = vadd.xlane.f32.xlu1 %v284_v7  ;;  %v3830_v6 = vld [vmem:[#allocation2 + $0x180] sm:$0xff]  ;;  %v3832_v7 = vld [vmem:[#allocation2 + $0x188] sm:$0xff] }
  0xc8   :  { %288 = vadd.xlane.f32.xlu0 %v287_v14  ;;  %291 = vadd.xlane.f32.xlu1 %v290_v15  ;;  %v329_v14 = vsel %vm184_vm0, %v3830_v6, 0.0  ;;  %v332_v15 = vsel %vm184_vm0, %v3832_v7, 0.0 }
  0xcc   :  { %294 = vadd.xlane.f32.xlu0 %v293_v22  ;;  %297 = vadd.xlane.f32.xlu1 %v296_v23  ;;  %v3838_v22 = vld [vmem:[#allocation2 + $0x190] sm:$0xff]  ;;  %v3840_v23 = vld [vmem:[#allocation2 + $0x198] sm:$0xff] }
  0xcd   :  { %4878 = vst [vmem:[#allocation23_spill] sm:$0xff] %v3838_v22  ;;  %4879 = vst [vmem:[#allocation24_spill] sm:$0xff] %v3840_v23 }
  0xd0   :  { %300 = vadd.xlane.f32.xlu0 %v299_v30  ;;  %303 = vadd.xlane.f32.xlu1 %v302_v31  ;;  %v335_v30 = vsel %vm184_vm0, %v3838_v22, 0.0  ;;  %v338_v31 = vsel %vm184_vm0, %v3840_v23, 0.0 }
  0xd4   :  { %306 = vadd.xlane.f32.xlu0 %v305_v38  ;;  %309 = vadd.xlane.f32.xlu1 %v308_v39  ;;  %v3846_v38 = vld [vmem:[#allocation2 + $0x1a0] sm:$0xff]  ;;  %v3848_v39 = vld [vmem:[#allocation2 + $0x1a8] sm:$0xff] }
  0xd5   :  { %4880 = vst [vmem:[#allocation25_spill] sm:$0xff] %v3846_v38  ;;  %4881 = vst [vmem:[#allocation26_spill] sm:$0xff] %v3848_v39 }
  0xd8   :  { %312 = vadd.xlane.f32.xlu0 %v311_v46  ;;  %315 = vadd.xlane.f32.xlu1 %v314_v47  ;;  %v341_v46 = vsel %vm184_vm0, %v3846_v38, 0.0  ;;  %v344_v47 = vsel %vm184_vm0, %v3848_v39, 0.0 }
  0xdc   :  { %318 = vadd.xlane.f32.xlu0 %v317_v54  ;;  %321 = vadd.xlane.f32.xlu1 %v320_v55  ;;  %v3854_v54 = vld [vmem:[#allocation2 + $0x1b0] sm:$0xff]  ;;  %v3856_v55 = vld [vmem:[#allocation2 + $0x1b8] sm:$0xff] }
  0xdd   :  { %4882 = vst [vmem:[#allocation27_spill] sm:$0xff] %v3854_v54  ;;  %4883 = vst [vmem:[#allocation28_spill] sm:$0xff] %v3856_v55 }
  0xe0   :  { %324 = vadd.xlane.f32.xlu0 %v323_v62  ;;  %327 = vadd.xlane.f32.xlu1 %v326_v63  ;;  %v347_v62 = vsel %vm184_vm0, %v3854_v54, 0.0  ;;  %v350_v63 = vsel %vm184_vm0, %v3856_v55, 0.0 }
  0xe4   :  { %330 = vadd.xlane.f32.xlu0 %v329_v14  ;;  %333 = vadd.xlane.f32.xlu1 %v332_v15  ;;  %v3862_v14 = vld [vmem:[#allocation2 + $0x1c0] sm:$0xff]  ;;  %v3864_v15 = vld [vmem:[#allocation2 + $0x1c8] sm:$0xff] }
  0xe5   :  { %4884 = vst [vmem:[#allocation29_spill] sm:$0xff] %v3862_v14  ;;  %4885 = vst [vmem:[#allocation30_spill] sm:$0xff] %v3864_v15 }
  0xe8   :  { %336 = vadd.xlane.f32.xlu0 %v335_v30  ;;  %339 = vadd.xlane.f32.xlu1 %v338_v31  ;;  %v353_v30 = vsel %vm184_vm0, %v3862_v14, 0.0  ;;  %v356_v31 = vsel %vm184_vm0, %v3864_v15, 0.0 }
  0xec   :  { %342 = vadd.xlane.f32.xlu0 %v341_v46  ;;  %345 = vadd.xlane.f32.xlu1 %v344_v47  ;;  %v3870_v46 = vld [vmem:[#allocation2 + $0x1d0] sm:$0xff]  ;;  %v3872_v47 = vld [vmem:[#allocation2 + $0x1d8] sm:$0xff] }
  0xed   :  { %4886 = vst [vmem:[#allocation31_spill] sm:$0xff] %v3870_v46  ;;  %v359_v55 = vsel %vm184_vm0, %v3870_v46, 0.0  ;;  %v362_v54 = vsel %vm184_vm0, %v3872_v47, 0.0 }
  0xf0   :  { %348 = vadd.xlane.f32.xlu0 %v347_v62  ;;  %351 = vadd.xlane.f32.xlu1 %v350_v63 }
  0xf4   :  { %354 = vadd.xlane.f32.xlu0 %v353_v30  ;;  %357 = vadd.xlane.f32.xlu1 %v356_v31 }
  0xf8   :  { %360 = vadd.xlane.f32.xlu0 %v359_v55  ;;  %363 = vadd.xlane.f32.xlu1 %v362_v54 }
 0x111   :  { %v187_v62 = vpop.xlane.xlu0 %186  ;;  %v193_v63 = vpop.xlane.xlu1 %192 }
 0x112   :  { %v378_v14 = vmul.f32 0.03125, %v187_v62  ;;  %v380_v39 = vmul.f32 0.03125, %v193_v63 }
 0x114   :  { %v3879_v15 = vsub.f32 %v3638_v0, %v378_v14  ;;  %v3882_v38 = vsub.f32 %v3640_v1, %v380_v39 }
 0x115   :  { %v190_v30 = vpop.xlane.xlu0 %189  ;;  %v196_v31 = vpop.xlane.xlu1 %195 }
 0x116   :  { %4887 = vst [vmem:[#allocation32_spill] sm:$0xff] %v3882_v38  ;;  %v379_v23 = vmul.f32 0.03125, %v190_v30  ;;  %v381_v22 = vmul.f32 0.03125, %v196_v31  ;;  %v506_v46 = vmul.f32 %v3879_v15, %v3879_v15  ;;  %v508_v54 = vmul.f32 %v3882_v38, %v3882_v38 }
 0x118   :  { %v3889_v55 = vsub.f32 %v3642_v2, %v379_v23  ;;  %v3892_v62 = vsub.f32 %v3648_v5, %v381_v22  ;;  %v570_v0 = vsel %vm184_vm0, %v506_v46, 0.0  ;;  %v576_v14 = vsel %vm184_vm0, %v508_v54, 0.0 }
 0x119   :  { %571 = vadd.xlane.f32.xlu0 %v570_v0  ;;  %v199_v1 = vpop.xlane.xlu0 %198  ;;  %v202_v39 = vpop.xlane.xlu1 %201 }
 0x11a   :  { %v382_v63 = vmul.f32 0.03125, %v199_v1  ;;  %v383_v30 = vmul.f32 0.03125, %v202_v39  ;;  %v507_v31 = vmul.f32 %v3889_v55, %v3889_v55  ;;  %v509_v38 = vmul.f32 %v3892_v62, %v3892_v62 }
 0x11c   :  { %v3901_v2 = vsub.f32 %v3654_v8, %v382_v63  ;;  %v3904_v5 = vsub.f32 %v3656_v9, %v383_v30  ;;  %v573_v22 = vsel %vm184_vm0, %v507_v31, 0.0  ;;  %v579_v54 = vsel %vm184_vm0, %v509_v38, 0.0 }
 0x11d   :  { %577 = vadd.xlane.f32.xlu0 %v576_v14  ;;  %574 = vadd.xlane.f32.xlu1 %v573_v22  ;;  %v205_v23 = vpop.xlane.xlu0 %204  ;;  %v208_v46 = vpop.xlane.xlu1 %207 }
 0x11e   :  { %v384_v0 = vmul.f32 0.03125, %v205_v23  ;;  %v385_v1 = vmul.f32 0.03125, %v208_v46  ;;  %v510_v39 = vmul.f32 %v3901_v2, %v3901_v2  ;;  %v511_v8 = vmul.f32 %v3904_v5, %v3904_v5 }
 0x120   :  { %v3913_v63 = vsub.f32 %v3662_v12, %v384_v0  ;;  %v3916_v9 = vsub.f32 %v3664_v13, %v385_v1  ;;  %v582_v14 = vsel %vm184_vm0, %v510_v39, 0.0  ;;  %v585_v31 = vsel %vm184_vm0, %v511_v8, 0.0 }
 0x121   :  { %580 = vadd.xlane.f32.xlu1 %v579_v54  ;;  %583 = vadd.xlane.f32.xlu0 %v582_v14  ;;  %v211_v30 = vpop.xlane.xlu0 %210  ;;  %v214_v38 = vpop.xlane.xlu1 %213 }
 0x122   :  { %v386_v22 = vmul.f32 0.03125, %v211_v30  ;;  %v387_v23 = vmul.f32 0.03125, %v214_v38  ;;  %v512_v46 = vmul.f32 %v3913_v63, %v3913_v63  ;;  %v513_v12 = vmul.f32 %v3916_v9, %v3916_v9 }
 0x124   :  { %v3925_v0 = vsub.f32 %v3670_v16, %v386_v22  ;;  %v3928_v13 = vsub.f32 %v3672_v17, %v387_v23  ;;  %v588_v54 = vsel %vm184_vm0, %v512_v46, 0.0  ;;  %v591_v8 = vsel %vm184_vm0, %v513_v12, 0.0 }
 0x125   :  { %586 = vadd.xlane.f32.xlu1 %v585_v31  ;;  %589 = vadd.xlane.f32.xlu0 %v588_v54  ;;  %v217_v1 = vpop.xlane.xlu0 %216  ;;  %v220_v39 = vpop.xlane.xlu1 %219 }
 0x126   :  { %v388_v14 = vmul.f32 0.03125, %v217_v1  ;;  %v389_v30 = vmul.f32 0.03125, %v220_v39  ;;  %v514_v38 = vmul.f32 %v3925_v0, %v3925_v0  ;;  %v515_v16 = vmul.f32 %v3928_v13, %v3928_v13 }
 0x128   :  { %v3937_v22 = vsub.f32 %v3678_v20, %v388_v14  ;;  %v3940_v17 = vsub.f32 %v3680_v21, %v389_v30  ;;  %v594_v31 = vsel %vm184_vm0, %v514_v38, 0.0  ;;  %v597_v12 = vsel %vm184_vm0, %v515_v16, 0.0 }
 0x129   :  { %592 = vadd.xlane.f32.xlu1 %v591_v8  ;;  %595 = vadd.xlane.f32.xlu0 %v594_v31  ;;  %v223_v23 = vpop.xlane.xlu0 %222  ;;  %v226_v46 = vpop.xlane.xlu1 %225 }
 0x12a   :  { %v390_v54 = vmul.f32 0.03125, %v223_v23  ;;  %v391_v1 = vmul.f32 0.03125, %v226_v46  ;;  %v516_v39 = vmul.f32 %v3937_v22, %v3937_v22  ;;  %v517_v20 = vmul.f32 %v3940_v17, %v3940_v17 }
 0x12c   :  { %v3949_v14 = vsub.f32 %v3686_v24, %v390_v54  ;;  %v3952_v21 = vsub.f32 %v3688_v25, %v391_v1  ;;  %v600_v8 = vsel %vm184_vm0, %v516_v39, 0.0  ;;  %v603_v16 = vsel %vm184_vm0, %v517_v20, 0.0 }
 0x12d   :  { %598 = vadd.xlane.f32.xlu1 %v597_v12  ;;  %601 = vadd.xlane.f32.xlu0 %v600_v8  ;;  %v229_v30 = vpop.xlane.xlu0 %228  ;;  %v232_v38 = vpop.xlane.xlu1 %231 }
 0x12e   :  { %v392_v31 = vmul.f32 0.03125, %v229_v30  ;;  %v393_v23 = vmul.f32 0.03125, %v232_v38  ;;  %v518_v46 = vmul.f32 %v3949_v14, %v3949_v14  ;;  %v519_v24 = vmul.f32 %v3952_v21, %v3952_v21 }
 0x130   :  { %v3961_v54 = vsub.f32 %v3694_v28, %v392_v31  ;;  %v3964_v25 = vsub.f32 %v3696_v29, %v393_v23  ;;  %v606_v12 = vsel %vm184_vm0, %v518_v46, 0.0  ;;  %v609_v20 = vsel %vm184_vm0, %v519_v24, 0.0 }
 0x131   :  { %604 = vadd.xlane.f32.xlu1 %v603_v16  ;;  %607 = vadd.xlane.f32.xlu0 %v606_v12  ;;  %v235_v1 = vpop.xlane.xlu0 %234  ;;  %v238_v39 = vpop.xlane.xlu1 %237 }
 0x132   :  { %v394_v8 = vmul.f32 0.03125, %v235_v1  ;;  %v395_v30 = vmul.f32 0.03125, %v238_v39  ;;  %v520_v38 = vmul.f32 %v3961_v54, %v3961_v54  ;;  %v521_v28 = vmul.f32 %v3964_v25, %v3964_v25 }
 0x134   :  { %v3973_v31 = vsub.f32 %v3702_v32, %v394_v8  ;;  %v3976_v29 = vsub.f32 %v3704_v33, %v395_v30  ;;  %v612_v16 = vsel %vm184_vm0, %v520_v38, 0.0  ;;  %v615_v24 = vsel %vm184_vm0, %v521_v28, 0.0 }
 0x135   :  { %610 = vadd.xlane.f32.xlu1 %v609_v20  ;;  %613 = vadd.xlane.f32.xlu0 %v612_v16  ;;  %v241_v23 = vpop.xlane.xlu0 %240  ;;  %v244_v46 = vpop.xlane.xlu1 %243 }
 0x136   :  { %v396_v12 = vmul.f32 0.03125, %v241_v23  ;;  %v397_v1 = vmul.f32 0.03125, %v244_v46  ;;  %v522_v39 = vmul.f32 %v3973_v31, %v3973_v31  ;;  %v523_v32 = vmul.f32 %v3976_v29, %v3976_v29 }
 0x138   :  { %v3985_v8 = vsub.f32 %v3710_v36, %v396_v12  ;;  %v3988_v33 = vsub.f32 %v3712_v37, %v397_v1  ;;  %v618_v20 = vsel %vm184_vm0, %v522_v39, 0.0  ;;  %v621_v28 = vsel %vm184_vm0, %v523_v32, 0.0 }
 0x139   :  { %616 = vadd.xlane.f32.xlu1 %v615_v24  ;;  %619 = vadd.xlane.f32.xlu0 %v618_v20  ;;  %v247_v30 = vpop.xlane.xlu0 %246  ;;  %v250_v38 = vpop.xlane.xlu1 %249  ;;  %v3132_v20 = vld [vmem:[#allocation8] sm:$0xff]  }
 0x13a   :  { %4888 = vst [vmem:[#allocation33_spill] sm:$0xff] %v3985_v8  ;;  %4889 = vst [vmem:[#allocation34_spill] sm:$0xff] %v3988_v33  ;;  %v398_v16 = vmul.f32 0.03125, %v247_v30  ;;  %v399_v23 = vmul.f32 0.03125, %v250_v38  ;;  %v524_v46 = vmul.f32 %v3985_v8, %v3985_v8  ;;  %v525_v36 = vmul.f32 %v3988_v33, %v3988_v33  ;;  %v3133_v30 = vld [vmem:[#allocation11] sm:$0xff]   ;;  %2983 = vmatprep.subr.bf16.mxu0 %v3132_v20 }
 0x13b   :  { %3051 = vmatprep.subr.bf16.mxu1 %v3133_v30  ;;  %2984 = vmatpush3.bf16.msra.mxu0 %v3132_v20 }
 0x13c   :  { %v3997_v12 = vsub.f32 %v3718_v40, %v398_v16  ;;  %v4000_v37 = vsub.f32 %v3720_v41, %v399_v23  ;;  %v624_v24 = vsel %vm184_vm0, %v524_v46, 0.0  ;;  %v627_v1 = vsel %vm184_vm0, %v525_v36, 0.0  ;;  %v4008_v41 = vld [vmem:[#allocation2 + $0x1e0] sm:$0xff]  ;;  %3052 = vmatpush3.bf16.msra.mxu1 %v3133_v30 }
 0x13d   :  { %622 = vadd.xlane.f32.xlu1 %v621_v28  ;;  %625 = vadd.xlane.f32.xlu0 %v624_v24  ;;  %v253_v39 = vpop.xlane.xlu0 %252  ;;  %v256_v32 = vpop.xlane.xlu1 %255  ;;  %v365_v23 = vsel %vm184_vm0, %v4008_v41, 0.0  ;;  %v3134_v24 = vld [vmem:[#allocation8 + $0x8] sm:$0xff]  }
 0x13e   :  { %4890 = vst [vmem:[#allocation35_spill] sm:$0xff] %v4000_v37  ;;  %v526_v38 = vmul.f32 %v3997_v12, %v3997_v12  ;;  %v400_v33 = vmul.f32 0.03125, %v253_v39  ;;  %v401_v8 = vmul.f32 0.03125, %v256_v32  ;;  %v527_v40 = vmul.f32 %v4000_v37, %v4000_v37  ;;  %v3135_v39 = vld [vmem:[#allocation11 + $0x8] sm:$0xff]   ;;  %2985 = vmatprep.subr.bf16.mxu0 %v3134_v24 }
 0x13f   :  { %3053 = vmatprep.subr.bf16.mxu1 %v3135_v39  ;;  %2986 = vmatpush3.bf16.msra.mxu0 %v3134_v24 }
 0x140   :  { %v630_v28 = vsel %vm184_vm0, %v526_v38, 0.0  ;;  %v4012_v16 = vsub.f32 %v3726_v44, %v400_v33  ;;  %v4017_v32 = vsub.f32 %v3728_v45, %v401_v8  ;;  %v633_v37 = vsel %vm184_vm0, %v527_v40, 0.0  ;;  %v4020_v38 = vld [vmem:[#allocation2 + $0x1e8] sm:$0xff]  ;;  %3054 = vmatpush3.bf16.msra.mxu1 %v3135_v39 }
 0x141   :  { %628 = vadd.xlane.f32.xlu1 %v627_v1  ;;  %631 = vadd.xlane.f32.xlu0 %v630_v28  ;;  %v259_v46 = vpop.xlane.xlu0 %258  ;;  %v262_v36 = vpop.xlane.xlu1 %261  ;;  %v368_v1 = vsel %vm184_vm0, %v4020_v38, 0.0 }
 0x142   :  { %4891 = vst [vmem:[#allocation36_spill] sm:$0xff] %v4012_v16  ;;  %4892 = vst [vmem:[#allocation37_spill] sm:$0xff] %v4017_v32  ;;  %v528_v44 = vmul.f32 %v4012_v16, %v4012_v16  ;;  %v402_v33 = vmul.f32 0.03125, %v259_v46  ;;  %v403_v20 = vmul.f32 0.03125, %v262_v36  ;;  %v529_v28 = vmul.f32 %v4017_v32, %v4017_v32  ;;  %v4032_v46 = vld [vmem:[#allocation2 + $0x1f0] sm:$0xff]  ;;  %v4043_v32 = vld [vmem:[#allocation2 + $0x1f8] sm:$0xff] }
 0x144   :  { %v636_v30 = vsel %vm184_vm0, %v528_v44, 0.0  ;;  %v4028_v40 = vsub.f32 %v3734_v48, %v402_v33  ;;  %v639_v48 = vsel %vm184_vm0, %v529_v28, 0.0 }
 0x145   :  { %634 = vadd.xlane.f32.xlu1 %v633_v37  ;;  %366 = vadd.xlane.f32.xlu0 %v365_v23  ;;  %v265_v45 = vpop.xlane.xlu0 %264  ;;  %v268_v8 = vpop.xlane.xlu1 %267  ;;  %v4035_v37 = vsub.f32 %v3736_v49, %v403_v20  ;;  %v371_v23 = vsel %vm184_vm0, %v4032_v46, 0.0  ;;  %v374_v20 = vsel %vm184_vm0, %v4043_v32, 0.0 }
 0x146   :  { %v404_v24 = vmul.f32 0.03125, %v265_v45  ;;  %v405_v36 = vmul.f32 0.03125, %v268_v8 }
 0x147   :  { %4893 = vst [vmem:[#allocation38_spill] sm:$0xff] %v4035_v37 }
 0x148   :  { %v4041_v33 = vsub.f32 %v3742_v52, %v404_v24  ;;  %v4048_v49 = vsub.f32 %v3744_v53, %v405_v36 }
 0x149   :  { %369 = vadd.xlane.f32.xlu1 %v368_v1  ;;  %637 = vadd.xlane.f32.xlu0 %v636_v30  ;;  %v271_v39 = vpop.xlane.xlu0 %270  ;;  %v274_v44 = vpop.xlane.xlu1 %273  ;;  %v530_v1 = vmul.f32 %v4028_v40, %v4028_v40  ;;  %v531_v30 = vmul.f32 %v4035_v37, %v4035_v37 }
 0x14a   :  { %v406_v45 = vmul.f32 0.03125, %v271_v39  ;;  %v407_v8 = vmul.f32 0.03125, %v274_v44 }
 0x14b   :  { %v642_v24 = vsel %vm184_vm0, %v530_v1, 0.0  ;;  %v645_v36 = vsel %vm184_vm0, %v531_v30, 0.0 }
 0x14c   :  { %v4056_v16 = vsub.f32 %v3750_v56, %v406_v45  ;;  %v4061_v53 = vsub.f32 %v3752_v57, %v407_v8 }
 0x14d   :  { %640 = vadd.xlane.f32.xlu1 %v639_v48  ;;  %372 = vadd.xlane.f32.xlu0 %v371_v23  ;;  %v277_v52 = vpop.xlane.xlu0 %276  ;;  %v280_v28 = vpop.xlane.xlu1 %279  ;;  %v532_v23 = vmul.f32 %v4041_v33, %v4041_v33  ;;  %v533_v48 = vmul.f32 %v4048_v49, %v4048_v49 }
 0x14e   :  { %v408_v39 = vmul.f32 0.03125, %v277_v52  ;;  %v409_v44 = vmul.f32 0.03125, %v280_v28  ;;  %v535_v28 = vmul.f32 %v4061_v53, %v4061_v53 }
 0x14f   :  { %v648_v56 = vsel %vm184_vm0, %v532_v23, 0.0  ;;  %v651_v8 = vsel %vm184_vm0, %v533_v48, 0.0 }
 0x150   :  { %v4068_v45 = vsub.f32 %v3758_v60, %v408_v39  ;;  %v4073_v57 = vsub.f32 %v3760_v61, %v409_v44  ;;  %v657_v44 = vsel %vm184_vm0, %v535_v28, 0.0 }
 0x151   :  { %375 = vadd.xlane.f32.xlu1 %v374_v20  ;;  %643 = vadd.xlane.f32.xlu0 %v642_v24  ;;  %v283_v37 = vpop.xlane.xlu0 %282  ;;  %v286_v1 = vpop.xlane.xlu1 %285  ;;  %v534_v20 = vmul.f32 %v4056_v16, %v4056_v16 }
 0x152   :  { %v410_v52 = vmul.f32 0.03125, %v283_v37  ;;  %v411_v30 = vmul.f32 0.03125, %v286_v1  ;;  %v536_v37 = vmul.f32 %v4068_v45, %v4068_v45  ;;  %v537_v1 = vmul.f32 %v4073_v57, %v4073_v57 }
 0x153   :  { %v654_v60 = vsel %vm184_vm0, %v534_v20, 0.0 }
 0x154   :  { %v4080_v39 = vsub.f32 %v3766_v3, %v410_v52  ;;  %v4085_v61 = vsub.f32 %v3768_v4, %v411_v30  ;;  %v660_v3 = vsel %vm184_vm0, %v536_v37, 0.0  ;;  %v663_v30 = vsel %vm184_vm0, %v537_v1, 0.0 }
 0x155   :  { %646 = vadd.xlane.f32.xlu1 %v645_v36  ;;  %649 = vadd.xlane.f32.xlu0 %v648_v56  ;;  %v289_v24 = vpop.xlane.xlu0 %288  ;;  %v292_v23 = vpop.xlane.xlu1 %291 }
 0x156   :  { %v412_v36 = vmul.f32 0.03125, %v289_v24  ;;  %v413_v48 = vmul.f32 0.03125, %v292_v23  ;;  %v539_v23 = vmul.f32 %v4085_v61, %v4085_v61 }
 0x158   :  { %v4092_v52 = vsub.f32 %v3774_v10, %v412_v36  ;;  %v4097_v4 = vsub.f32 %v3776_v11, %v413_v48  ;;  %v669_v48 = vsel %vm184_vm0, %v539_v23, 0.0 }
 0x159   :  { %652 = vadd.xlane.f32.xlu1 %v651_v8  ;;  %655 = vadd.xlane.f32.xlu0 %v654_v60  ;;  %v295_v56 = vpop.xlane.xlu0 %294  ;;  %v298_v20 = vpop.xlane.xlu1 %297  ;;  %v538_v8 = vmul.f32 %v4080_v39, %v4080_v39 }
 0x15a   :  { %v414_v24 = vmul.f32 0.03125, %v295_v56  ;;  %v415_v28 = vmul.f32 0.03125, %v298_v20  ;;  %v541_v20 = vmul.f32 %v4097_v4, %v4097_v4 }
 0x15b   :  { %v666_v10 = vsel %vm184_vm0, %v538_v8, 0.0 }
 0x15c   :  { %v4104_v36 = vsub.f32 %v3782_v18, %v414_v24  ;;  %v4109_v11 = vsub.f32 %v3784_v19, %v415_v28  ;;  %v675_v28 = vsel %vm184_vm0, %v541_v20, 0.0 }
 0x15d   :  { %658 = vadd.xlane.f32.xlu1 %v657_v44  ;;  %661 = vadd.xlane.f32.xlu0 %v660_v3  ;;  %v301_v60 = vpop.xlane.xlu0 %300  ;;  %v304_v37 = vpop.xlane.xlu1 %303  ;;  %v540_v44 = vmul.f32 %v4092_v52, %v4092_v52 }
 0x15e   :  { %v416_v56 = vmul.f32 0.03125, %v301_v60  ;;  %v417_v1 = vmul.f32 0.03125, %v304_v37  ;;  %v543_v37 = vmul.f32 %v4109_v11, %v4109_v11 }
 0x15f   :  { %v672_v18 = vsel %vm184_vm0, %v540_v44, 0.0 }
 0x160   :  { %v4116_v24 = vsub.f32 %v3790_v26, %v416_v56  ;;  %v4121_v19 = vsub.f32 %v3792_v27, %v417_v1  ;;  %v681_v1 = vsel %vm184_vm0, %v543_v37, 0.0 }
 0x161   :  { %664 = vadd.xlane.f32.xlu1 %v663_v30  ;;  %667 = vadd.xlane.f32.xlu0 %v666_v10  ;;  %v307_v3 = vpop.xlane.xlu0 %306  ;;  %v310_v8 = vpop.xlane.xlu1 %309  ;;  %v542_v30 = vmul.f32 %v4104_v36, %v4104_v36 }
 0x162   :  { %v418_v60 = vmul.f32 0.03125, %v307_v3  ;;  %v419_v23 = vmul.f32 0.03125, %v310_v8  ;;  %v545_v8 = vmul.f32 %v4121_v19, %v4121_v19 }
 0x163   :  { %v678_v26 = vsel %vm184_vm0, %v542_v30, 0.0 }
 0x164   :  { %v4128_v56 = vsub.f32 %v3798_v34, %v418_v60  ;;  %v4133_v27 = vsub.f32 %v3800_v35, %v419_v23  ;;  %v687_v23 = vsel %vm184_vm0, %v545_v8, 0.0 }
 0x165   :  { %670 = vadd.xlane.f32.xlu1 %v669_v48  ;;  %673 = vadd.xlane.f32.xlu0 %v672_v18  ;;  %v313_v10 = vpop.xlane.xlu0 %312  ;;  %v316_v44 = vpop.xlane.xlu1 %315  ;;  %v544_v48 = vmul.f32 %v4116_v24, %v4116_v24 }
 0x166   :  { %v420_v3 = vmul.f32 0.03125, %v313_v10  ;;  %v421_v20 = vmul.f32 0.03125, %v316_v44  ;;  %v547_v44 = vmul.f32 %v4133_v27, %v4133_v27 }
 0x167   :  { %v684_v34 = vsel %vm184_vm0, %v544_v48, 0.0 }
 0x168   :  { %v4140_v60 = vsub.f32 %v3806_v42, %v420_v3  ;;  %v4145_v35 = vsub.f32 %v3808_v43, %v421_v20  ;;  %v693_v20 = vsel %vm184_vm0, %v547_v44, 0.0 }
 0x169   :  { %676 = vadd.xlane.f32.xlu1 %v675_v28  ;;  %679 = vadd.xlane.f32.xlu0 %v678_v26  ;;  %v319_v18 = vpop.xlane.xlu0 %318  ;;  %v322_v30 = vpop.xlane.xlu1 %321  ;;  %v546_v28 = vmul.f32 %v4128_v56, %v4128_v56 }
 0x16a   :  { %v422_v10 = vmul.f32 0.03125, %v319_v18  ;;  %v423_v37 = vmul.f32 0.03125, %v322_v30  ;;  %v549_v30 = vmul.f32 %v4145_v35, %v4145_v35 }
 0x16b   :  { %v690_v42 = vsel %vm184_vm0, %v546_v28, 0.0 }
 0x16c   :  { %v4152_v3 = vsub.f32 %v3814_v50, %v422_v10  ;;  %v4157_v43 = vsub.f32 %v3816_v51, %v423_v37  ;;  %v699_v37 = vsel %vm184_vm0, %v549_v30, 0.0 }
 0x16d   :  { %682 = vadd.xlane.f32.xlu1 %v681_v1  ;;  %685 = vadd.xlane.f32.xlu0 %v684_v34  ;;  %v325_v26 = vpop.xlane.xlu0 %324  ;;  %v328_v48 = vpop.xlane.xlu1 %327  ;;  %v548_v1 = vmul.f32 %v4140_v60, %v4140_v60 }
 0x16e   :  { %v424_v18 = vmul.f32 0.03125, %v325_v26  ;;  %4894 = vst [vmem:[#allocation39_spill] sm:$0xff] %v4157_v43  ;;  %v425_v8 = vmul.f32 0.03125, %v328_v48  ;;  %v551_v48 = vmul.f32 %v4157_v43, %v4157_v43 }
 0x16f   :  { %v696_v50 = vsel %vm184_vm0, %v548_v1, 0.0 }
 0x170   :  { %v4164_v10 = vsub.f32 %v3822_v58, %v424_v18  ;;  %v4169_v51 = vsub.f32 %v3824_v59, %v425_v8  ;;  %v705_v8 = vsel %vm184_vm0, %v551_v48, 0.0 }
 0x171   :  { %688 = vadd.xlane.f32.xlu1 %v687_v23  ;;  %691 = vadd.xlane.f32.xlu0 %v690_v42  ;;  %v331_v34 = vpop.xlane.xlu0 %330  ;;  %v334_v28 = vpop.xlane.xlu1 %333  ;;  %v550_v23 = vmul.f32 %v4152_v3, %v4152_v3 }
 0x172   :  { %4895 = vst [vmem:[#allocation40_spill] sm:$0xff] %v4164_v10  ;;  %v426_v26 = vmul.f32 0.03125, %v331_v34  ;;  %4896 = vst [vmem:[#allocation41_spill] sm:$0xff] %v4169_v51  ;;  %v427_v44 = vmul.f32 0.03125, %v334_v28  ;;  %v553_v28 = vmul.f32 %v4169_v51, %v4169_v51 }
 0x173   :  { %v702_v58 = vsel %vm184_vm0, %v550_v23, 0.0 }
 0x174   :  { %v4176_v18 = vsub.f32 %v3830_v6, %v426_v26  ;;  %v4181_v59 = vsub.f32 %v3832_v7, %v427_v44  ;;  %v4899_v26 = vld [vmem:[#allocation23_spill] sm:$0xff]  ;;  %v4900_v7 = vld [vmem:[#allocation24_spill] sm:$0xff]  ;;  %v711_v48 = vsel %vm184_vm0, %v553_v28, 0.0 }
 0x175   :  { %694 = vadd.xlane.f32.xlu1 %v693_v20  ;;  %697 = vadd.xlane.f32.xlu0 %v696_v50  ;;  %v337_v42 = vpop.xlane.xlu0 %336  ;;  %v340_v1 = vpop.xlane.xlu1 %339  ;;  %v552_v20 = vmul.f32 %v4164_v10, %v4164_v10 }
 0x176   :  { %4897 = vst [vmem:[#allocation42_spill] sm:$0xff] %v4176_v18  ;;  %v428_v34 = vmul.f32 0.03125, %v337_v42  ;;  %4898 = vst [vmem:[#allocation43_spill] sm:$0xff] %v4181_v59  ;;  %v429_v30 = vmul.f32 0.03125, %v340_v1 }
 0x177   :  { %v708_v6 = vsel %vm184_vm0, %v552_v20, 0.0 }
 0x178   :  { %v4188_v43 = vsub.f32 %v4899_v26, %v428_v34  ;;  %v4193_v44 = vsub.f32 %v4900_v7, %v429_v30  ;;  %v4902_v26 = vld [vmem:[#allocation25_spill] sm:$0xff]  ;;  %v4904_v30 = vld [vmem:[#allocation26_spill] sm:$0xff] }
 0x179   :  { %700 = vadd.xlane.f32.xlu1 %v699_v37  ;;  %703 = vadd.xlane.f32.xlu0 %v702_v58  ;;  %v343_v50 = vpop.xlane.xlu0 %342  ;;  %v346_v23 = vpop.xlane.xlu1 %345  ;;  %v554_v37 = vmul.f32 %v4176_v18, %v4176_v18  ;;  %v555_v58 = vmul.f32 %v4181_v59, %v4181_v59 }
 0x17a   :  { %v430_v42 = vmul.f32 0.03125, %v343_v50  ;;  %4901 = vst [vmem:[#allocation23_spill] sm:$0xff] %v4193_v44  ;;  %v431_v1 = vmul.f32 0.03125, %v346_v23  ;;  %v557_v7 = vmul.f32 %v4193_v44, %v4193_v44 }
 0x17b   :  { %v714_v34 = vsel %vm184_vm0, %v554_v37, 0.0  ;;  %v717_v28 = vsel %vm184_vm0, %v555_v58, 0.0 }
 0x17c   :  { %v4200_v10 = vsub.f32 %v4902_v26, %v430_v42  ;;  %v4906_v26 = vld [vmem:[#allocation27_spill] sm:$0xff]  ;;  %v723_v58 = vsel %vm184_vm0, %v557_v7, 0.0 }
 0x17d   :  { %706 = vadd.xlane.f32.xlu1 %v705_v8  ;;  %709 = vadd.xlane.f32.xlu0 %v708_v6  ;;  %v349_v51 = vpop.xlane.xlu0 %348  ;;  %v352_v20 = vpop.xlane.xlu1 %351  ;;  %v556_v8 = vmul.f32 %v4188_v43, %v4188_v43  ;;  %v4205_v6 = vsub.f32 %v4904_v30, %v431_v1  ;;  %v4908_v1 = vld [vmem:[#allocation28_spill] sm:$0xff] }
 0x17e   :  { %4903 = vst [vmem:[#allocation24_spill] sm:$0xff] %v4200_v10  ;;  %v432_v50 = vmul.f32 0.03125, %v349_v51  ;;  %v433_v23 = vmul.f32 0.03125, %v352_v20  ;;  %v558_v51 = vmul.f32 %v4200_v10, %v4200_v10 }
 0x17f   :  { %4905 = vst [vmem:[#allocation25_spill] sm:$0xff] %v4205_v6  ;;  %v720_v42 = vsel %vm184_vm0, %v556_v8, 0.0  ;;  %v559_v30 = vmul.f32 %v4205_v6, %v4205_v6  ;;  %v4914_v6 = vld [vmem:[#allocation31_spill] sm:$0xff] }
 0x180   :  { %v4212_v18 = vsub.f32 %v4906_v26, %v432_v50  ;;  %v726_v8 = vsel %vm184_vm0, %v558_v51, 0.0  ;;  %v4910_v50 = vld [vmem:[#allocation29_spill] sm:$0xff] }
 0x181   :  { %712 = vadd.xlane.f32.xlu1 %v711_v48  ;;  %715 = vadd.xlane.f32.xlu0 %v714_v34  ;;  %v355_v59 = vpop.xlane.xlu0 %354  ;;  %v358_v37 = vpop.xlane.xlu1 %357  ;;  %v4217_v34 = vsub.f32 %v4908_v1, %v433_v23  ;;  %v4912_v23 = vld [vmem:[#allocation30_spill] sm:$0xff]  ;;  %v729_v7 = vsel %vm184_vm0, %v559_v30, 0.0 }
 0x182   :  { %4907 = vst [vmem:[#allocation26_spill] sm:$0xff] %v4212_v18  ;;  %v434_v48 = vmul.f32 0.03125, %v355_v59  ;;  %v435_v20 = vmul.f32 0.03125, %v358_v37  ;;  %v560_v59 = vmul.f32 %v4212_v18, %v4212_v18 }
 0x183   :  { %4909 = vst [vmem:[#allocation27_spill] sm:$0xff] %v4217_v34  ;;  %v561_v37 = vmul.f32 %v4217_v34, %v4217_v34 }
 0x184   :  { %v4224_v26 = vsub.f32 %v4910_v50, %v434_v48  ;;  %v4229_v1 = vsub.f32 %v4912_v23, %v435_v20  ;;  %v732_v51 = vsel %vm184_vm0, %v560_v59, 0.0 }
 0x185   :  { %718 = vadd.xlane.f32.xlu1 %v717_v28  ;;  %721 = vadd.xlane.f32.xlu0 %v720_v42  ;;  %v361_v44 = vpop.xlane.xlu0 %360  ;;  %v364_v42 = vpop.xlane.xlu1 %363 }
 0x186   :  { %4911 = vst [vmem:[#allocation28_spill] sm:$0xff] %v4224_v26  ;;  %v436_v28 = vmul.f32 0.03125, %v361_v44  ;;  %4913 = vst [vmem:[#allocation29_spill] sm:$0xff] %v4229_v1  ;;  %v437_v50 = vmul.f32 0.03125, %v364_v42  ;;  %v562_v44 = vmul.f32 %v4224_v26, %v4224_v26 }
 0x188   :  { %v4236_v48 = vsub.f32 %v4914_v6, %v436_v28  ;;  %v4242_v20 = vsub.f32 %v3872_v47, %v437_v50  ;;  %v738_v30 = vsel %vm184_vm0, %v562_v44, 0.0 }
 0x189   :  { %724 = vadd.xlane.f32.xlu1 %v723_v58  ;;  %727 = vadd.xlane.f32.xlu0 %v726_v8  ;;  %v735_v58 = vsel %vm184_vm0, %v561_v37, 0.0  ;;  %v563_v8 = vmul.f32 %v4229_v1, %v4229_v1 }
 0x18a   :  { %4915 = vst [vmem:[#allocation30_spill] sm:$0xff] %v4236_v48  ;;  %4916 = vst [vmem:[#allocation31_spill] sm:$0xff] %v4242_v20  ;;  %v564_v6 = vmul.f32 %v4236_v48, %v4236_v48  ;;  %v565_v42 = vmul.f32 %v4242_v20, %v4242_v20 }
 0x18b   :  { %v741_v59 = vsel %vm184_vm0, %v563_v8, 0.0 }
 0x18c   :  { %v744_v28 = vsel %vm184_vm0, %v564_v6, 0.0  ;;  %v747_v47 = vsel %vm184_vm0, %v565_v42, 0.0 }
 0x18d   :  { %730 = vadd.xlane.f32.xlu1 %v729_v7  ;;  %733 = vadd.xlane.f32.xlu0 %v732_v51 }
 0x191   :  { %736 = vadd.xlane.f32.xlu1 %v735_v58  ;;  %739 = vadd.xlane.f32.xlu0 %v738_v30 }
 0x195   :  { %742 = vadd.xlane.f32.xlu1 %v741_v59  ;;  %745 = vadd.xlane.f32.xlu0 %v744_v28 }
 0x199   :  { %748 = vadd.xlane.f32.xlu1 %v747_v47 }
 0x1a6   :  { %v572_v23 = vpop.xlane.xlu0 %571 }
 0x1a7   :  { %v762_v7 = vmul.f32 0.03125, %v572_v23 }
 0x1a9   :  { %v826_v37 = vadd.f32 1e-05, %v762_v7 }
 0x1aa   :  { %v575_v51 = vpop.xlane.xlu1 %574  ;;  %v578_v50 = vpop.xlane.xlu0 %577 }
 0x1ab   :  { %3136 = vrsqrt.f32 %v826_v37  ;;  %v763_v44 = vmul.f32 0.03125, %v575_v51  ;;  %v764_v58 = vmul.f32 0.03125, %v578_v50 }
 0x1ad   :  { %v827_v30 = vadd.f32 1e-05, %v763_v44  ;;  %v828_v8 = vadd.f32 1e-05, %v764_v58 }
 0x1ae   :  { %v581_v48 = vpop.xlane.xlu1 %580  ;;  %v584_v6 = vpop.xlane.xlu0 %583 }
 0x1af   :  { %3138 = vrsqrt.f32 %v827_v30  ;;  %v765_v1 = vmul.f32 0.03125, %v581_v48  ;;  %v766_v20 = vmul.f32 0.03125, %v584_v6  ;;  %v4255_v6 = vld [vmem:[#allocation5] ss:$0 sm:$0xff] }
 0x1b0   :  { %3140 = vrsqrt.f32 %v828_v8 }
 0x1b1   :  { %v829_v59 = vadd.f32 1e-05, %v765_v1  ;;  %v830_v28 = vadd.f32 1e-05, %v766_v20 }
 0x1b2   :  { %v587_v42 = vpop.xlane.xlu1 %586  ;;  %v590_v47 = vpop.xlane.xlu0 %589 }
 0x1b3   :  { %3142 = vrsqrt.f32 %v829_v59  ;;  %v767_v23 = vmul.f32 0.03125, %v587_v42  ;;  %v768_v7 = vmul.f32 0.03125, %v590_v47 }
 0x1b4   :  { %3144 = vrsqrt.f32 %v830_v28 }
 0x1b5   :  { %v3137_v26 = vpop.eup %3136  ;;  %v831_v37 = vadd.f32 1e-05, %v767_v23  ;;  %v832_v51 = vadd.f32 1e-05, %v768_v7  ;;  %v4917_v7 = vld [vmem:[#allocation32_spill] sm:$0xff] }
 0x1b6   :  { %v593_v50 = vpop.xlane.xlu1 %592  ;;  %v596_v44 = vpop.xlane.xlu0 %595  ;;  %v954_v58 = vmul.f32 %v3137_v26, %v3879_v15 }
 0x1b7   :  { %3146 = vrsqrt.f32 %v831_v37  ;;  %v769_v30 = vmul.f32 0.03125, %v593_v50  ;;  %v770_v48 = vmul.f32 0.03125, %v596_v44  ;;  %v4260_v37 = vld [vmem:[#allocation7] ss:$0 sm:$0xff] }
 0x1b8   :  { %3148 = vrsqrt.f32 %v832_v51  ;;  %v1024_v23 = vmul.f32 %v4255_v6, %v954_v58 }
 0x1b9   :  { %v3139_v1 = vpop.eup %3138  ;;  %v833_v20 = vadd.f32 1e-05, %v769_v30  ;;  %v834_v8 = vadd.f32 1e-05, %v770_v48 }
 0x1ba   :  { %v3141_v59 = vpop.eup %3140  ;;  %v599_v42 = vpop.xlane.xlu1 %598  ;;  %v955_v28 = vmul.f32 %v3139_v1, %v3889_v55 }
 0x1bb   :  { %v602_v47 = vpop.xlane.xlu0 %601  ;;  %v956_v34 = vmul.f32 %v3141_v59, %v4917_v7  ;;  %3150 = vrsqrt.f32 %v833_v20  ;;  %v771_v15 = vmul.f32 0.03125, %v599_v42  ;;  %v1094_v59 = vadd.f32 %v4260_v37, %v1024_v23 }
 0x1bc   :  { %v772_v26 = vmul.f32 0.03125, %v602_v47  ;;  %3152 = vrsqrt.f32 %v834_v8  ;;  %v1025_v51 = vmul.f32 %v4255_v6, %v955_v28 }
 0x1bd   :  { %v3143_v50 = vpop.eup %3142  ;;  %v835_v44 = vadd.f32 1e-05, %v771_v15  ;;  %v1026_v48 = vmul.f32 %v4255_v6, %v956_v34 }
 0x1be   :  { %v836_v30 = vadd.f32 1e-05, %v772_v26  ;;  %v3145_v18 = vpop.eup %3144  ;;  %v957_v55 = vmul.f32 %v3143_v50, %v3892_v62  ;;  %v605_v1 = vpop.xlane.xlu1 %604  ;;  %v1095_v20 = vadd.f32 %v4260_v37, %v1025_v51 }
 0x1bf   :  { %v608_v58 = vpop.xlane.xlu0 %607  ;;  %v958_v42 = vmul.f32 %v3145_v18, %v3901_v2  ;;  %3154 = vrsqrt.f32 %v835_v44  ;;  %v773_v8 = vmul.f32 0.03125, %v605_v1  ;;  %v1096_v62 = vadd.f32 %v4260_v37, %v1026_v48 }
 0x1c0   :  { %v774_v47 = vmul.f32 0.03125, %v608_v58  ;;  %3156 = vrsqrt.f32 %v836_v30  ;;  %v1158_v28 = vpack.c.bf16 %v1095_v20, %v1094_v59  ;;  %v1027_v7 = vmul.f32 %v4255_v6, %v957_v55 }
 0x1c1   :  { %v3147_v15 = vpop.eup %3146  ;;  %v837_v34 = vadd.f32 1e-05, %v773_v8  ;;  %v1028_v51 = vmul.f32 %v4255_v6, %v958_v42 }
 0x1c2   :  { %v838_v26 = vadd.f32 1e-05, %v774_v47  ;;  %v3149_v50 = vpop.eup %3148  ;;  %v959_v10 = vmul.f32 %v3147_v15, %v3904_v5  ;;  %v611_v23 = vpop.xlane.xlu1 %610  ;;  %2987 = vmatprep.mubr.msk.bf16.mxu0 %vm184_vm0, %v1158_v28  ;;  %3055 = vmatprep.mubr.msk.bf16.mxu1 %vm184_vm0, %v1158_v28  ;;  %v1097_v18 = vadd.f32 %v4260_v37, %v1027_v7 }
 0x1c3   :  { %v614_v2 = vpop.xlane.xlu0 %613  ;;  %v960_v44 = vmul.f32 %v3149_v50, %v3913_v63  ;;  %3158 = vrsqrt.f32 %v837_v34  ;;  %v775_v30 = vmul.f32 0.03125, %v611_v23  ;;  %v1098_v42 = vadd.f32 %v4260_v37, %v1028_v51 }
 0x1c4   :  { %v776_v55 = vmul.f32 0.03125, %v614_v2  ;;  %3160 = vrsqrt.f32 %v838_v26  ;;  %v1159_v48 = vpack.c.bf16 %v1097_v18, %v1096_v62  ;;  %v1029_v1 = vmul.f32 %v4255_v6, %v959_v10 }
 0x1c5   :  { %v3151_v5 = vpop.eup %3150  ;;  %v839_v58 = vadd.f32 1e-05, %v775_v30  ;;  %v1030_v20 = vmul.f32 %v4255_v6, %v960_v44 }
 0x1c6   :  { %v840_v59 = vadd.f32 1e-05, %v776_v55  ;;  %v3153_v8 = vpop.eup %3152  ;;  %v961_v47 = vmul.f32 %v3151_v5, %v3916_v9  ;;  %v617_v28 = vpop.xlane.xlu1 %616  ;;  %2988 = vmatmul.mubr.msk.bf16.vlgmr.msra.gmra.mrb[0].mxu0 %vm184_vm0, %v1159_v48  ;;  %3056 = vmatmul.mubr.msk.bf16.vlgmr.msra.gmra.mrb[0].mxu1 %vm184_vm0, %v1159_v48  ;;  %v1099_v7 = vadd.f32 %v4260_v37, %v1029_v1 }
 0x1c7   :  { %v620_v63 = vpop.xlane.xlu0 %619  ;;  %v962_v10 = vmul.f32 %v3153_v8, %v3925_v0  ;;  %3162 = vrsqrt.f32 %v839_v58  ;;  %v777_v15 = vmul.f32 0.03125, %v617_v28  ;;  %v1100_v2 = vadd.f32 %v4260_v37, %v1030_v20 }
 0x1c8   :  { %v778_v34 = vmul.f32 0.03125, %v620_v63  ;;  %3164 = vrsqrt.f32 %v840_v59  ;;  %v1160_v26 = vpack.c.bf16 %v1099_v7, %v1098_v42  ;;  %v1031_v62 = vmul.f32 %v4255_v6, %v961_v47 }
 0x1c9   :  { %v3155_v9 = vpop.eup %3154  ;;  %v841_v50 = vadd.f32 1e-05, %v777_v15  ;;  %v1032_v55 = vmul.f32 %v4255_v6, %v962_v10 }
 0x1ca   :  { %v842_v23 = vadd.f32 1e-05, %v778_v34  ;;  %v3157_v18 = vpop.eup %3156  ;;  %v963_v44 = vmul.f32 %v3155_v9, %v3928_v13  ;;  %v623_v51 = vpop.xlane.xlu1 %622  ;;  %2991 = vmatprep.mubr.msk.bf16.mxu0 %vm184_vm0, %v1160_v26  ;;  %3059 = vmatprep.mubr.msk.bf16.mxu1 %vm184_vm0, %v1160_v26  ;;  %v1101_v30 = vadd.f32 %v4260_v37, %v1031_v62 }
 0x1cb   :  { %v626_v0 = vpop.xlane.xlu0 %625  ;;  %v964_v48 = vmul.f32 %v3157_v18, %v3937_v22  ;;  %3166 = vrsqrt.f32 %v841_v50  ;;  %v779_v1 = vmul.f32 0.03125, %v623_v51  ;;  %v1102_v7 = vadd.f32 %v4260_v37, %v1032_v55 }
 0x1cc   :  { %v780_v5 = vmul.f32 0.03125, %v626_v0  ;;  %3168 = vrsqrt.f32 %v842_v23  ;;  %v1161_v58 = vpack.c.bf16 %v1101_v30, %v1100_v2  ;;  %v1033_v59 = vmul.f32 %v4255_v6, %v963_v44 }
 0x1cd   :  { %v3159_v13 = vpop.eup %3158  ;;  %v843_v20 = vadd.f32 1e-05, %v779_v1  ;;  %v1034_v47 = vmul.f32 %v4255_v6, %v964_v48 }
 0x1ce   :  { %v844_v8 = vadd.f32 1e-05, %v780_v5  ;;  %v3161_v28 = vpop.eup %3160  ;;  %v965_v63 = vmul.f32 %v3159_v13, %v3940_v17  ;;  %v629_v42 = vpop.xlane.xlu1 %628  ;;  %2992 = vmatmul.mubr.msk.bf16.gmra.mrb[4].mxu0 %vm184_vm0, %v1161_v58  ;;  %3060 = vmatmul.mubr.msk.bf16.gmra.mrb[4].mxu1 %vm184_vm0, %v1161_v58  ;;  %v1103_v10 = vadd.f32 %v4260_v37, %v1033_v59 }
 0x1cf   :  { %v632_v22 = vpop.xlane.xlu0 %631  ;;  %v966_v15 = vmul.f32 %v3161_v28, %v3949_v14  ;;  %3170 = vrsqrt.f32 %v843_v20  ;;  %v781_v34 = vmul.f32 0.03125, %v629_v42  ;;  %v1104_v2 = vadd.f32 %v4260_v37, %v1034_v47 }
 0x1d0   :  { %v782_v26 = vmul.f32 0.03125, %v632_v22  ;;  %3172 = vrsqrt.f32 %v844_v8  ;;  %v1162_v62 = vpack.c.bf16 %v1103_v10, %v1102_v7  ;;  %v1035_v9 = vmul.f32 %v4255_v6, %v965_v63 }
 0x1d1   :  { %v3163_v17 = vpop.eup %3162  ;;  %v845_v50 = vadd.f32 1e-05, %v781_v34  ;;  %v1036_v30 = vmul.f32 %v4255_v6, %v966_v15 }
 0x1d2   :  { %v846_v23 = vadd.f32 1e-05, %v782_v26  ;;  %v3165_v18 = vpop.eup %3164  ;;  %v967_v44 = vmul.f32 %v3163_v17, %v3952_v21  ;;  %v635_v51 = vpop.xlane.xlu1 %634  ;;  %2995 = vmatprep.mubr.msk.bf16.mxu0 %vm184_vm0, %v1162_v62  ;;  %3063 = vmatprep.mubr.msk.bf16.mxu1 %vm184_vm0, %v1162_v62  ;;  %v1105_v0 = vadd.f32 %v4260_v37, %v1035_v9 }
 0x1d3   :  { %v367_v14 = vpop.xlane.xlu0 %366  ;;  %v968_v55 = vmul.f32 %v3165_v18, %v3961_v54  ;;  %3174 = vrsqrt.f32 %v845_v50  ;;  %v783_v48 = vmul.f32 0.03125, %v635_v51  ;;  %v1106_v63 = vadd.f32 %v4260_v37, %v1036_v30 }
 0x1d4   :  { %v438_v1 = vmul.f32 0.03125, %v367_v14  ;;  %3176 = vrsqrt.f32 %v846_v23  ;;  %v1163_v5 = vpack.c.bf16 %v1105_v0, %v1104_v2  ;;  %v1037_v58 = vmul.f32 %v4255_v6, %v967_v44 }
 0x1d5   :  { %v3167_v21 = vpop.eup %3166  ;;  %v847_v59 = vadd.f32 1e-05, %v783_v48  ;;  %v1038_v20 = vmul.f32 %v4255_v6, %v968_v55 }
 0x1d6   :  { %v4310_v13 = vsub.f32 %v4008_v41, %v438_v1  ;;  %v3169_v8 = vpop.eup %3168  ;;  %v969_v47 = vmul.f32 %v3167_v21, %v3964_v25  ;;  %v370_v28 = vpop.xlane.xlu1 %369  ;;  %2996 = vmatmul.mubr.msk.bf16.gmra.mrb[8].mxu0 %vm184_vm0, %v1163_v5  ;;  %3064 = vmatmul.mubr.msk.bf16.gmra.mrb[8].mxu1 %vm184_vm0, %v1163_v5  ;;  %v1107_v42 = vadd.f32 %v4260_v37, %v1037_v58 }
 0x1d7   :  { %v638_v54 = vpop.xlane.xlu0 %637  ;;  %v970_v22 = vmul.f32 %v3169_v8, %v3973_v31  ;;  %3178 = vrsqrt.f32 %v847_v59  ;;  %v439_v41 = vmul.f32 0.03125, %v370_v28  ;;  %v1108_v9 = vadd.f32 %v4260_v37, %v1038_v20  ;;  %v4919_v59 = vld [vmem:[#allocation34_spill] sm:$0xff] }
 0x1d8   :  { %v784_v7 = vmul.f32 0.03125, %v638_v54  ;;  %v1164_v10 = vpack.c.bf16 %v1107_v42, %v1106_v63  ;;  %v566_v15 = vmul.f32 %v4310_v13, %v4310_v13  ;;  %v1039_v25 = vmul.f32 %v4255_v6, %v969_v47 }
 0x1d9   :  { %v3171_v34 = vpop.eup %3170  ;;  %v4323_v26 = vsub.f32 %v4020_v38, %v439_v41  ;;  %v1040_v44 = vmul.f32 %v4255_v6, %v970_v22  ;;  %v4918_v38 = vld [vmem:[#allocation33_spill] sm:$0xff] }
 0x1da   :  { %v848_v62 = vadd.f32 1e-05, %v784_v7  ;;  %v3173_v17 = vpop.eup %3172  ;;  %v971_v50 = vmul.f32 %v3171_v34, %v3976_v29  ;;  %v641_v31 = vpop.xlane.xlu1 %640  ;;  %2999 = vmatprep.mubr.msk.bf16.mxu0 %vm184_vm0, %v1164_v10  ;;  %3067 = vmatprep.mubr.msk.bf16.mxu1 %vm184_vm0, %v1164_v10  ;;  %v750_v23 = vsel %vm184_vm0, %v566_v15, 0.0  ;;  %v1109_v18 = vadd.f32 %v4260_v37, %v1039_v25 }
 0x1db   :  { %v373_v2 = vpop.xlane.xlu0 %372  ;;  %v972_v51 = vmul.f32 %v3173_v17, %v4918_v38  ;;  %v785_v14 = vmul.f32 0.03125, %v641_v31  ;;  %751 = vadd.xlane.f32.xlu0 %v750_v23  ;;  %v567_v29 = vmul.f32 %v4323_v26, %v4323_v26  ;;  %v1110_v54 = vadd.f32 %v4260_v37, %v1040_v44 }
 0x1dc   :  { %3180 = vrsqrt.f32 %v848_v62  ;;  %v440_v0 = vmul.f32 0.03125, %v373_v2  ;;  %v1165_v30 = vpack.c.bf16 %v1109_v18, %v1108_v9  ;;  %v1041_v55 = vmul.f32 %v4255_v6, %v971_v50  ;;  %v4920_v9 = vld [vmem:[#allocation35_spill] sm:$0xff] }
 0x1dd   :  { %v3175_v48 = vpop.eup %3174  ;;  %v849_v1 = vadd.f32 1e-05, %v785_v14  ;;  %v1042_v58 = vmul.f32 %v4255_v6, %v972_v51  ;;  %v753_v8 = vsel %vm184_vm0, %v567_v29, 0.0 }
 0x1de   :  { %v4337_v5 = vsub.f32 %v4032_v46, %v440_v0  ;;  %v3177_v21 = vpop.eup %3176  ;;  %v973_v20 = vmul.f32 %v3175_v48, %v4919_v59  ;;  %v376_v47 = vpop.xlane.xlu1 %375  ;;  %3000 = vmatmul.mubr.msk.bf16.gmra.mrb[12].mxu0 %vm184_vm0, %v1165_v30  ;;  %3068 = vmatmul.mubr.msk.bf16.gmra.mrb[12].mxu1 %vm184_vm0, %v1165_v30  ;;  %v1111_v63 = vadd.f32 %v4260_v37, %v1041_v55  ;;  %v4921_v55 = vld [vmem:[#allocation36_spill] sm:$0xff] }
 0x1df   :  { %v644_v28 = vpop.xlane.xlu0 %643  ;;  %v974_v46 = vmul.f32 %v3177_v21, %v3997_v12  ;;  %3182 = vrsqrt.f32 %v849_v1  ;;  %754 = vadd.xlane.f32.xlu1 %v753_v8  ;;  %v441_v42 = vmul.f32 0.03125, %v376_v47  ;;  %v1112_v62 = vadd.f32 %v4260_v37, %v1042_v58 }
 0x1e0   :  { %v786_v22 = vmul.f32 0.03125, %v644_v28  ;;  %v1166_v41 = vpack.c.bf16 %v1111_v63, %v1110_v54  ;;  %v568_v7 = vmul.f32 %v4337_v5, %v4337_v5  ;;  %v1043_v10 = vmul.f32 %v4255_v6, %v973_v20 }
 0x1e1   :  { %v3179_v15 = vpop.eup %3178  ;;  %v4351_v25 = vsub.f32 %v4043_v32, %v441_v42  ;;  %v1044_v2 = vmul.f32 %v4255_v6, %v974_v46  ;;  %v4922_v46 = vld [vmem:[#allocation37_spill] sm:$0xff] }
 0x1e2   :  { %v850_v34 = vadd.f32 1e-05, %v786_v22  ;;  %v975_v17 = vmul.f32 %v3179_v15, %v4920_v9  ;;  %v647_v12 = vpop.xlane.xlu1 %646  ;;  %3003 = vmatprep.mubr.msk.bf16.mxu0 %vm184_vm0, %v1166_v41  ;;  %3071 = vmatprep.mubr.msk.bf16.mxu1 %vm184_vm0, %v1166_v41  ;;  %v756_v50 = vsel %vm184_vm0, %v568_v7, 0.0  ;;  %v1113_v23 = vadd.f32 %v4260_v37, %v1043_v10 }
 0x1e3   :  { %v650_v31 = vpop.xlane.xlu0 %649  ;;  %v787_v32 = vmul.f32 0.03125, %v647_v12  ;;  %757 = vadd.xlane.f32.xlu0 %v756_v50  ;;  %v569_v44 = vmul.f32 %v4351_v25, %v4351_v25  ;;  %v1114_v21 = vadd.f32 %v4260_v37, %v1044_v2 }
 0x1e4   :  { %3184 = vrsqrt.f32 %v850_v34  ;;  %v788_v18 = vmul.f32 0.03125, %v650_v31  ;;  %v1167_v38 = vpack.c.bf16 %v1113_v23, %v1112_v62  ;;  %v1045_v51 = vmul.f32 %v4255_v6, %v975_v17 }
 0x1e5   :  { %v851_v0 = vadd.f32 1e-05, %v787_v32  ;;  %v759_v30 = vsel %vm184_vm0, %v569_v44, 0.0 }
 0x1e6   :  { %v3181_v14 = vpop.eup %3180  ;;  %v852_v29 = vadd.f32 1e-05, %v788_v18  ;;  %760 = vadd.xlane.f32.xlu1 %v759_v30  ;;  %v653_v1 = vpop.xlane.xlu1 %652  ;;  %3004 = vmatmul.mubr.msk.bf16.gmra.mrb[16].mxu0 %vm184_vm0, %v1167_v38  ;;  %v1115_v59 = vadd.f32 %v4260_v37, %v1045_v51 }
 0x1e7   :  { %v976_v48 = vmul.f32 %v3181_v14, %v4921_v55  ;;  %v656_v58 = vpop.xlane.xlu0 %655  ;;  %3186 = vrsqrt.f32 %v851_v0  ;;  %v789_v20 = vmul.f32 0.03125, %v653_v1  ;;  %3072 = vmatmul.mubr.msk.bf16.gmra.mrb[16].mxu1 %vm184_vm0, %v1167_v38 }
 0x1e8   :  { %v790_v8 = vmul.f32 0.03125, %v656_v58  ;;  %3188 = vrsqrt.f32 %v852_v29  ;;  %v1168_v47 = vpack.c.bf16 %v1115_v59, %v1114_v21  ;;  %v4923_v29 = vld [vmem:[#allocation38_spill] sm:$0xff] }
 0x1e9   :  { %v3183_v28 = vpop.eup %3182  ;;  %v853_v54 = vadd.f32 1e-05, %v789_v20  ;;  %v1046_v7 = vmul.f32 %v4255_v6, %v976_v48 }
 0x1ea   :  { %v854_v63 = vadd.f32 1e-05, %v790_v8  ;;  %v977_v42 = vmul.f32 %v3183_v28, %v4922_v46  ;;  %v659_v22 = vpop.xlane.xlu1 %658  ;;  %3007 = vmatprep.mubr.msk.bf16.mxu0 %vm184_vm0, %v1168_v47  ;;  %3075 = vmatprep.mubr.msk.bf16.mxu1 %vm184_vm0, %v1168_v47 }
 0x1eb   :  { %v662_v41 = vpop.xlane.xlu0 %661  ;;  %3190 = vrsqrt.f32 %v853_v54  ;;  %v791_v10 = vmul.f32 0.03125, %v659_v22  ;;  %v1116_v23 = vadd.f32 %v4260_v37, %v1046_v7 }
 0x1ec   :  { %v792_v15 = vmul.f32 0.03125, %v662_v41  ;;  %3192 = vrsqrt.f32 %v854_v63  ;;  %v1047_v34 = vmul.f32 %v4255_v6, %v977_v42 }
 0x1ed   :  { %v855_v9 = vadd.f32 1e-05, %v791_v10 }
 0x1ee   :  { %v3185_v62 = vpop.eup %3184  ;;  %v856_v17 = vadd.f32 1e-05, %v792_v15  ;;  %v665_v50 = vpop.xlane.xlu1 %664  ;;  %v1117_v2 = vadd.f32 %v4260_v37, %v1047_v34 }
 0x1ef   :  { %v978_v12 = vmul.f32 %v3185_v62, %v4028_v40  ;;  %v668_v31 = vpop.xlane.xlu0 %667  ;;  %3194 = vrsqrt.f32 %v855_v9  ;;  %v793_v32 = vmul.f32 0.03125, %v665_v50 }
 0x1f0   :  { %v794_v18 = vmul.f32 0.03125, %v668_v31  ;;  %3196 = vrsqrt.f32 %v856_v17  ;;  %v1169_v44 = vpack.c.bf16 %v1117_v2, %v1116_v23 }
 0x1f1   :  { %v3187_v38 = vpop.eup %3186  ;;  %v857_v51 = vadd.f32 1e-05, %v793_v32  ;;  %v1048_v48 = vmul.f32 %v4255_v6, %v978_v12 }
 0x1f2   :  { %v858_v14 = vadd.f32 1e-05, %v794_v18  ;;  %v3189_v0 = vpop.eup %3188  ;;  %v979_v30 = vmul.f32 %v3187_v38, %v4923_v29  ;;  %v671_v55 = vpop.xlane.xlu1 %670  ;;  %3008 = vmatmul.mubr.msk.bf16.gmra.mrb[20].mxu0 %vm184_vm0, %v1169_v44  ;;  %3076 = vmatmul.mubr.msk.bf16.gmra.mrb[20].mxu1 %vm184_vm0, %v1169_v44 }
 0x1f3   :  { %v674_v40 = vpop.xlane.xlu0 %673  ;;  %v980_v1 = vmul.f32 %v3189_v0, %v4041_v33  ;;  %3198 = vrsqrt.f32 %v857_v51  ;;  %v795_v58 = vmul.f32 0.03125, %v671_v55  ;;  %v1118_v42 = vadd.f32 %v4260_v37, %v1048_v48 }
 0x1f4   :  { %v796_v21 = vmul.f32 0.03125, %v674_v40  ;;  %3200 = vrsqrt.f32 %v858_v14  ;;  %v1049_v59 = vmul.f32 %v4255_v6, %v979_v30 }
 0x1f5   :  { %v3191_v20 = vpop.eup %3190  ;;  %v859_v8 = vadd.f32 1e-05, %v795_v58  ;;  %v1050_v33 = vmul.f32 %v4255_v6, %v980_v1 }
 0x1f6   :  { %v860_v47 = vadd.f32 1e-05, %v796_v21  ;;  %v3193_v28 = vpop.eup %3192  ;;  %v981_v54 = vmul.f32 %v3191_v20, %v4048_v49  ;;  %v677_v63 = vpop.xlane.xlu1 %676  ;;  %v1119_v22 = vadd.f32 %v4260_v37, %v1049_v59 }
 0x1f7   :  { %v680_v46 = vpop.xlane.xlu0 %679  ;;  %v982_v41 = vmul.f32 %v3193_v28, %v4056_v16  ;;  %3202 = vrsqrt.f32 %v859_v8  ;;  %v797_v7 = vmul.f32 0.03125, %v677_v63  ;;  %v1120_v23 = vadd.f32 %v4260_v37, %v1050_v33 }
 0x1f8   :  { %v798_v10 = vmul.f32 0.03125, %v680_v46  ;;  %3204 = vrsqrt.f32 %v860_v47  ;;  %v1170_v15 = vpack.c.bf16 %v1119_v22, %v1118_v42  ;;  %v1051_v34 = vmul.f32 %v4255_v6, %v981_v54 }
 0x1f9   :  { %v3195_v62 = vpop.eup %3194  ;;  %v861_v9 = vadd.f32 1e-05, %v797_v7  ;;  %v1052_v17 = vmul.f32 %v4255_v6, %v982_v41 }
 0x1fa   :  { %v862_v49 = vadd.f32 1e-05, %v798_v10  ;;  %v3197_v12 = vpop.eup %3196  ;;  %v983_v50 = vmul.f32 %v3195_v62, %v4061_v53  ;;  %v683_v31 = vpop.xlane.xlu1 %682  ;;  %3011 = vmatprep.mubr.msk.bf16.mxu0 %vm184_vm0, %v1170_v15  ;;  %3079 = vmatprep.mubr.msk.bf16.mxu1 %vm184_vm0, %v1170_v15  ;;  %v1121_v2 = vadd.f32 %v4260_v37, %v1051_v34 }
 0x1fb   :  { %v686_v16 = vpop.xlane.xlu0 %685  ;;  %v984_v32 = vmul.f32 %v3197_v12, %v4068_v45  ;;  %3206 = vrsqrt.f32 %v861_v9  ;;  %v799_v18 = vmul.f32 0.03125, %v683_v31  ;;  %v1122_v29 = vadd.f32 %v4260_v37, %v1052_v17 }
 0x1fc   :  { %v800_v44 = vmul.f32 0.03125, %v686_v16  ;;  %3208 = vrsqrt.f32 %v862_v49  ;;  %v1171_v38 = vpack.c.bf16 %v1121_v2, %v1120_v23  ;;  %v1053_v51 = vmul.f32 %v4255_v6, %v983_v50 }
 0x1fd   :  { %v3199_v53 = vpop.eup %3198  ;;  %v863_v14 = vadd.f32 1e-05, %v799_v18  ;;  %v1054_v1 = vmul.f32 %v4255_v6, %v984_v32 }
 0x1fe   :  { %v864_v0 = vadd.f32 1e-05, %v800_v44  ;;  %v3201_v30 = vpop.eup %3200  ;;  %v985_v55 = vmul.f32 %v3199_v53, %v4073_v57  ;;  %v689_v40 = vpop.xlane.xlu1 %688  ;;  %3012 = vmatmul.mubr.msk.bf16.gmra.mrb[24].mxu0 %vm184_vm0, %v1171_v38  ;;  %3080 = vmatmul.mubr.msk.bf16.gmra.mrb[24].mxu1 %vm184_vm0, %v1171_v38  ;;  %v1123_v48 = vadd.f32 %v4260_v37, %v1053_v51 }
 0x1ff   :  { %v692_v45 = vpop.xlane.xlu0 %691  ;;  %v986_v58 = vmul.f32 %v3201_v30, %v4080_v39  ;;  %3210 = vrsqrt.f32 %v863_v14  ;;  %v801_v21 = vmul.f32 0.03125, %v689_v40  ;;  %v1124_v22 = vadd.f32 %v4260_v37, %v1054_v1 }
 0x200   :  { %v802_v59 = vmul.f32 0.03125, %v692_v45  ;;  %3212 = vrsqrt.f32 %v864_v0  ;;  %v1172_v20 = vpack.c.bf16 %v1123_v48, %v1122_v29  ;;  %v1055_v8 = vmul.f32 %v4255_v6, %v985_v55 }
 0x201   :  { %v3203_v57 = vpop.eup %3202  ;;  %v865_v47 = vadd.f32 1e-05, %v801_v21  ;;  %v1056_v54 = vmul.f32 %v4255_v6, %v986_v58 }
 0x202   :  { %v866_v28 = vadd.f32 1e-05, %v802_v59  ;;  %v3205_v63 = vpop.eup %3204  ;;  %v987_v46 = vmul.f32 %v3203_v57, %v4085_v61  ;;  %v695_v42 = vpop.xlane.xlu1 %694  ;;  %3015 = vmatprep.mubr.msk.bf16.mxu0 %vm184_vm0, %v1172_v20  ;;  %3083 = vmatprep.mubr.msk.bf16.mxu1 %vm184_vm0, %v1172_v20  ;;  %v1125_v33 = vadd.f32 %v4260_v37, %v1055_v8 }
 0x203   :  { %v698_v39 = vpop.xlane.xlu0 %697  ;;  %v988_v41 = vmul.f32 %v3205_v63, %v4092_v52  ;;  %3214 = vrsqrt.f32 %v865_v47  ;;  %v803_v7 = vmul.f32 0.03125, %v695_v42  ;;  %v1126_v49 = vadd.f32 %v4260_v37, %v1056_v54 }
 0x204   :  { %v804_v10 = vmul.f32 0.03125, %v698_v39  ;;  %3216 = vrsqrt.f32 %v866_v28  ;;  %v1173_v15 = vpack.c.bf16 %v1125_v33, %v1124_v22  ;;  %v1057_v34 = vmul.f32 %v4255_v6, %v987_v46 }
 0x205   :  { %v3207_v61 = vpop.eup %3206  ;;  %v867_v62 = vadd.f32 1e-05, %v803_v7  ;;  %v1058_v16 = vmul.f32 %v4255_v6, %v988_v41 }
 0x206   :  { %v868_v9 = vadd.f32 1e-05, %v804_v10  ;;  %v3209_v17 = vpop.eup %3208  ;;  %v989_v12 = vmul.f32 %v3207_v61, %v4097_v4  ;;  %v701_v50 = vpop.xlane.xlu1 %700  ;;  %3016 = vmatmul.mubr.msk.bf16.gmra.mrb[28].mxu0 %vm184_vm0, %v1173_v15  ;;  %3084 = vmatmul.mubr.msk.bf16.gmra.mrb[28].mxu1 %vm184_vm0, %v1173_v15  ;;  %v1127_v31 = vadd.f32 %v4260_v37, %v1057_v34 }
 0x207   :  { %v704_v52 = vpop.xlane.xlu0 %703  ;;  %v990_v23 = vmul.f32 %v3209_v17, %v4104_v36  ;;  %3218 = vrsqrt.f32 %v867_v62  ;;  %v805_v2 = vmul.f32 0.03125, %v701_v50  ;;  %v1128_v30 = vadd.f32 %v4260_v37, %v1058_v16 }
 0x208   :  { %v806_v32 = vmul.f32 0.03125, %v704_v52  ;;  %3220 = vrsqrt.f32 %v868_v9  ;;  %v1174_v18 = vpack.c.bf16 %v1127_v31, %v1126_v49  ;;  %v1059_v44 = vmul.f32 %v4255_v6, %v989_v12 }
 0x209   :  { %v3211_v4 = vpop.eup %3210  ;;  %v869_v38 = vadd.f32 1e-05, %v805_v2  ;;  %v1060_v53 = vmul.f32 %v4255_v6, %v990_v23 }
 0x20a   :  { %v870_v51 = vadd.f32 1e-05, %v806_v32  ;;  %v3213_v14 = vpop.eup %3212  ;;  %v991_v0 = vmul.f32 %v3211_v4, %v4109_v11  ;;  %v707_v29 = vpop.xlane.xlu1 %706  ;;  %3019 = vmatprep.mubr.msk.bf16.mxu0 %vm184_vm0, %v1174_v18  ;;  %3087 = vmatprep.mubr.msk.bf16.mxu1 %vm184_vm0, %v1174_v18  ;;  %v1129_v55 = vadd.f32 %v4260_v37, %v1059_v44 }
 0x20b   :  { %v710_v36 = vpop.xlane.xlu0 %709  ;;  %v992_v40 = vmul.f32 %v3213_v14, %v4116_v24  ;;  %3222 = vrsqrt.f32 %v869_v38  ;;  %v807_v45 = vmul.f32 0.03125, %v707_v29  ;;  %v1130_v20 = vadd.f32 %v4260_v37, %v1060_v53 }
 0x20c   :  { %v808_v48 = vmul.f32 0.03125, %v710_v36  ;;  %3224 = vrsqrt.f32 %v870_v51  ;;  %v1175_v1 = vpack.c.bf16 %v1129_v55, %v1128_v30  ;;  %v1061_v58 = vmul.f32 %v4255_v6, %v991_v0  ;;  %v4924_v55 = vld [vmem:[#allocation39_spill] sm:$0xff] }
 0x20d   :  { %v3215_v11 = vpop.eup %3214  ;;  %v871_v21 = vadd.f32 1e-05, %v807_v45  ;;  %v1062_v54 = vmul.f32 %v4255_v6, %v992_v40 }
 0x20e   :  { %v872_v59 = vadd.f32 1e-05, %v808_v48  ;;  %v3217_v8 = vpop.eup %3216  ;;  %v993_v57 = vmul.f32 %v3215_v11, %v4121_v19  ;;  %v713_v47 = vpop.xlane.xlu1 %712  ;;  %3020 = vmatmul.mubr.msk.bf16.gmra.mrb[32].mxu0 %vm184_vm0, %v1175_v1  ;;  %3088 = vmatmul.mubr.msk.bf16.gmra.mrb[32].mxu1 %vm184_vm0, %v1175_v1  ;;  %v1131_v28 = vadd.f32 %v4260_v37, %v1061_v58  ;;  %v4925_v58 = vld [vmem:[#allocation40_spill] sm:$0xff] }
 0x20f   :  { %v716_v24 = vpop.xlane.xlu0 %715  ;;  %v994_v63 = vmul.f32 %v3217_v8, %v4128_v56  ;;  %3226 = vrsqrt.f32 %v871_v21  ;;  %v809_v46 = vmul.f32 0.03125, %v713_v47  ;;  %v1132_v61 = vadd.f32 %v4260_v37, %v1062_v54 }
 0x210   :  { %v810_v42 = vmul.f32 0.03125, %v716_v24  ;;  %3228 = vrsqrt.f32 %v872_v59  ;;  %v1176_v39 = vpack.c.bf16 %v1131_v28, %v1130_v20  ;;  %v1063_v22 = vmul.f32 %v4255_v6, %v993_v57 }
 0x211   :  { %v3219_v19 = vpop.eup %3218  ;;  %v873_v33 = vadd.f32 1e-05, %v809_v46  ;;  %v1064_v7 = vmul.f32 %v4255_v6, %v994_v63  ;;  %v4926_v63 = vld [vmem:[#allocation41_spill] sm:$0xff] }
 0x212   :  { %v874_v41 = vadd.f32 1e-05, %v810_v42  ;;  %v3221_v10 = vpop.eup %3220  ;;  %v995_v15 = vmul.f32 %v3219_v19, %v4133_v27  ;;  %v719_v34 = vpop.xlane.xlu1 %718  ;;  %3023 = vmatprep.mubr.msk.bf16.mxu0 %vm184_vm0, %v1176_v39  ;;  %3091 = vmatprep.mubr.msk.bf16.mxu1 %vm184_vm0, %v1176_v39  ;;  %v1133_v62 = vadd.f32 %v4260_v37, %v1063_v22 }
 0x213   :  { %v722_v56 = vpop.xlane.xlu0 %721  ;;  %v996_v9 = vmul.f32 %v3221_v10, %v4140_v60  ;;  %3230 = vrsqrt.f32 %v873_v33  ;;  %v811_v49 = vmul.f32 0.03125, %v719_v34  ;;  %v1134_v16 = vadd.f32 %v4260_v37, %v1064_v7  ;;  %v4927_v33 = vld [vmem:[#allocation42_spill] sm:$0xff] }
 0x214   :  { %v812_v17 = vmul.f32 0.03125, %v722_v56  ;;  %3232 = vrsqrt.f32 %v874_v41  ;;  %v1177_v12 = vpack.c.bf16 %v1133_v62, %v1132_v61  ;;  %v1065_v50 = vmul.f32 %v4255_v6, %v995_v15 }
 0x215   :  { %v3223_v27 = vpop.eup %3222  ;;  %v875_v52 = vadd.f32 1e-05, %v811_v49  ;;  %v1066_v44 = vmul.f32 %v4255_v6, %v996_v9 }
 0x216   :  { %v876_v31 = vadd.f32 1e-05, %v812_v17  ;;  %v3225_v23 = vpop.eup %3224  ;;  %v997_v2 = vmul.f32 %v3223_v27, %v4145_v35  ;;  %v725_v32 = vpop.xlane.xlu1 %724  ;;  %3024 = vmatmul.mubr.msk.bf16.gmra.mrb[36].mxu0 %vm184_vm0, %v1177_v12  ;;  %3092 = vmatmul.mubr.msk.bf16.gmra.mrb[36].mxu1 %vm184_vm0, %v1177_v12  ;;  %v1135_v18 = vadd.f32 %v4260_v37, %v1065_v50  ;;  %v4928_v17 = vld [vmem:[#allocation43_spill] sm:$0xff] }
 0x217   :  { %v728_v60 = vpop.xlane.xlu0 %727  ;;  %v998_v4 = vmul.f32 %v3225_v23, %v4152_v3  ;;  %3234 = vrsqrt.f32 %v875_v52  ;;  %v813_v38 = vmul.f32 0.03125, %v725_v32  ;;  %v1136_v48 = vadd.f32 %v4260_v37, %v1066_v44 }
 0x218   :  { %v814_v51 = vmul.f32 0.03125, %v728_v60  ;;  %3236 = vrsqrt.f32 %v876_v31  ;;  %v1178_v53 = vpack.c.bf16 %v1135_v18, %v1134_v16  ;;  %v1067_v14 = vmul.f32 %v4255_v6, %v997_v2 }
 0x219   :  { %v3227_v35 = vpop.eup %3226  ;;  %v877_v0 = vadd.f32 1e-05, %v813_v38  ;;  %v1068_v36 = vmul.f32 %v4255_v6, %v998_v4 }
 0x21a   :  { %v878_v29 = vadd.f32 1e-05, %v814_v51  ;;  %v3229_v30 = vpop.eup %3228  ;;  %v999_v40 = vmul.f32 %v3227_v35, %v4924_v55  ;;  %v731_v45 = vpop.xlane.xlu1 %730  ;;  %3027 = vmatprep.mubr.msk.bf16.mxu0 %vm184_vm0, %v1178_v53  ;;  %3095 = vmatprep.mubr.msk.bf16.mxu1 %vm184_vm0, %v1178_v53  ;;  %v1137_v1 = vadd.f32 %v4260_v37, %v1067_v14  ;;  %v4929_v53 = vld [vmem:[#allocation23_spill] sm:$0xff] }
 0x21b   :  { %v734_v3 = vpop.xlane.xlu0 %733  ;;  %v1000_v11 = vmul.f32 %v3229_v30, %v4925_v58  ;;  %3238 = vrsqrt.f32 %v877_v0  ;;  %v815_v21 = vmul.f32 0.03125, %v731_v45  ;;  %v1138_v28 = vadd.f32 %v4260_v37, %v1068_v36 }
 0x21c   :  { %v816_v59 = vmul.f32 0.03125, %v734_v3  ;;  %3240 = vrsqrt.f32 %v878_v29  ;;  %v1179_v20 = vpack.c.bf16 %v1137_v1, %v1136_v48  ;;  %v1069_v8 = vmul.f32 %v4255_v6, %v999_v40  ;;  %v4930_v29 = vld [vmem:[#allocation24_spill] sm:$0xff]  ;;  %v4485_v48 = vld [vmem:[#allocation5] ss:$0 sm:$0xff] }
 0x21d   :  { %v3231_v57 = vpop.eup %3230  ;;  %v879_v47 = vadd.f32 1e-05, %v815_v21  ;;  %v1070_v19 = vmul.f32 %v4255_v6, %v1000_v11  ;;  %v4931_v11 = vld [vmem:[#allocation25_spill] sm:$0xff] }
 0x21e   :  { %v880_v24 = vadd.f32 1e-05, %v816_v59  ;;  %v3233_v54 = vpop.eup %3232  ;;  %v1001_v46 = vmul.f32 %v3231_v57, %v4926_v63  ;;  %v737_v42 = vpop.xlane.xlu1 %736  ;;  %3028 = vmatmul.mubr.msk.bf16.gmra.mrb[40].mxu0 %vm184_vm0, %v1179_v20  ;;  %3096 = vmatmul.mubr.msk.bf16.gmra.mrb[40].mxu1 %vm184_vm0, %v1179_v20  ;;  %v1139_v22 = vadd.f32 %v4260_v37, %v1069_v8  ;;  %v4932_v8 = vld [vmem:[#allocation26_spill] sm:$0xff] }
 0x21f   :  { %v740_v39 = vpop.xlane.xlu0 %739  ;;  %v1002_v41 = vmul.f32 %v3233_v54, %v4927_v33  ;;  %3242 = vrsqrt.f32 %v879_v47  ;;  %v817_v7 = vmul.f32 0.03125, %v737_v42  ;;  %v1140_v52 = vadd.f32 %v4260_v37, %v1070_v19 }
 0x220   :  { %v818_v10 = vmul.f32 0.03125, %v740_v39  ;;  %3244 = vrsqrt.f32 %v880_v24  ;;  %v1180_v15 = vpack.c.bf16 %v1139_v22, %v1138_v28  ;;  %v1071_v34 = vmul.f32 %v4255_v6, %v1001_v46  ;;  %v4495_v28 = vld [vmem:[#allocation7] ss:$0 sm:$0xff]  ;;  %v4933_v46 = vld [vmem:[#allocation27_spill] sm:$0xff]  ;;  %v4934_v22 = vld [vmem:[#allocation28_spill] sm:$0xff] }
 0x221   :  { %v3235_v56 = vpop.eup %3234  ;;  %v881_v61 = vadd.f32 1e-05, %v817_v7  ;;  %v1072_v9 = vmul.f32 %v4255_v6, %v1002_v41 }
 0x222   :  { %v882_v62 = vadd.f32 1e-05, %v818_v10  ;;  %v3237_v49 = vpop.eup %3236  ;;  %v1003_v12 = vmul.f32 %v3235_v56, %v4928_v17  ;;  %v743_v50 = vpop.xlane.xlu1 %742  ;;  %3031 = vmatprep.mubr.msk.bf16.mxu0 %vm184_vm0, %v1180_v15  ;;  %3099 = vmatprep.mubr.msk.bf16.mxu1 %vm184_vm0, %v1180_v15  ;;  %v1141_v31 = vadd.f32 %v4260_v37, %v1071_v34  ;;  %v4935_v34 = vld [vmem:[#allocation29_spill] sm:$0xff] }
 0x223   :  { %v746_v27 = vpop.xlane.xlu0 %745  ;;  %v1004_v16 = vmul.f32 %v3237_v49, %v4188_v43  ;;  %3246 = vrsqrt.f32 %v881_v61  ;;  %v819_v23 = vmul.f32 0.03125, %v743_v50  ;;  %v1142_v38 = vadd.f32 %v4260_v37, %v1072_v9  ;;  %v4936_v9 = vld [vmem:[#allocation30_spill] sm:$0xff] }
 0x224   :  { %v820_v2 = vmul.f32 0.03125, %v746_v27  ;;  %3248 = vrsqrt.f32 %v882_v62  ;;  %v1181_v32 = vpack.c.bf16 %v1141_v31, %v1140_v52  ;;  %v1073_v60 = vmul.f32 %v4255_v6, %v1003_v12  ;;  %v4937_v52 = vld [vmem:[#allocation31_spill] sm:$0xff] }
 0x225   :  { %v3239_v18 = vpop.eup %3238  ;;  %v883_v44 = vadd.f32 1e-05, %v819_v23  ;;  %v1074_v0 = vmul.f32 %v4255_v6, %v1004_v16 }
 0x226   :  { %v884_v4 = vadd.f32 1e-05, %v820_v2  ;;  %v3241_v51 = vpop.eup %3240  ;;  %v1005_v14 = vmul.f32 %v3239_v18, %v4929_v53  ;;  %v749_v35 = vpop.xlane.xlu1 %748  ;;  %3032 = vmatmul.mubr.msk.bf16.gmra.mrb[44].mxu0 %vm184_vm0, %v1181_v32  ;;  %3100 = vmatmul.mubr.msk.bf16.gmra.mrb[44].mxu1 %vm184_vm0, %v1181_v32  ;;  %v1143_v43 = vadd.f32 %v4260_v37, %v1073_v60 }
 0x227   :  { %v1006_v36 = vmul.f32 %v3241_v51, %v4930_v29  ;;  %3250 = vrsqrt.f32 %v883_v44  ;;  %v821_v30 = vmul.f32 0.03125, %v749_v35  ;;  %v1144_v59 = vadd.f32 %v4260_v37, %v1074_v0 }
 0x228   :  { %3252 = vrsqrt.f32 %v884_v4  ;;  %v1182_v55 = vpack.c.bf16 %v1143_v43, %v1142_v38  ;;  %v1075_v40 = vmul.f32 %v4255_v6, %v1005_v14 }
 0x229   :  { %v3243_v45 = vpop.eup %3242  ;;  %v885_v3 = vadd.f32 1e-05, %v821_v30  ;;  %v1076_v1 = vmul.f32 %v4485_v48, %v1006_v36 }
 0x22a   :  { %v3245_v58 = vpop.eup %3244  ;;  %v1007_v21 = vmul.f32 %v3243_v45, %v4931_v11  ;;  %3035 = vmatprep.mubr.msk.bf16.mxu0 %vm184_vm0, %v1182_v55  ;;  %3103 = vmatprep.mubr.msk.bf16.mxu1 %vm184_vm0, %v1182_v55  ;;  %v1145_v20 = vadd.f32 %v4260_v37, %v1075_v40 }
 0x22b   :  { %v1008_v57 = vmul.f32 %v3245_v58, %v4932_v8  ;;  %3254 = vrsqrt.f32 %v885_v3  ;;  %v1146_v54 = vadd.f32 %v4495_v28, %v1076_v1 }
 0x22c   :  { %v1183_v6 = vpack.c.bf16 %v1145_v20, %v1144_v59  ;;  %v1077_v47 = vmul.f32 %v4485_v48, %v1007_v21 }
 0x22d   :  { %v3247_v24 = vpop.eup %3246  ;;  %v1078_v39 = vmul.f32 %v4485_v48, %v1008_v57 }
 0x22e   :  { %v3249_v63 = vpop.eup %3248  ;;  %v1009_v42 = vmul.f32 %v3247_v24, %v4933_v46  ;;  %3036 = vmatmul.mubr.msk.bf16.gmra.mrb[48].mxu0 %vm184_vm0, %v1183_v6  ;;  %3104 = vmatmul.mubr.msk.bf16.gmra.mrb[48].mxu1 %vm184_vm0, %v1183_v6  ;;  %v1147_v37 = vadd.f32 %v4495_v28, %v1077_v47 }
 0x22f   :  { %v1010_v19 = vmul.f32 %v3249_v63, %v4934_v22  ;;  %v1148_v61 = vadd.f32 %v4495_v28, %v1078_v39  ;;  %v4542_v63 = vld [vmem:[#allocation10] ss:$0 sm:$0xff] }
 0x230   :  { %v1184_v33 = vpack.c.bf16 %v1147_v37, %v1146_v54  ;;  %v1079_v41 = vmul.f32 %v4485_v48, %v1009_v42 }
 0x231   :  { %v3251_v7 = vpop.eup %3250  ;;  %v1080_v10 = vmul.f32 %v4485_v48, %v1010_v19 }
 0x232   :  { %v3253_v15 = vpop.eup %3252  ;;  %v1011_v56 = vmul.f32 %v3251_v7, %v4935_v34  ;;  %3039 = vmatprep.mubr.msk.bf16.mxu0 %vm184_vm0, %v1184_v33  ;;  %3107 = vmatprep.mubr.msk.bf16.mxu1 %vm184_vm0, %v1184_v33  ;;  %v1149_v62 = vadd.f32 %v4495_v28, %v1079_v41 }
 0x233   :  { %v1012_v49 = vmul.f32 %v3253_v15, %v4936_v9  ;;  %v1150_v27 = vadd.f32 %v4495_v28, %v1080_v10 }
 0x234   :  { %v1185_v17 = vpack.c.bf16 %v1149_v62, %v1148_v61  ;;  %v1081_v12 = vmul.f32 %v4485_v48, %v1011_v56 }
 0x235   :  { %v3255_v50 = vpop.eup %3254  ;;  %v1082_v23 = vmul.f32 %v4485_v48, %v1012_v49 }
 0x236   :  { %v1013_v31 = vmul.f32 %v3255_v50, %v4937_v52  ;;  %3040 = vmatmul.mubr.msk.bf16.gmra.mrb[52].mxu0 %vm184_vm0, %v1185_v17  ;;  %3108 = vmatmul.mubr.msk.bf16.gmra.mrb[52].mxu1 %vm184_vm0, %v1185_v17  ;;  %v1151_v16 = vadd.f32 %v4495_v28, %v1081_v12 }
 0x237   :  { %v1152_v60 = vadd.f32 %v4495_v28, %v1082_v23 }
 0x238   :  { %v1186_v2 = vpack.c.bf16 %v1151_v16, %v1150_v27  ;;  %v1083_v32 = vmul.f32 %v4485_v48, %v1013_v31 }
 0x23a   :  { %3043 = vmatprep.mubr.msk.bf16.mxu0 %vm184_vm0, %v1186_v2  ;;  %3111 = vmatprep.mubr.msk.bf16.mxu1 %vm184_vm0, %v1186_v2  ;;  %v1153_v18 = vadd.f32 %v4495_v28, %v1083_v32 }
 0x23c   :  { %v1187_v44 = vpack.c.bf16 %v1153_v18, %v1152_v60 }
 0x23e   :  { %3044 = vmatmul.mubr.msk.bf16.gmra.mrb[56].mxu0 %vm184_vm0, %v1187_v44  ;;  %3112 = vmatmul.mubr.msk.bf16.gmra.mrb[56].mxu1 %vm184_vm0, %v1187_v44 }
 0x268   :  { %v752_v4 = vpop.xlane.xlu0 %751 }
 0x269   :  { %v822_v38 = vmul.f32 0.03125, %v752_v4 }
 0x26b   :  { %v886_v51 = vadd.f32 1e-05, %v822_v38 }
 0x26c   :  { %v755_v53 = vpop.xlane.xlu1 %754 }
 0x26d   :  { %3256 = vrsqrt.f32 %v886_v51  ;;  %v823_v14 = vmul.f32 0.03125, %v755_v53 }
 0x26f   :  { %v887_v35 = vadd.f32 1e-05, %v823_v14 }
 0x270   :  { %v758_v43 = vpop.xlane.xlu0 %757 }
 0x271   :  { %3258 = vrsqrt.f32 %v887_v35  ;;  %v824_v0 = vmul.f32 0.03125, %v758_v43 }
 0x273   :  { %v888_v29 = vadd.f32 1e-05, %v824_v0  ;;  %v761_v36 = vpop.xlane.xlu1 %760 }
 0x274   :  { %v825_v30 = vmul.f32 0.03125, %v761_v36 }
 0x275   :  { %3260 = vrsqrt.f32 %v888_v29 }
 0x276   :  { %v889_v55 = vadd.f32 1e-05, %v825_v30 }
 0x277   :  { %v3257_v40 = vpop.eup %3256 }
 0x278   :  { %v1014_v45 = vmul.f32 %v3257_v40, %v4310_v13  ;;  %3262 = vrsqrt.f32 %v889_v55 }
 0x27a   :  { %v1084_v58 = vmul.f32 %v4485_v48, %v1014_v45 }
 0x27b   :  { %v3259_v3 = vpop.eup %3258 }
 0x27c   :  { %v1015_v1 = vmul.f32 %v3259_v3, %v4323_v26  ;;  %v1154_v20 = vadd.f32 %v4495_v28, %v1084_v58 }
 0x27e   :  { %v1085_v11 = vmul.f32 %v4485_v48, %v1015_v1 }
 0x27f   :  { %v3261_v21 = vpop.eup %3260 }
 0x280   :  { %v1016_v59 = vmul.f32 %v3261_v21, %v4337_v5  ;;  %v1155_v8 = vadd.f32 %v4495_v28, %v1085_v11 }
 0x282   :  { %v3263_v57 = vpop.eup %3262  ;;  %v1188_v6 = vpack.c.bf16 %v1155_v8, %v1154_v20  ;;  %v1086_v13 = vmul.f32 %v4485_v48, %v1016_v59 }
 0x283   :  { %v1017_v47 = vmul.f32 %v3263_v57, %v4351_v25  ;;  %v4544_v25 = vld [vmem:[#allocation13] ss:$0 sm:$0xff] }
 0x284   :  { %3047 = vmatprep.mubr.msk.bf16.mxu0 %vm184_vm0, %v1188_v6  ;;  %3115 = vmatprep.mubr.msk.bf16.mxu1 %vm184_vm0, %v1188_v6  ;;  %v1156_v24 = vadd.f32 %v4495_v28, %v1086_v13 }
 0x285   :  { %v1087_v26 = vmul.f32 %v4485_v48, %v1017_v47 }
 0x287   :  { %v1157_v5 = vadd.f32 %v4495_v28, %v1087_v26 }
 0x289   :  { %v1189_v54 = vpack.c.bf16 %v1157_v5, %v1156_v24 }
 0x28b   :  { %3048 = vmatmul.mubr.msk.bf16.gmra.mrb[60].mxu0 %vm184_vm0, %v1189_v54  ;;  %3116 = vmatmul.mubr.msk.bf16.gmra.mrb[60].mxu1 %vm184_vm0, %v1189_v54 }
 0x299   :  { %v2989_v46 = vpop.f32.mrb[0].mxu0  ;;  %v3057_v42 = vpop.f32.mrb[0].mxu1 }
 0x29a   :  { %v1352_v37 = vadd.f32 %v2989_v46, %v4542_v63  ;;  %v1985_v39 = vadd.f32 %v3057_v42, %v4544_v25  ;;  %v1343_v48 = vpop.f32.mrb[1].mxu0  ;;  %v1976_v22 = vpop.f32.mrb[1].mxu1 }
 0x29b   :  { %v1344_v28 = vadd.f32 %v4542_v63, %v1343_v48  ;;  %v1977_v19 = vadd.f32 %v4544_v25, %v1976_v22  ;;  %v2990_v33 = vpop.f32.mrb[2].mxu0  ;;  %v3058_v41 = vpop.f32.mrb[2].mxu1 }
 0x29c   :  { %v2789_v7 = vpack.c.bf16 %v1352_v37, %v1352_v37  ;;  %v2853_v10 = vpack.c.bf16 %v1985_v39, %v1985_v39  ;;  %v1355_v15 = vadd.f32 %v2990_v33, %v4542_v63  ;;  %v1988_v34 = vadd.f32 %v3058_v41, %v4544_v25  ;;  %v1346_v56 = vpop.f32.mrb[3].mxu0  ;;  %v1979_v61 = vpop.f32.mrb[3].mxu1 }
 0x29d   :  { %v2787_v62 = vpack.c.bf16 %v1344_v28, %v1344_v28  ;;  %v2851_v9 = vpack.c.bf16 %v1977_v19, %v1977_v19  ;;  %v1347_v49 = vadd.f32 %v4542_v63, %v1346_v56  ;;  %v1980_v17 = vadd.f32 %v4544_v25, %v1979_v61 }
 0x29e   :  { %1857 = vst.msk [vmem:[#allocation14 + $0x8] sm:$0xf] %vm1854_vm1, %v2789_v7  ;;  %2489 = vst.msk [vmem:[#allocation15 + $0x8] sm:$0xf] %vm1854_vm1, %v2853_v10  ;;  %v2790_v12 = vpack.c.bf16 %v1355_v15, %v1355_v15  ;;  %v2854_v50 = vpack.c.bf16 %v1988_v34, %v1988_v34 }
 0x29f   :  { %1855 = vst.msk [vmem:[#allocation14] sm:$0xf] %vm1854_vm1, %v2787_v62  ;;  %2487 = vst.msk [vmem:[#allocation15] sm:$0xf] %vm1854_vm1, %v2851_v9  ;;  %v2788_v27 = vpack.c.bf16 %v1347_v49, %v1347_v49  ;;  %v2852_v52 = vpack.c.bf16 %v1980_v17, %v1980_v17 }
 0x2a0   :  { %1858 = vst.msk [vmem:[#allocation14 + $0xc] sm:$0xf] %vm1854_vm1, %v2790_v12  ;;  %2490 = vst.msk [vmem:[#allocation15 + $0xc] sm:$0xf] %vm1854_vm1, %v2854_v50 }
 0x2a1   :  { %1856 = vst.msk [vmem:[#allocation14 + $0x4] sm:$0xf] %vm1854_vm1, %v2788_v27  ;;  %2488 = vst.msk [vmem:[#allocation15 + $0x4] sm:$0xf] %vm1854_vm1, %v2852_v52  ;;  %v2993_v31 = vpop.f32.mrb[4].mxu0  ;;  %v3061_v16 = vpop.f32.mrb[4].mxu1 }
 0x2a2   :  { %v1368_v23 = vadd.f32 %v2993_v31, %v4542_v63  ;;  %v2001_v2 = vadd.f32 %v3061_v16, %v4544_v25  ;;  %v1359_v32 = vpop.f32.mrb[5].mxu0  ;;  %v1992_v60 = vpop.f32.mrb[5].mxu1 }
 0x2a3   :  { %v1360_v18 = vadd.f32 %v4542_v63, %v1359_v32  ;;  %v1993_v44 = vadd.f32 %v4544_v25, %v1992_v60  ;;  %v2994_v4 = vpop.f32.mrb[6].mxu0  ;;  %v3062_v38 = vpop.f32.mrb[6].mxu1 }
 0x2a4   :  { %v2793_v51 = vpack.c.bf16 %v1368_v23, %v1368_v23  ;;  %v2857_v53 = vpack.c.bf16 %v2001_v2, %v2001_v2  ;;  %v1371_v14 = vadd.f32 %v2994_v4, %v4542_v63  ;;  %v2004_v35 = vadd.f32 %v3062_v38, %v4544_v25  ;;  %v1362_v43 = vpop.f32.mrb[7].mxu0  ;;  %v1995_v0 = vpop.f32.mrb[7].mxu1 }
 0x2a5   :  { %v2791_v29 = vpack.c.bf16 %v1360_v18, %v1360_v18  ;;  %v2855_v36 = vpack.c.bf16 %v1993_v44, %v1993_v44  ;;  %v1363_v30 = vadd.f32 %v4542_v63, %v1362_v43  ;;  %v1996_v55 = vadd.f32 %v4544_v25, %v1995_v0 }
 0x2a6   :  { %1861 = vst.msk [vmem:[#allocation14 + $0x18] sm:$0xf] %vm1854_vm1, %v2793_v51  ;;  %2493 = vst.msk [vmem:[#allocation15 + $0x18] sm:$0xf] %vm1854_vm1, %v2857_v53  ;;  %v2794_v40 = vpack.c.bf16 %v1371_v14, %v1371_v14  ;;  %v2858_v45 = vpack.c.bf16 %v2004_v35, %v2004_v35 }
 0x2a7   :  { %1859 = vst.msk [vmem:[#allocation14 + $0x10] sm:$0xf] %vm1854_vm1, %v2791_v29  ;;  %2491 = vst.msk [vmem:[#allocation15 + $0x10] sm:$0xf] %vm1854_vm1, %v2855_v36  ;;  %v2792_v3 = vpack.c.bf16 %v1363_v30, %v1363_v30  ;;  %v2856_v1 = vpack.c.bf16 %v1996_v55, %v1996_v55 }
 0x2a8   :  { %1862 = vst.msk [vmem:[#allocation14 + $0x1c] sm:$0xf] %vm1854_vm1, %v2794_v40  ;;  %2494 = vst.msk [vmem:[#allocation15 + $0x1c] sm:$0xf] %vm1854_vm1, %v2858_v45 }
 0x2a9   :  { %1860 = vst.msk [vmem:[#allocation14 + $0x14] sm:$0xf] %vm1854_vm1, %v2792_v3  ;;  %2492 = vst.msk [vmem:[#allocation15 + $0x14] sm:$0xf] %vm1854_vm1, %v2856_v1  ;;  %v2997_v58 = vpop.f32.mrb[8].mxu0  ;;  %v3065_v11 = vpop.f32.mrb[8].mxu1 }
 0x2aa   :  { %v1384_v21 = vadd.f32 %v2997_v58, %v4542_v63  ;;  %v2017_v59 = vadd.f32 %v3065_v11, %v4544_v25  ;;  %v1375_v20 = vpop.f32.mrb[9].mxu0  ;;  %v2008_v8 = vpop.f32.mrb[9].mxu1 }
 0x2ab   :  { %v1376_v57 = vadd.f32 %v4542_v63, %v1375_v20  ;;  %v2009_v6 = vadd.f32 %v4544_v25, %v2008_v8  ;;  %v2998_v47 = vpop.f32.mrb[10].mxu0  ;;  %v3066_v13 = vpop.f32.mrb[10].mxu1 }
 0x2ac   :  { %v2797_v26 = vpack.c.bf16 %v1384_v21, %v1384_v21  ;;  %v2861_v24 = vpack.c.bf16 %v2017_v59, %v2017_v59  ;;  %v1387_v5 = vadd.f32 %v2998_v47, %v4542_v63  ;;  %v2020_v54 = vadd.f32 %v3066_v13, %v4544_v25  ;;  %v1378_v46 = vpop.f32.mrb[11].mxu0  ;;  %v2011_v42 = vpop.f32.mrb[11].mxu1 }
 0x2ad   :  { %v2795_v37 = vpack.c.bf16 %v1376_v57, %v1376_v57  ;;  %v2859_v39 = vpack.c.bf16 %v2009_v6, %v2009_v6  ;;  %v1379_v48 = vadd.f32 %v4542_v63, %v1378_v46  ;;  %v2012_v22 = vadd.f32 %v4544_v25, %v2011_v42 }
 0x2ae   :  { %1865 = vst.msk [vmem:[#allocation14 + $0x28] sm:$0xf] %vm1854_vm1, %v2797_v26  ;;  %2497 = vst.msk [vmem:[#allocation15 + $0x28] sm:$0xf] %vm1854_vm1, %v2861_v24  ;;  %v2798_v28 = vpack.c.bf16 %v1387_v5, %v1387_v5  ;;  %v2862_v19 = vpack.c.bf16 %v2020_v54, %v2020_v54 }
 0x2af   :  { %1863 = vst.msk [vmem:[#allocation14 + $0x20] sm:$0xf] %vm1854_vm1, %v2795_v37  ;;  %2495 = vst.msk [vmem:[#allocation15 + $0x20] sm:$0xf] %vm1854_vm1, %v2859_v39  ;;  %v2796_v33 = vpack.c.bf16 %v1379_v48, %v1379_v48  ;;  %v2860_v41 = vpack.c.bf16 %v2012_v22, %v2012_v22 }
 0x2b0   :  { %1866 = vst.msk [vmem:[#allocation14 + $0x2c] sm:$0xf] %vm1854_vm1, %v2798_v28  ;;  %2498 = vst.msk [vmem:[#allocation15 + $0x2c] sm:$0xf] %vm1854_vm1, %v2862_v19 }
 0x2b1   :  { %1864 = vst.msk [vmem:[#allocation14 + $0x24] sm:$0xf] %vm1854_vm1, %v2796_v33  ;;  %2496 = vst.msk [vmem:[#allocation15 + $0x24] sm:$0xf] %vm1854_vm1, %v2860_v41  ;;  %v3001_v7 = vpop.f32.mrb[12].mxu0  ;;  %v3069_v10 = vpop.f32.mrb[12].mxu1 }
 0x2b2   :  { %v1400_v15 = vadd.f32 %v3001_v7, %v4542_v63  ;;  %v2033_v34 = vadd.f32 %v3069_v10, %v4544_v25  ;;  %v1391_v56 = vpop.f32.mrb[13].mxu0  ;;  %v2024_v61 = vpop.f32.mrb[13].mxu1 }
 0x2b3   :  { %v1392_v62 = vadd.f32 %v4542_v63, %v1391_v56  ;;  %v2025_v9 = vadd.f32 %v4544_v25, %v2024_v61  ;;  %v3002_v49 = vpop.f32.mrb[14].mxu0  ;;  %v3070_v17 = vpop.f32.mrb[14].mxu1 }
 0x2b4   :  { %v2801_v12 = vpack.c.bf16 %v1400_v15, %v1400_v15  ;;  %v2865_v50 = vpack.c.bf16 %v2033_v34, %v2033_v34  ;;  %v1403_v27 = vadd.f32 %v3002_v49, %v4542_v63  ;;  %v2036_v52 = vadd.f32 %v3070_v17, %v4544_v25  ;;  %v1394_v31 = vpop.f32.mrb[15].mxu0  ;;  %v2027_v16 = vpop.f32.mrb[15].mxu1 }
 0x2b5   :  { %v2799_v23 = vpack.c.bf16 %v1392_v62, %v1392_v62  ;;  %v2863_v2 = vpack.c.bf16 %v2025_v9, %v2025_v9  ;;  %v1395_v32 = vadd.f32 %v4542_v63, %v1394_v31  ;;  %v2028_v60 = vadd.f32 %v4544_v25, %v2027_v16 }
 0x2b6   :  { %1869 = vst.msk [vmem:[#allocation14 + $0x38] sm:$0xf] %vm1854_vm1, %v2801_v12  ;;  %2501 = vst.msk [vmem:[#allocation15 + $0x38] sm:$0xf] %vm1854_vm1, %v2865_v50  ;;  %v2802_v18 = vpack.c.bf16 %v1403_v27, %v1403_v27  ;;  %v2866_v44 = vpack.c.bf16 %v2036_v52, %v2036_v52 }
 0x2b7   :  { %1867 = vst.msk [vmem:[#allocation14 + $0x30] sm:$0xf] %vm1854_vm1, %v2799_v23  ;;  %2499 = vst.msk [vmem:[#allocation15 + $0x30] sm:$0xf] %vm1854_vm1, %v2863_v2  ;;  %v2800_v4 = vpack.c.bf16 %v1395_v32, %v1395_v32  ;;  %v2864_v38 = vpack.c.bf16 %v2028_v60, %v2028_v60 }
 0x2b8   :  { %1870 = vst.msk [vmem:[#allocation14 + $0x3c] sm:$0xf] %vm1854_vm1, %v2802_v18  ;;  %2502 = vst.msk [vmem:[#allocation15 + $0x3c] sm:$0xf] %vm1854_vm1, %v2866_v44 }
 0x2b9   :  { %1868 = vst.msk [vmem:[#allocation14 + $0x34] sm:$0xf] %vm1854_vm1, %v2800_v4  ;;  %2500 = vst.msk [vmem:[#allocation15 + $0x34] sm:$0xf] %vm1854_vm1, %v2864_v38  ;;  %v3005_v51 = vpop.f32.mrb[16].mxu0 }
 0x2ba   :  { %v1416_v53 = vadd.f32 %v3005_v51, %v4542_v63  ;;  %v3073_v14 = vpop.f32.mrb[16].mxu1  ;;  %v1407_v35 = vpop.f32.mrb[17].mxu0 }
 0x2bb   :  { %v2049_v43 = vadd.f32 %v3073_v14, %v4544_v25  ;;  %v1408_v0 = vadd.f32 %v4542_v63, %v1407_v35  ;;  %v2040_v29 = vpop.f32.mrb[17].mxu1  ;;  %v3006_v36 = vpop.f32.mrb[18].mxu0 }
 0x2bc   :  { %v2805_v30 = vpack.c.bf16 %v1416_v53, %v1416_v53  ;;  %v2041_v55 = vadd.f32 %v4544_v25, %v2040_v29  ;;  %v1419_v40 = vadd.f32 %v3006_v36, %v4542_v63  ;;  %v3074_v45 = vpop.f32.mrb[18].mxu1  ;;  %v1410_v3 = vpop.f32.mrb[19].mxu0 }
 0x2bd   :  { %v2869_v1 = vpack.c.bf16 %v2049_v43, %v2049_v43  ;;  %v2803_v58 = vpack.c.bf16 %v1408_v0, %v1408_v0  ;;  %v2052_v11 = vadd.f32 %v3074_v45, %v4544_v25  ;;  %v1411_v21 = vadd.f32 %v4542_v63, %v1410_v3  ;;  %v2043_v59 = vpop.f32.mrb[19].mxu1 }
 0x2be   :  { %1873 = vst.msk [vmem:[#allocation14 + $0x48] sm:$0xf] %vm1854_vm1, %v2805_v30  ;;  %v2867_v20 = vpack.c.bf16 %v2041_v55, %v2041_v55  ;;  %v2806_v8 = vpack.c.bf16 %v1419_v40, %v1419_v40  ;;  %v2044_v57 = vadd.f32 %v4544_v25, %v2043_v59 }
 0x2bf   :  { %2505 = vst.msk [vmem:[#allocation15 + $0x48] sm:$0xf] %vm1854_vm1, %v2869_v1  ;;  %1871 = vst.msk [vmem:[#allocation14 + $0x40] sm:$0xf] %vm1854_vm1, %v2803_v58  ;;  %v2870_v6 = vpack.c.bf16 %v2052_v11, %v2052_v11  ;;  %v2804_v47 = vpack.c.bf16 %v1411_v21, %v1411_v21 }
 0x2c0   :  { %2503 = vst.msk [vmem:[#allocation15 + $0x40] sm:$0xf] %vm1854_vm1, %v2867_v20  ;;  %1874 = vst.msk [vmem:[#allocation14 + $0x4c] sm:$0xf] %vm1854_vm1, %v2806_v8  ;;  %v2868_v13 = vpack.c.bf16 %v2044_v57, %v2044_v57 }
 0x2c1   :  { %2506 = vst.msk [vmem:[#allocation15 + $0x4c] sm:$0xf] %vm1854_vm1, %v2870_v6  ;;  %1872 = vst.msk [vmem:[#allocation14 + $0x44] sm:$0xf] %vm1854_vm1, %v2804_v47 }
 0x2c2   :  { %2504 = vst.msk [vmem:[#allocation15 + $0x44] sm:$0xf] %vm1854_vm1, %v2868_v13 }
 0x2c5   :  { %v3009_v26 = vpop.f32.mrb[20].mxu0  ;;  %v3077_v24 = vpop.f32.mrb[20].mxu1 }
 0x2c6   :  { %v1432_v5 = vadd.f32 %v3009_v26, %v4542_v63  ;;  %v2065_v54 = vadd.f32 %v3077_v24, %v4544_v25  ;;  %v1423_v46 = vpop.f32.mrb[21].mxu0  ;;  %v2056_v42 = vpop.f32.mrb[21].mxu1 }
 0x2c7   :  { %v1424_v37 = vadd.f32 %v4542_v63, %v1423_v46  ;;  %v2057_v39 = vadd.f32 %v4544_v25, %v2056_v42  ;;  %v3010_v48 = vpop.f32.mrb[22].mxu0  ;;  %v3078_v22 = vpop.f32.mrb[22].mxu1 }
 0x2c8   :  { %v2809_v28 = vpack.c.bf16 %v1432_v5, %v1432_v5  ;;  %v2873_v19 = vpack.c.bf16 %v2065_v54, %v2065_v54  ;;  %v1435_v33 = vadd.f32 %v3010_v48, %v4542_v63  ;;  %v2068_v41 = vadd.f32 %v3078_v22, %v4544_v25  ;;  %v1426_v7 = vpop.f32.mrb[23].mxu0  ;;  %v2059_v10 = vpop.f32.mrb[23].mxu1 }
 0x2c9   :  { %v2807_v15 = vpack.c.bf16 %v1424_v37, %v1424_v37  ;;  %v2871_v34 = vpack.c.bf16 %v2057_v39, %v2057_v39  ;;  %v1427_v56 = vadd.f32 %v4542_v63, %v1426_v7  ;;  %v2060_v61 = vadd.f32 %v4544_v25, %v2059_v10 }
 0x2ca   :  { %1877 = vst.msk [vmem:[#allocation14 + $0x58] sm:$0xf] %vm1854_vm1, %v2809_v28  ;;  %2509 = vst.msk [vmem:[#allocation15 + $0x58] sm:$0xf] %vm1854_vm1, %v2873_v19  ;;  %v2810_v62 = vpack.c.bf16 %v1435_v33, %v1435_v33  ;;  %v2874_v9 = vpack.c.bf16 %v2068_v41, %v2068_v41 }
 0x2cb   :  { %1875 = vst.msk [vmem:[#allocation14 + $0x50] sm:$0xf] %vm1854_vm1, %v2807_v15  ;;  %2507 = vst.msk [vmem:[#allocation15 + $0x50] sm:$0xf] %vm1854_vm1, %v2871_v34  ;;  %v2808_v49 = vpack.c.bf16 %v1427_v56, %v1427_v56  ;;  %v2872_v17 = vpack.c.bf16 %v2060_v61, %v2060_v61 }
 0x2cc   :  { %1878 = vst.msk [vmem:[#allocation14 + $0x5c] sm:$0xf] %vm1854_vm1, %v2810_v62  ;;  %2510 = vst.msk [vmem:[#allocation15 + $0x5c] sm:$0xf] %vm1854_vm1, %v2874_v9 }
 0x2cd   :  { %1876 = vst.msk [vmem:[#allocation14 + $0x54] sm:$0xf] %vm1854_vm1, %v2808_v49  ;;  %2508 = vst.msk [vmem:[#allocation15 + $0x54] sm:$0xf] %vm1854_vm1, %v2872_v17 }
 0x2d1   :  { %v3013_v12 = vpop.f32.mrb[24].mxu0  ;;  %v3081_v50 = vpop.f32.mrb[24].mxu1 }
 0x2d2   :  { %v1448_v27 = vadd.f32 %v3013_v12, %v4542_v63  ;;  %v2081_v52 = vadd.f32 %v3081_v50, %v4544_v25  ;;  %v1439_v31 = vpop.f32.mrb[25].mxu0  ;;  %v2072_v16 = vpop.f32.mrb[25].mxu1 }
 0x2d3   :  { %v1440_v23 = vadd.f32 %v4542_v63, %v1439_v31  ;;  %v2073_v2 = vadd.f32 %v4544_v25, %v2072_v16  ;;  %v3014_v32 = vpop.f32.mrb[26].mxu0  ;;  %v3082_v60 = vpop.f32.mrb[26].mxu1 }
 0x2d4   :  { %v2813_v18 = vpack.c.bf16 %v1448_v27, %v1448_v27  ;;  %v2877_v44 = vpack.c.bf16 %v2081_v52, %v2081_v52  ;;  %v1451_v4 = vadd.f32 %v3014_v32, %v4542_v63  ;;  %v2084_v38 = vadd.f32 %v3082_v60, %v4544_v25  ;;  %v1442_v51 = vpop.f32.mrb[27].mxu0  ;;  %v2075_v53 = vpop.f32.mrb[27].mxu1 }
 0x2d5   :  { %v2811_v14 = vpack.c.bf16 %v1440_v23, %v1440_v23  ;;  %v2875_v35 = vpack.c.bf16 %v2073_v2, %v2073_v2  ;;  %v1443_v43 = vadd.f32 %v4542_v63, %v1442_v51  ;;  %v2076_v0 = vadd.f32 %v4544_v25, %v2075_v53 }
 0x2d6   :  { %1881 = vst.msk [vmem:[#allocation14 + $0x68] sm:$0xf] %vm1854_vm1, %v2813_v18  ;;  %2513 = vst.msk [vmem:[#allocation15 + $0x68] sm:$0xf] %vm1854_vm1, %v2877_v44  ;;  %v2814_v29 = vpack.c.bf16 %v1451_v4, %v1451_v4  ;;  %v2878_v36 = vpack.c.bf16 %v2084_v38, %v2084_v38 }
 0x2d7   :  { %1879 = vst.msk [vmem:[#allocation14 + $0x60] sm:$0xf] %vm1854_vm1, %v2811_v14  ;;  %2511 = vst.msk [vmem:[#allocation15 + $0x60] sm:$0xf] %vm1854_vm1, %v2875_v35  ;;  %v2812_v30 = vpack.c.bf16 %v1443_v43, %v1443_v43  ;;  %v2876_v55 = vpack.c.bf16 %v2076_v0, %v2076_v0 }
 0x2d8   :  { %1882 = vst.msk [vmem:[#allocation14 + $0x6c] sm:$0xf] %vm1854_vm1, %v2814_v29  ;;  %2514 = vst.msk [vmem:[#allocation15 + $0x6c] sm:$0xf] %vm1854_vm1, %v2878_v36 }
 0x2d9   :  { %1880 = vst.msk [vmem:[#allocation14 + $0x64] sm:$0xf] %vm1854_vm1, %v2812_v30  ;;  %2512 = vst.msk [vmem:[#allocation15 + $0x64] sm:$0xf] %vm1854_vm1, %v2876_v55  ;;  %v3017_v40 = vpop.f32.mrb[28].mxu0  ;;  %v3085_v45 = vpop.f32.mrb[28].mxu1 }
 0x2da   :  { %v1464_v3 = vadd.f32 %v3017_v40, %v4542_v63  ;;  %v2097_v1 = vadd.f32 %v3085_v45, %v4544_v25  ;;  %v1455_v58 = vpop.f32.mrb[29].mxu0  ;;  %v2088_v11 = vpop.f32.mrb[29].mxu1 }
 0x2db   :  { %v1456_v21 = vadd.f32 %v4542_v63, %v1455_v58  ;;  %v2089_v59 = vadd.f32 %v4544_v25, %v2088_v11  ;;  %v3018_v20 = vpop.f32.mrb[30].mxu0  ;;  %v3086_v8 = vpop.f32.mrb[30].mxu1 }
 0x2dc   :  { %v2817_v57 = vpack.c.bf16 %v1464_v3, %v1464_v3  ;;  %v2881_v6 = vpack.c.bf16 %v2097_v1, %v2097_v1  ;;  %v1467_v47 = vadd.f32 %v3018_v20, %v4542_v63  ;;  %v2100_v13 = vadd.f32 %v3086_v8, %v4544_v25  ;;  %v1458_v26 = vpop.f32.mrb[31].mxu0  ;;  %v2091_v24 = vpop.f32.mrb[31].mxu1 }
 0x2dd   :  { %v2815_v5 = vpack.c.bf16 %v1456_v21, %v1456_v21  ;;  %v2879_v54 = vpack.c.bf16 %v2089_v59, %v2089_v59  ;;  %v1459_v46 = vadd.f32 %v4542_v63, %v1458_v26  ;;  %v2092_v42 = vadd.f32 %v4544_v25, %v2091_v24 }
 0x2de   :  { %1885 = vst.msk [vmem:[#allocation14 + $0x78] sm:$0xf] %vm1854_vm1, %v2817_v57  ;;  %2517 = vst.msk [vmem:[#allocation15 + $0x78] sm:$0xf] %vm1854_vm1, %v2881_v6  ;;  %v2818_v37 = vpack.c.bf16 %v1467_v47, %v1467_v47  ;;  %v2882_v39 = vpack.c.bf16 %v2100_v13, %v2100_v13 }
 0x2df   :  { %1883 = vst.msk [vmem:[#allocation14 + $0x70] sm:$0xf] %vm1854_vm1, %v2815_v5  ;;  %2515 = vst.msk [vmem:[#allocation15 + $0x70] sm:$0xf] %vm1854_vm1, %v2879_v54  ;;  %v2816_v48 = vpack.c.bf16 %v1459_v46, %v1459_v46  ;;  %v2880_v22 = vpack.c.bf16 %v2092_v42, %v2092_v42 }
 0x2e0   :  { %1886 = vst.msk [vmem:[#allocation14 + $0x7c] sm:$0xf] %vm1854_vm1, %v2818_v37  ;;  %2518 = vst.msk [vmem:[#allocation15 + $0x7c] sm:$0xf] %vm1854_vm1, %v2882_v39 }
 0x2e1   :  { %1884 = vst.msk [vmem:[#allocation14 + $0x74] sm:$0xf] %vm1854_vm1, %v2816_v48  ;;  %2516 = vst.msk [vmem:[#allocation15 + $0x74] sm:$0xf] %vm1854_vm1, %v2880_v22  ;;  %v3021_v28 = vpop.f32.mrb[32].mxu0  ;;  %v3089_v19 = vpop.f32.mrb[32].mxu1 }
 0x2e2   :  { %v1480_v33 = vadd.f32 %v3021_v28, %v4542_v63  ;;  %v2113_v41 = vadd.f32 %v3089_v19, %v4544_v25  ;;  %v1471_v7 = vpop.f32.mrb[33].mxu0  ;;  %v2104_v10 = vpop.f32.mrb[33].mxu1 }
 0x2e3   :  { %v1472_v15 = vadd.f32 %v4542_v63, %v1471_v7  ;;  %v2105_v34 = vadd.f32 %v4544_v25, %v2104_v10  ;;  %v3022_v56 = vpop.f32.mrb[34].mxu0  ;;  %v3090_v61 = vpop.f32.mrb[34].mxu1 }
 0x2e4   :  { %v2821_v62 = vpack.c.bf16 %v1480_v33, %v1480_v33  ;;  %v2885_v9 = vpack.c.bf16 %v2113_v41, %v2113_v41  ;;  %v1483_v49 = vadd.f32 %v3022_v56, %v4542_v63  ;;  %v2116_v17 = vadd.f32 %v3090_v61, %v4544_v25  ;;  %v1474_v12 = vpop.f32.mrb[35].mxu0  ;;  %v2107_v50 = vpop.f32.mrb[35].mxu1 }
 0x2e5   :  { %v2819_v27 = vpack.c.bf16 %v1472_v15, %v1472_v15  ;;  %v2883_v52 = vpack.c.bf16 %v2105_v34, %v2105_v34  ;;  %v1475_v31 = vadd.f32 %v4542_v63, %v1474_v12  ;;  %v2108_v16 = vadd.f32 %v4544_v25, %v2107_v50 }
 0x2e6   :  { %1889 = vst.msk [vmem:[#allocation14 + $0x88] sm:$0xf] %vm1854_vm1, %v2821_v62  ;;  %2521 = vst.msk [vmem:[#allocation15 + $0x88] sm:$0xf] %vm1854_vm1, %v2885_v9  ;;  %v2822_v23 = vpack.c.bf16 %v1483_v49, %v1483_v49  ;;  %v2886_v2 = vpack.c.bf16 %v2116_v17, %v2116_v17 }
 0x2e7   :  { %1887 = vst.msk [vmem:[#allocation14 + $0x80] sm:$0xf] %vm1854_vm1, %v2819_v27  ;;  %2519 = vst.msk [vmem:[#allocation15 + $0x80] sm:$0xf] %vm1854_vm1, %v2883_v52  ;;  %v2820_v32 = vpack.c.bf16 %v1475_v31, %v1475_v31  ;;  %v2884_v60 = vpack.c.bf16 %v2108_v16, %v2108_v16 }
 0x2e8   :  { %1890 = vst.msk [vmem:[#allocation14 + $0x8c] sm:$0xf] %vm1854_vm1, %v2822_v23  ;;  %2522 = vst.msk [vmem:[#allocation15 + $0x8c] sm:$0xf] %vm1854_vm1, %v2886_v2 }
 0x2e9   :  { %1888 = vst.msk [vmem:[#allocation14 + $0x84] sm:$0xf] %vm1854_vm1, %v2820_v32  ;;  %2520 = vst.msk [vmem:[#allocation15 + $0x84] sm:$0xf] %vm1854_vm1, %v2884_v60  ;;  %v3025_v18 = vpop.f32.mrb[36].mxu0  ;;  %v3093_v44 = vpop.f32.mrb[36].mxu1 }
 0x2ea   :  { %v1496_v4 = vadd.f32 %v3025_v18, %v4542_v63  ;;  %v2129_v38 = vadd.f32 %v3093_v44, %v4544_v25  ;;  %v1487_v51 = vpop.f32.mrb[37].mxu0  ;;  %v2120_v53 = vpop.f32.mrb[37].mxu1 }
 0x2eb   :  { %v1488_v14 = vadd.f32 %v4542_v63, %v1487_v51  ;;  %v2121_v35 = vadd.f32 %v4544_v25, %v2120_v53  ;;  %v3026_v43 = vpop.f32.mrb[38].mxu0  ;;  %v3094_v0 = vpop.f32.mrb[38].mxu1 }
 0x2ec   :  { %v2825_v29 = vpack.c.bf16 %v1496_v4, %v1496_v4  ;;  %v2889_v36 = vpack.c.bf16 %v2129_v38, %v2129_v38  ;;  %v1499_v30 = vadd.f32 %v3026_v43, %v4542_v63  ;;  %v2132_v55 = vadd.f32 %v3094_v0, %v4544_v25  ;;  %v1490_v40 = vpop.f32.mrb[39].mxu0  ;;  %v2123_v45 = vpop.f32.mrb[39].mxu1 }
 0x2ed   :  { %v2823_v3 = vpack.c.bf16 %v1488_v14, %v1488_v14  ;;  %v2887_v1 = vpack.c.bf16 %v2121_v35, %v2121_v35  ;;  %v1491_v58 = vadd.f32 %v4542_v63, %v1490_v40  ;;  %v2124_v11 = vadd.f32 %v4544_v25, %v2123_v45 }
 0x2ee   :  { %1893 = vst.msk [vmem:[#allocation14 + $0x98] sm:$0xf] %vm1854_vm1, %v2825_v29  ;;  %2525 = vst.msk [vmem:[#allocation15 + $0x98] sm:$0xf] %vm1854_vm1, %v2889_v36  ;;  %v2826_v21 = vpack.c.bf16 %v1499_v30, %v1499_v30  ;;  %v2890_v59 = vpack.c.bf16 %v2132_v55, %v2132_v55 }
 0x2ef   :  { %1891 = vst.msk [vmem:[#allocation14 + $0x90] sm:$0xf] %vm1854_vm1, %v2823_v3  ;;  %2523 = vst.msk [vmem:[#allocation15 + $0x90] sm:$0xf] %vm1854_vm1, %v2887_v1  ;;  %v2824_v20 = vpack.c.bf16 %v1491_v58, %v1491_v58  ;;  %v2888_v8 = vpack.c.bf16 %v2124_v11, %v2124_v11 }
 0x2f0   :  { %1894 = vst.msk [vmem:[#allocation14 + $0x9c] sm:$0xf] %vm1854_vm1, %v2826_v21  ;;  %2526 = vst.msk [vmem:[#allocation15 + $0x9c] sm:$0xf] %vm1854_vm1, %v2890_v59 }
 0x2f1   :  { %1892 = vst.msk [vmem:[#allocation14 + $0x94] sm:$0xf] %vm1854_vm1, %v2824_v20  ;;  %2524 = vst.msk [vmem:[#allocation15 + $0x94] sm:$0xf] %vm1854_vm1, %v2888_v8  ;;  %v3029_v57 = vpop.f32.mrb[40].mxu0  ;;  %v3097_v6 = vpop.f32.mrb[40].mxu1 }
 0x2f2   :  { %v1512_v47 = vadd.f32 %v3029_v57, %v4542_v63  ;;  %v2145_v13 = vadd.f32 %v3097_v6, %v4544_v25  ;;  %v1503_v26 = vpop.f32.mrb[41].mxu0  ;;  %v2136_v24 = vpop.f32.mrb[41].mxu1 }
 0x2f3   :  { %v1504_v5 = vadd.f32 %v4542_v63, %v1503_v26  ;;  %v2137_v54 = vadd.f32 %v4544_v25, %v2136_v24  ;;  %v3030_v46 = vpop.f32.mrb[42].mxu0  ;;  %v3098_v42 = vpop.f32.mrb[42].mxu1 }
 0x2f4   :  { %v2829_v37 = vpack.c.bf16 %v1512_v47, %v1512_v47  ;;  %v2893_v39 = vpack.c.bf16 %v2145_v13, %v2145_v13  ;;  %v1515_v48 = vadd.f32 %v3030_v46, %v4542_v63  ;;  %v2148_v22 = vadd.f32 %v3098_v42, %v4544_v25  ;;  %v1506_v28 = vpop.f32.mrb[43].mxu0  ;;  %v2139_v19 = vpop.f32.mrb[43].mxu1 }
 0x2f5   :  { %v2827_v33 = vpack.c.bf16 %v1504_v5, %v1504_v5  ;;  %v2891_v41 = vpack.c.bf16 %v2137_v54, %v2137_v54  ;;  %v1507_v7 = vadd.f32 %v4542_v63, %v1506_v28  ;;  %v2140_v10 = vadd.f32 %v4544_v25, %v2139_v19 }
 0x2f6   :  { %1897 = vst.msk [vmem:[#allocation14 + $0xa8] sm:$0xf] %vm1854_vm1, %v2829_v37  ;;  %2529 = vst.msk [vmem:[#allocation15 + $0xa8] sm:$0xf] %vm1854_vm1, %v2893_v39  ;;  %v2830_v15 = vpack.c.bf16 %v1515_v48, %v1515_v48  ;;  %v2894_v34 = vpack.c.bf16 %v2148_v22, %v2148_v22 }
 0x2f7   :  { %1895 = vst.msk [vmem:[#allocation14 + $0xa0] sm:$0xf] %vm1854_vm1, %v2827_v33  ;;  %2527 = vst.msk [vmem:[#allocation15 + $0xa0] sm:$0xf] %vm1854_vm1, %v2891_v41  ;;  %v2828_v56 = vpack.c.bf16 %v1507_v7, %v1507_v7  ;;  %v2892_v61 = vpack.c.bf16 %v2140_v10, %v2140_v10 }
 0x2f8   :  { %1898 = vst.msk [vmem:[#allocation14 + $0xac] sm:$0xf] %vm1854_vm1, %v2830_v15  ;;  %2530 = vst.msk [vmem:[#allocation15 + $0xac] sm:$0xf] %vm1854_vm1, %v2894_v34 }
 0x2f9   :  { %1896 = vst.msk [vmem:[#allocation14 + $0xa4] sm:$0xf] %vm1854_vm1, %v2828_v56  ;;  %2528 = vst.msk [vmem:[#allocation15 + $0xa4] sm:$0xf] %vm1854_vm1, %v2892_v61  ;;  %v3033_v62 = vpop.f32.mrb[44].mxu0  ;;  %v3101_v9 = vpop.f32.mrb[44].mxu1 }
 0x2fa   :  { %v1528_v49 = vadd.f32 %v3033_v62, %v4542_v63  ;;  %v2161_v17 = vadd.f32 %v3101_v9, %v4544_v25  ;;  %v1519_v12 = vpop.f32.mrb[45].mxu0  ;;  %v2152_v50 = vpop.f32.mrb[45].mxu1 }
 0x2fb   :  { %v1520_v27 = vadd.f32 %v4542_v63, %v1519_v12  ;;  %v2153_v52 = vadd.f32 %v4544_v25, %v2152_v50  ;;  %v3034_v31 = vpop.f32.mrb[46].mxu0  ;;  %v3102_v16 = vpop.f32.mrb[46].mxu1 }
 0x2fc   :  { %v2833_v23 = vpack.c.bf16 %v1528_v49, %v1528_v49  ;;  %v2897_v2 = vpack.c.bf16 %v2161_v17, %v2161_v17  ;;  %v1531_v32 = vadd.f32 %v3034_v31, %v4542_v63  ;;  %v2164_v60 = vadd.f32 %v3102_v16, %v4544_v25  ;;  %v1522_v18 = vpop.f32.mrb[47].mxu0  ;;  %v2155_v44 = vpop.f32.mrb[47].mxu1 }
 0x2fd   :  { %v2831_v4 = vpack.c.bf16 %v1520_v27, %v1520_v27  ;;  %v2895_v38 = vpack.c.bf16 %v2153_v52, %v2153_v52  ;;  %v1523_v51 = vadd.f32 %v4542_v63, %v1522_v18  ;;  %v2156_v53 = vadd.f32 %v4544_v25, %v2155_v44 }
 0x2fe   :  { %1901 = vst.msk [vmem:[#allocation14 + $0xb8] sm:$0xf] %vm1854_vm1, %v2833_v23  ;;  %2533 = vst.msk [vmem:[#allocation15 + $0xb8] sm:$0xf] %vm1854_vm1, %v2897_v2  ;;  %v2834_v14 = vpack.c.bf16 %v1531_v32, %v1531_v32  ;;  %v2898_v35 = vpack.c.bf16 %v2164_v60, %v2164_v60 }
 0x2ff   :  { %1899 = vst.msk [vmem:[#allocation14 + $0xb0] sm:$0xf] %vm1854_vm1, %v2831_v4  ;;  %2531 = vst.msk [vmem:[#allocation15 + $0xb0] sm:$0xf] %vm1854_vm1, %v2895_v38  ;;  %v2832_v43 = vpack.c.bf16 %v1523_v51, %v1523_v51  ;;  %v2896_v0 = vpack.c.bf16 %v2156_v53, %v2156_v53 }
 0x300   :  { %1902 = vst.msk [vmem:[#allocation14 + $0xbc] sm:$0xf] %vm1854_vm1, %v2834_v14  ;;  %2534 = vst.msk [vmem:[#allocation15 + $0xbc] sm:$0xf] %vm1854_vm1, %v2898_v35 }
 0x301   :  { %1900 = vst.msk [vmem:[#allocation14 + $0xb4] sm:$0xf] %vm1854_vm1, %v2832_v43  ;;  %2532 = vst.msk [vmem:[#allocation15 + $0xb4] sm:$0xf] %vm1854_vm1, %v2896_v0  ;;  %v3037_v29 = vpop.f32.mrb[48].mxu0  ;;  %v3105_v36 = vpop.f32.mrb[48].mxu1 }
 0x302   :  { %v1544_v30 = vadd.f32 %v3037_v29, %v4542_v63  ;;  %v2177_v55 = vadd.f32 %v3105_v36, %v4544_v25  ;;  %v1535_v40 = vpop.f32.mrb[49].mxu0  ;;  %v2168_v45 = vpop.f32.mrb[49].mxu1 }
 0x303   :  { %v1536_v3 = vadd.f32 %v4542_v63, %v1535_v40  ;;  %v2169_v1 = vadd.f32 %v4544_v25, %v2168_v45  ;;  %v3038_v58 = vpop.f32.mrb[50].mxu0  ;;  %v3106_v11 = vpop.f32.mrb[50].mxu1 }
 0x304   :  { %v2837_v21 = vpack.c.bf16 %v1544_v30, %v1544_v30  ;;  %v2901_v59 = vpack.c.bf16 %v2177_v55, %v2177_v55  ;;  %v1547_v20 = vadd.f32 %v3038_v58, %v4542_v63  ;;  %v2180_v8 = vadd.f32 %v3106_v11, %v4544_v25  ;;  %v1538_v57 = vpop.f32.mrb[51].mxu0  ;;  %v2171_v6 = vpop.f32.mrb[51].mxu1 }
 0x305   :  { %v2835_v47 = vpack.c.bf16 %v1536_v3, %v1536_v3  ;;  %v2899_v13 = vpack.c.bf16 %v2169_v1, %v2169_v1  ;;  %v1539_v26 = vadd.f32 %v4542_v63, %v1538_v57  ;;  %v2172_v24 = vadd.f32 %v4544_v25, %v2171_v6 }
 0x306   :  { %1905 = vst.msk [vmem:[#allocation14 + $0xc8] sm:$0xf] %vm1854_vm1, %v2837_v21  ;;  %2537 = vst.msk [vmem:[#allocation15 + $0xc8] sm:$0xf] %vm1854_vm1, %v2901_v59  ;;  %v2838_v5 = vpack.c.bf16 %v1547_v20, %v1547_v20  ;;  %v2902_v54 = vpack.c.bf16 %v2180_v8, %v2180_v8 }
 0x307   :  { %1903 = vst.msk [vmem:[#allocation14 + $0xc0] sm:$0xf] %vm1854_vm1, %v2835_v47  ;;  %2535 = vst.msk [vmem:[#allocation15 + $0xc0] sm:$0xf] %vm1854_vm1, %v2899_v13  ;;  %v2836_v46 = vpack.c.bf16 %v1539_v26, %v1539_v26  ;;  %v2900_v42 = vpack.c.bf16 %v2172_v24, %v2172_v24 }
 0x308   :  { %1906 = vst.msk [vmem:[#allocation14 + $0xcc] sm:$0xf] %vm1854_vm1, %v2838_v5  ;;  %2538 = vst.msk [vmem:[#allocation15 + $0xcc] sm:$0xf] %vm1854_vm1, %v2902_v54 }
 0x309   :  { %1904 = vst.msk [vmem:[#allocation14 + $0xc4] sm:$0xf] %vm1854_vm1, %v2836_v46  ;;  %2536 = vst.msk [vmem:[#allocation15 + $0xc4] sm:$0xf] %vm1854_vm1, %v2900_v42  ;;  %v3041_v37 = vpop.f32.mrb[52].mxu0  ;;  %v3109_v39 = vpop.f32.mrb[52].mxu1 }
 0x30a   :  { %v1560_v48 = vadd.f32 %v3041_v37, %v4542_v63  ;;  %v2193_v22 = vadd.f32 %v3109_v39, %v4544_v25  ;;  %v1551_v28 = vpop.f32.mrb[53].mxu0  ;;  %v2184_v19 = vpop.f32.mrb[53].mxu1 }
 0x30b   :  { %v1552_v33 = vadd.f32 %v4542_v63, %v1551_v28  ;;  %v2185_v41 = vadd.f32 %v4544_v25, %v2184_v19  ;;  %v3042_v7 = vpop.f32.mrb[54].mxu0  ;;  %v3110_v10 = vpop.f32.mrb[54].mxu1 }
 0x30c   :  { %v2841_v15 = vpack.c.bf16 %v1560_v48, %v1560_v48  ;;  %v2905_v34 = vpack.c.bf16 %v2193_v22, %v2193_v22  ;;  %v1563_v56 = vadd.f32 %v3042_v7, %v4542_v63  ;;  %v2196_v61 = vadd.f32 %v3110_v10, %v4544_v25  ;;  %v1554_v62 = vpop.f32.mrb[55].mxu0  ;;  %v2187_v9 = vpop.f32.mrb[55].mxu1 }
 0x30d   :  { %v2839_v49 = vpack.c.bf16 %v1552_v33, %v1552_v33  ;;  %v2903_v17 = vpack.c.bf16 %v2185_v41, %v2185_v41  ;;  %v1555_v12 = vadd.f32 %v4542_v63, %v1554_v62  ;;  %v2188_v50 = vadd.f32 %v4544_v25, %v2187_v9 }
 0x30e   :  { %1909 = vst.msk [vmem:[#allocation14 + $0xd8] sm:$0xf] %vm1854_vm1, %v2841_v15  ;;  %2541 = vst.msk [vmem:[#allocation15 + $0xd8] sm:$0xf] %vm1854_vm1, %v2905_v34  ;;  %v2842_v27 = vpack.c.bf16 %v1563_v56, %v1563_v56  ;;  %v2906_v52 = vpack.c.bf16 %v2196_v61, %v2196_v61 }
 0x30f   :  { %1907 = vst.msk [vmem:[#allocation14 + $0xd0] sm:$0xf] %vm1854_vm1, %v2839_v49  ;;  %2539 = vst.msk [vmem:[#allocation15 + $0xd0] sm:$0xf] %vm1854_vm1, %v2903_v17  ;;  %v2840_v31 = vpack.c.bf16 %v1555_v12, %v1555_v12  ;;  %v2904_v16 = vpack.c.bf16 %v2188_v50, %v2188_v50 }
 0x310   :  { %1910 = vst.msk [vmem:[#allocation14 + $0xdc] sm:$0xf] %vm1854_vm1, %v2842_v27  ;;  %2542 = vst.msk [vmem:[#allocation15 + $0xdc] sm:$0xf] %vm1854_vm1, %v2906_v52 }
 0x311   :  { %1908 = vst.msk [vmem:[#allocation14 + $0xd4] sm:$0xf] %vm1854_vm1, %v2840_v31  ;;  %2540 = vst.msk [vmem:[#allocation15 + $0xd4] sm:$0xf] %vm1854_vm1, %v2904_v16  ;;  %v3045_v23 = vpop.f32.mrb[56].mxu0  ;;  %v3113_v2 = vpop.f32.mrb[56].mxu1 }
 0x312   :  { %v1576_v32 = vadd.f32 %v3045_v23, %v4542_v63  ;;  %v2209_v60 = vadd.f32 %v3113_v2, %v4544_v25  ;;  %v1567_v18 = vpop.f32.mrb[57].mxu0  ;;  %v2200_v44 = vpop.f32.mrb[57].mxu1 }
 0x313   :  { %v1568_v4 = vadd.f32 %v4542_v63, %v1567_v18  ;;  %v2201_v38 = vadd.f32 %v4544_v25, %v2200_v44  ;;  %v3046_v51 = vpop.f32.mrb[58].mxu0  ;;  %v3114_v53 = vpop.f32.mrb[58].mxu1 }
 0x314   :  { %v2845_v14 = vpack.c.bf16 %v1576_v32, %v1576_v32  ;;  %v2909_v35 = vpack.c.bf16 %v2209_v60, %v2209_v60  ;;  %v1579_v43 = vadd.f32 %v3046_v51, %v4542_v63  ;;  %v2212_v0 = vadd.f32 %v3114_v53, %v4544_v25  ;;  %v1570_v29 = vpop.f32.mrb[59].mxu0  ;;  %v2203_v36 = vpop.f32.mrb[59].mxu1 }
 0x315   :  { %v2843_v30 = vpack.c.bf16 %v1568_v4, %v1568_v4  ;;  %v2907_v55 = vpack.c.bf16 %v2201_v38, %v2201_v38  ;;  %v1571_v40 = vadd.f32 %v4542_v63, %v1570_v29  ;;  %v2204_v45 = vadd.f32 %v4544_v25, %v2203_v36 }
 0x316   :  { %1913 = vst.msk [vmem:[#allocation14 + $0xe8] sm:$0xf] %vm1854_vm1, %v2845_v14  ;;  %2545 = vst.msk [vmem:[#allocation15 + $0xe8] sm:$0xf] %vm1854_vm1, %v2909_v35  ;;  %v2846_v3 = vpack.c.bf16 %v1579_v43, %v1579_v43  ;;  %v2910_v1 = vpack.c.bf16 %v2212_v0, %v2212_v0 }
 0x317   :  { %1911 = vst.msk [vmem:[#allocation14 + $0xe0] sm:$0xf] %vm1854_vm1, %v2843_v30  ;;  %2543 = vst.msk [vmem:[#allocation15 + $0xe0] sm:$0xf] %vm1854_vm1, %v2907_v55  ;;  %v2844_v58 = vpack.c.bf16 %v1571_v40, %v1571_v40  ;;  %v2908_v11 = vpack.c.bf16 %v2204_v45, %v2204_v45 }
 0x318   :  { %1914 = vst.msk [vmem:[#allocation14 + $0xec] sm:$0xf] %vm1854_vm1, %v2846_v3  ;;  %2546 = vst.msk [vmem:[#allocation15 + $0xec] sm:$0xf] %vm1854_vm1, %v2910_v1 }
 0x319   :  { %1912 = vst.msk [vmem:[#allocation14 + $0xe4] sm:$0xf] %vm1854_vm1, %v2844_v58  ;;  %2544 = vst.msk [vmem:[#allocation15 + $0xe4] sm:$0xf] %vm1854_vm1, %v2908_v11 }
 0x35e   :  { %v3049_v21 = vpop.f32.mrb[60].mxu0  ;;  %v3117_v59 = vpop.f32.mrb[60].mxu1 }
 0x35f   :  { %v1592_v20 = vadd.f32 %v3049_v21, %v4542_v63  ;;  %v2225_v8 = vadd.f32 %v3117_v59, %v4544_v25  ;;  %v1583_v57 = vpop.f32.mrb[61].mxu0  ;;  %v2216_v6 = vpop.f32.mrb[61].mxu1 }
 0x360   :  { %v1584_v47 = vadd.f32 %v4542_v63, %v1583_v57  ;;  %v2217_v13 = vadd.f32 %v4544_v25, %v2216_v6  ;;  %v3050_v26 = vpop.f32.mrb[62].mxu0  ;;  %v3118_v24 = vpop.f32.mrb[62].mxu1 }
 0x361   :  { %v2849_v5 = vpack.c.bf16 %v1592_v20, %v1592_v20  ;;  %v2913_v54 = vpack.c.bf16 %v2225_v8, %v2225_v8  ;;  %v1595_v46 = vadd.f32 %v3050_v26, %v4542_v63  ;;  %v2228_v42 = vadd.f32 %v3118_v24, %v4544_v25  ;;  %v1586_v37 = vpop.f32.mrb[63].mxu0  ;;  %v2219_v39 = vpop.f32.mrb[63].mxu1 }
 0x362   :  { %v2847_v48 = vpack.c.bf16 %v1584_v47, %v1584_v47  ;;  %v2911_v22 = vpack.c.bf16 %v2217_v13, %v2217_v13  ;;  %v1587_v28 = vadd.f32 %v4542_v63, %v1586_v37  ;;  %v2220_v19 = vadd.f32 %v4544_v25, %v2219_v39 }
 0x363   :  { %1917 = vst.msk [vmem:[#allocation14 + $0xf8] sm:$0xf] %vm1854_vm1, %v2849_v5  ;;  %2549 = vst.msk [vmem:[#allocation15 + $0xf8] sm:$0xf] %vm1854_vm1, %v2913_v54  ;;  %v2850_v33 = vpack.c.bf16 %v1595_v46, %v1595_v46  ;;  %v2914_v41 = vpack.c.bf16 %v2228_v42, %v2228_v42 }
 0x364   :  { %1915 = vst.msk [vmem:[#allocation14 + $0xf0] sm:$0xf] %vm1854_vm1, %v2847_v48  ;;  %2547 = vst.msk [vmem:[#allocation15 + $0xf0] sm:$0xf] %vm1854_vm1, %v2911_v22  ;;  %v2848_v7 = vpack.c.bf16 %v1587_v28, %v1587_v28  ;;  %v2912_v10 = vpack.c.bf16 %v2220_v19, %v2220_v19 }
 0x365   :  { %1918 = vst.msk [vmem:[#allocation14 + $0xfc] sm:$0xf] %vm1854_vm1, %v2850_v33  ;;  %2550 = vst.msk [vmem:[#allocation15 + $0xfc] sm:$0xf] %vm1854_vm1, %v2914_v41 }
 0x366   :  { %1916 = vst.msk [vmem:[#allocation14 + $0xf4] sm:$0xf] %vm1854_vm1, %v2848_v7  ;;  %2548 = vst.msk [vmem:[#allocation15 + $0xf4] sm:$0xf] %vm1854_vm1, %v2912_v10 }
 0x367   :  { %3431 = shalt.err (!%p3428_p4)
}
 0x368   :  { %s3432_s9 = scalar_lea.hbm %s4846_s7, 4096 }
 0x369   :  { %p3433_p5 = scmp.ne.s32.totalorder %s4846_s7, %s3432_s9  ;;  %p3436_p6 = scmp.lt.u32.totalorder %s3432_s9, %s4846_s7 }
 0x36b   :  { %p3438_p7 = pnand %p3436_p6, %p3433_p5 }
 0x36d   :  { %3441 = shalt.err (!%p3438_p7)
}
 0x36e   :  { %2562 = dma.vmem_to_hbm [thread:$0]  %s2557_s23, 4096, %s4846_s7, [#allocation4], %s3478_s1, %s3478_s1, %s3479_s28  }
 0x36f   :  { %s3442_s15 = scalar_lea.vmem %s4800_s25, 4096  ;;  %p3447_p9 = scmp.lt.s32.totalorder %s4800_s25, %s4800_s25 }
 0x370   :  { %p3443_p8 = scmp.ne.s32.totalorder %s4800_s25, %s3442_s15  ;;  %p3448_p10 = scmp.lt.s32.totalorder %s3442_s15, %s3442_s15 }
 0x372   :  { %p3449_p11 = por %p3448_p10, %p3447_p9 }
 0x374   :  { %p3450_p12 = pnand %p3449_p11, %p3443_p8 }
 0x376   :  { %3453 = shalt.err (!%p3450_p12)
}
 0x377   :  { %s3454_s19 = scalar_lea.hbm %s4847_s8, 4096 }
 0x378   :  { %p3455_p13 = scmp.ne.s32.totalorder %s4847_s8, %s3454_s19  ;;  %p3458_p0 = scmp.lt.u32.totalorder %s3454_s19, %s4847_s8 }
 0x37a   :  { %p3460_p1 = pnand %p3458_p0, %p3455_p13 }
 0x37c   :  { %3463 = shalt.err (!%p3460_p1)
}
 0x37d   :  { %2574 = dma.vmem_to_hbm [thread:$0]  %s4800_s25, 4096, %s4847_s8, [#allocation16], %s3478_s1, %s3478_s1, %s3479_s28  }
 0x37e   :  { %3472 = dma.done.wait [#allocation4], 4096  }
 0x37f   :  { %3473 = vsyncadd [#allocation4], 4294963200 }
 0x380   :  { %3474 = dma.done.wait [#allocation16], 4096  }
 0x381   :  { %3475 = vsyncadd [#allocation16], 4294963200 }
 0x382   :  { %2581 = vsyncpa [#allocation3], 1 }
 0x383   :  { %2582 = vsyncpa [#allocation6], 1 }
 0x384   :  { %2583 = vsyncpa [#allocation9], 1 }
 0x385   :  { %2584 = vsyncpa [#allocation12], 1 }
 0x386   :  { %2585 = vsyncpa [#allocation4], 1 }
 0x387   :  { %2586 = vsyncpa [#allocation16], 1 }

</bundles_post_ra>
